<compile_context>
chip_gen: v5e
topology: v5e:2x2
jax: 0.10.0
libtpu: 0.0.40
codegen_flags: <defaults>
</compile_context>

<pallas_src>
import functools

import jax
import jax.numpy as jnp
from jax.experimental import pallas as pl
from jax.experimental.pallas import tpu as pltpu


_VMEM_LIMIT = 64 * 1024 * 1024  # explicit scoped-VMEM cap (tiles use far less)
_TM_MAX = 512                   # safe on v7x (64 MiB VMEM); good on v6e/v5e too
_TK_MAX = 1024
_TN_MAX = 512


# ----------------------------------------------------------------------------
# Small helpers
# ----------------------------------------------------------------------------
def _round_up(x, m):
    return -(-x // m) * m


def _pick_tile(dim, max_tile, quantum=128):
    """dim is a multiple of `quantum`; largest multiple-of-quantum divisor <= max_tile."""
    q = dim // quantum
    best = 1
    for d in range(1, q + 1):
        if q % d == 0 and quantum * d <= max_tile:
            best = d
    return quantum * best


def _pick_tm(M, max_tm=_TM_MAX):
    """Return (tm, Mp) with tm % 8 == 0 and Mp % tm == 0."""
    Mp = _round_up(M, 8)
    if Mp <= max_tm:
        return Mp, Mp
    return max_tm, _round_up(M, max_tm)


def _pad2d(a, rows, cols):
    r, c = a.shape
    if rows == r and cols == c:
        return a
    return jnp.pad(a, ((0, rows - r), (0, cols - c)))


# ----------------------------------------------------------------------------
# Pallas kernels
# ----------------------------------------------------------------------------
def _conv_mm_kernel(p_ref, w_ref, b_ref, o_ref, acc_ref, *, slope):
    """Tiled (patches @ W) + bias [+ leaky_relu]; K-reduction on grid axis 2."""
    k = pl.program_id(2)

    @pl.when(k == 0)
    def _():
        acc_ref[...] = jnp.zeros_like(acc_ref)

    acc_ref[...] += jnp.dot(p_ref[...], w_ref[...],
                            preferred_element_type=jnp.float32)

    @pl.when(k == pl.num_programs(2) - 1)
    def _():
        y = acc_ref[...] + b_ref[...]
        if slope is not None:
            y = jnp.where(y >= 0, y, jnp.float32(slope) * y)
        o_ref[...] = y.astype(o_ref.dtype)


def _conv_mm_skip_kernel(p_ref, xs_ref, w_ref, ws_ref, b_ref, o_ref, acc_ref,
                         *, slope):
    """Fused: (patches @ W2) + (x_strided @ W3)  [1x1 skip conv] + bias + lrelu."""
    k = pl.program_id(2)

    @pl.when(k == 0)
    def _():
        # 1x1 skip conv computed once per (M, N) tile, directly into the acc.
        acc_ref[...] = jnp.dot(xs_ref[...], ws_ref[...],
                               preferred_element_type=jnp.float32)

    acc_ref[...] += jnp.dot(p_ref[...], w_ref[...],
                            preferred_element_type=jnp.float32)

    @pl.when(k == pl.num_programs(2) - 1)
    def _():
        y = acc_ref[...] + b_ref[...]
        y = jnp.where(y >= 0, y, jnp.float32(slope) * y)
        o_ref[...] = y.astype(o_ref.dtype)


def _head_kernel(p_ref, w1_ref, b1_ref, w2_ref, b2_ref, o_ref, acc_ref):
    """Fused head: 3x3 conv (256->512) + LeakyReLU(0.01) + 1x1 conv (512->1)."""
    k = pl.program_id(1)

    @pl.when(k == 0)
    def _():
        acc_ref[...] = jnp.zeros_like(acc_ref)

    acc_ref[...] += jnp.dot(p_ref[...], w1_ref[...],
                            preferred_element_type=jnp.float32)

    @pl.when(k == pl.num_programs(1) - 1)
    def _():
        y = acc_ref[...] + b1_ref[...]
        y = jnp.where(y >= 0, y, jnp.float32(0.01) * y)   # nn.LeakyReLU() default
        o = jnp.dot(y, w2_ref[...], preferred_element_type=jnp.float32)
        o_ref[...] = (o + b2_ref[...]).astype(o_ref.dtype)


# ----------------------------------------------------------------------------
# Pallas-call wrappers (tiled grids)
# ----------------------------------------------------------------------------
def _tiled_conv_mm(patches, w2d, bias, xs=None, ws=None, *, slope, out_dtype):
    """patches (M, Kp) bf16; w2d (Kp, Coutp) bf16; bias (1, Coutp) f32;
    optional fused 1x1 skip: xs (M, Cxp) bf16, ws (Cxp, Coutp) bf16."""
    M, Kp = patches.shape
    Coutp = w2d.shape[1]
    tm, Mp = _pick_tm(M)
    tk = _pick_tile(Kp, _TK_MAX)
    tn = _pick_tile(Coutp, _TN_MAX)

    patches = _pad2d(patches, Mp, Kp)
    grid = (Mp // tm, Coutp // tn, Kp // tk)

    in_specs = [pl.BlockSpec((tm, tk), lambda i, j, k: (i, k))]
    args = [patches]
    if xs is not None:
        Cxp = xs.shape[1]
        xs = _pad2d(xs, Mp, Cxp)
        # index_map independent of k -> block stays resident across the K loop.
        in_specs.append(pl.BlockSpec((tm, Cxp), lambda i, j, k: (i, 0)))
        args.append(xs)
    in_specs.append(pl.BlockSpec((tk, tn), lambda i, j, k: (k, j)))
    args.append(w2d)
    if ws is not None:
        in_specs.append(pl.BlockSpec((ws.shape[0], tn), lambda i, j, k: (0, j)))
        args.append(ws)
    in_specs.append(pl.BlockSpec((1, tn), lambda i, j, k: (0, j)))
    args.append(bias)

    if xs is None:
        kernel = functools.partial(_conv_mm_kernel, slope=slope)
    else:
        kernel = functools.partial(_conv_mm_skip_kernel, slope=slope)

    flops = 2 * Mp * Kp * Coutp
    bytes_accessed = (patches.size * patches.dtype.itemsize
                      + w2d.size * w2d.dtype.itemsize
                      + bias.size * 4
                      + Mp * Coutp * jnp.dtype(out_dtype).itemsize)
    if xs is not None:
        flops += 2 * Mp * xs.shape[1] * Coutp
        bytes_accessed += xs.size * xs.dtype.itemsize + ws.size * ws.dtype.itemsize

    out = pl.pallas_call(
        kernel,
        out_shape=jax.ShapeDtypeStruct((Mp, Coutp), out_dtype),
        grid=grid,
        in_specs=in_specs,
        out_specs=pl.BlockSpec((tm, tn), lambda i, j, k: (i, j)),
        scratch_shapes=[pltpu.VMEM((tm, tn), jnp.float32)],
        compiler_params=pltpu.CompilerParams(
            dimension_semantics=("parallel", "parallel", "arbitrary"),
            vmem_limit_bytes=_VMEM_LIMIT),
        cost_estimate=pl.CostEstimate(flops=int(flops), transcendentals=0,
                                      bytes_accessed=int(bytes_accessed)),
    )(*args)
    return out[:M]


def _head_call(patches, w1_2d, b1_2d, w2_2d, b2_2d):
    """Fused head kernel launch. patches (M, Kp) bf16; w1 (Kp, 512) bf16;
    b1 (1, 512) f32; w2 (512, 128) f32 (Cout=1 padded to 128); b2 (1, 128) f32."""
    M, Kp = patches.shape
    Cmid = w1_2d.shape[1]
    Coutp = w2_2d.shape[1]
    tm, Mp = _pick_tm(M)
    tk = _pick_tile(Kp, _TK_MAX)
    patches = _pad2d(patches, Mp, Kp)
    grid = (Mp // tm, Kp // tk)

    flops = 2 * Mp * Kp * Cmid + 2 * Mp * Cmid * Coutp
    bytes_accessed = (patches.size * patches.dtype.itemsize
                      + w1_2d.size * 2 + w2_2d.size * 4 + Mp * Coutp * 4)

    out = pl.pallas_call(
        _head_kernel,
        out_shape=jax.ShapeDtypeStruct((Mp, Coutp), jnp.float32),
        grid=grid,
        in_specs=[
            pl.BlockSpec((tm, tk), lambda i, k: (i, k)),
            pl.BlockSpec((tk, Cmid), lambda i, k: (k, 0)),
            pl.BlockSpec((1, Cmid), lambda i, k: (0, 0)),
            pl.BlockSpec((Cmid, Coutp), lambda i, k: (0, 0)),
            pl.BlockSpec((1, Coutp), lambda i, k: (0, 0)),
        ],
        out_specs=pl.BlockSpec((tm, Coutp), lambda i, k: (i, 0)),
        scratch_shapes=[pltpu.VMEM((tm, Cmid), jnp.float32)],
        compiler_params=pltpu.CompilerParams(
            dimension_semantics=("parallel", "arbitrary"),
            vmem_limit_bytes=_VMEM_LIMIT),
        cost_estimate=pl.CostEstimate(flops=int(flops), transcendentals=0,
                                      bytes_accessed=int(bytes_accessed)),
    )(patches, w1_2d, b1_2d, w2_2d, b2_2d)
    return out[:M, :1]


# ----------------------------------------------------------------------------
# Plain-JAX glue: im2col + weight/bias prep (padding to MXU-friendly shapes)
# ----------------------------------------------------------------------------
def im2col(x, ksize, stride, padding):
    """x: (N, H, W, C) -> patches (N*Ho*Wo, ksize*ksize*C), plus (N, Ho, Wo)."""
    N, H, W, C = x.shape
    xp = jnp.pad(x, ((0, 0), (padding, padding), (padding, padding), (0, 0)))
    Ho = (H + 2 * padding - ksize) // stride + 1
    Wo = (W + 2 * padding - ksize) // stride + 1
    cols = []
    for kh in range(ksize):
        for kw in range(ksize):
            cols.append(xp[:,
                           kh: kh + stride * (Ho - 1) + 1: stride,
                           kw: kw + stride * (Wo - 1) + 1: stride,
                           :])
    patches = jnp.concatenate(cols, axis=-1)            # (N, Ho, Wo, k*k*C)
    return patches.reshape(N * Ho * Wo, ksize * ksize * C), (N, Ho, Wo)


def _prep_weight(w, cin_x, coutp):
    """(KH,KW,Cin,Cout) f32 -> bf16 (Kp, coutp) with Cin padded to cin_x
    (matching zero-padded activation channels) and K padded to x128."""
    KH, KW, Cin, Cout = w.shape
    if cin_x != Cin:
        w = jnp.pad(w, ((0, 0), (0, 0), (0, cin_x - Cin), (0, 0)))
    w2d = w.reshape(KH * KW * cin_x, Cout)
    Kp = _round_up(w2d.shape[0], 128)
    w2d = _pad2d(w2d, Kp, coutp)
    return w2d.astype(jnp.bfloat16), Kp


def conv2d_lrelu(x, w, b, *, stride, padding, slope):
    """x NHWC bf16 (channels may be zero-padded past the conv's Cin)."""
    KH, KW, _, Cout = w.shape
    Cx = x.shape[-1]
    Coutp = _round_up(Cout, 128)
    patches, (N, Ho, Wo) = im2col(x, KH, stride, padding)
    M = patches.shape[0]
    w2d, Kp = _prep_weight(w, Cx, Coutp)
    patches = _pad2d(patches, M, Kp)
    bias = _pad2d(b.reshape(1, Cout).astype(jnp.float32), 1, Coutp)
    out = _tiled_conv_mm(patches, w2d, bias, slope=slope, out_dtype=jnp.bfloat16)
    return out.reshape(N, Ho, Wo, Coutp)


def conv2d_skip_lrelu(y, x, w2, b2, w3, b3, *, stride_skip, slope):
    """leaky_relu(conv3x3_s1(y) + conv1x1_stride(x), slope) with the 1x1 skip
    conv, both biases and the activation fused into one tiled Pallas call."""
    N, Ho, Wo, Cyp = y.shape
    Cout = w2.shape[3]
    Coutp = _round_up(Cout, 128)

    patches, _ = im2col(y, 3, 1, 1)
    M = patches.shape[0]
    w2_2d, Kp = _prep_weight(w2, Cyp, Coutp)
    patches = _pad2d(patches, M, Kp)

    xs = x[:, ::stride_skip, ::stride_skip, :]           # 1x1 stride-s sampling
    Cx = xs.shape[-1]
    Cxp = _round_up(Cx, 128)
    xs2d = _pad2d(xs.reshape(N * Ho * Wo, Cx), M, Cxp)
    w3_2d, _ = _prep_weight(w3, Cx, Coutp)               # (Cxp, Coutp)

    bias = _pad2d((b2 + b3).reshape(1, Cout).astype(jnp.float32), 1, Coutp)
    out = _tiled_conv_mm(patches, w2_2d, bias, xs=xs2d, ws=w3_2d,
                         slope=slope, out_dtype=jnp.bfloat16)
    return out.reshape(N, Ho, Wo, Coutp)


def head_fused(x, p1, p2):
    """Conv2d(256,512,3,1,1) + LeakyReLU() + Conv2d(512,1,1), fused."""
    w1, b1 = p1
    w2, b2 = p2
    Cx = x.shape[-1]
    Cmid = w1.shape[3]                                   # 512
    patches, (N, Ho, Wo) = im2col(x, 3, 1, 1)
    M = patches.shape[0]
    w1_2d, Kp = _prep_weight(w1, Cx, Cmid)
    patches = _pad2d(patches, M, Kp)
    b1_2d = b1.reshape(1, Cmid).astype(jnp.float32)
    Coutp = 128                                          # pad Cout=1 -> 128 lanes
    w2_2d = _pad2d(w2.reshape(Cmid, 1).astype(jnp.float32), Cmid, Coutp)
    b2_2d = _pad2d(b2.reshape(1, 1).astype(jnp.float32), 1, Coutp)
    out = _head_call(patches, w1_2d, b1_2d, w2_2d, b2_2d)  # (M, 1) f32
    return out.reshape(N, Ho, Wo, 1)


# ----------------------------------------------------------------------------
# Parameters (deterministic, PyTorch-default-like scaling)
# ----------------------------------------------------------------------------
def _init_conv(key, ksize, cin, cout):
    kw_key, kb_key = jax.random.split(key)
    fan_in = cin * ksize * ksize
    bound = 1.0 / jnp.sqrt(jnp.float32(fan_in))
    w = jax.random.uniform(kw_key, (ksize, ksize, cin, cout),
                           minval=-bound, maxval=bound, dtype=jnp.float32)
    b = jax.random.uniform(kb_key, (cout,),
                           minval=-bound, maxval=bound, dtype=jnp.float32)
    return w, b


def init_discriminator_params(key, in_channels):
    keys = jax.random.split(key, 16)
    params = {}
    chans = [(in_channels, 64), (64, 128), (128, 256)]
    k = 0
    for bi, (ci, co) in enumerate(chans):
        params[f"res{bi}_conv1"] = _init_conv(keys[k], 3, ci, co); k += 1
        params[f"res{bi}_conv2"] = _init_conv(keys[k], 3, co, co); k += 1
        params[f"res{bi}_conv3"] = _init_conv(keys[k], 1, ci, co); k += 1
    params["head_conv1"] = _init_conv(keys[k], 3, 256, 512); k += 1
    params["head_conv2"] = _init_conv(keys[k], 1, 512, 1); k += 1
    return params


# ----------------------------------------------------------------------------
# Forward pass
# ----------------------------------------------------------------------------
def residual_block(x, p1, p2, p3, stride):
    """Residual (no BN): lrelu(conv2(lrelu(conv1(x),0.1)) + conv3(x), 0.1)."""
    w1, b1 = p1
    w2, b2 = p2
    w3, b3 = p3
    y = conv2d_lrelu(x, w1, b1, stride=stride, padding=1, slope=0.1)
    return conv2d_skip_lrelu(y, x, w2, b2, w3, b3, stride_skip=stride, slope=0.1)


def discriminator_forward(x_nchw, params):
    # NCHW -> NHWC, bf16 activations (f32 accumulation inside the kernels)
    x = jnp.transpose(x_nchw, (0, 2, 3, 1)).astype(jnp.bfloat16)
    for bi, stride in enumerate([2, 2, 2]):
        x = residual_block(x,
                           params[f"res{bi}_conv1"],
                           params[f"res{bi}_conv2"],
                           params[f"res{bi}_conv3"],
                           stride)
    y = head_fused(x, params["head_conv1"], params["head_conv2"])
    # NHWC -> NCHW to match the PyTorch output convention
    return jnp.transpose(y, (0, 3, 1, 2)).astype(jnp.float32)


# ----------------------------------------------------------------------------
if __name__ == "__main__":
    key = jax.random.PRNGKey(0)
    k_x, k_p = jax.random.split(key)

    batch, in_channels, H, W = 2, 4, 16, 16
    x = jax.random.normal(k_x, (batch, in_channels, H, W), dtype=jnp.float32)

    params = init_discriminator_params(k_p, in_channels)

    fwd = jax.jit(discriminator_forward)
    y = fwd(x, params)
    y = jax.block_until_ready(y)

    # 16 -> 8 -> 4 -> 2 spatially; final channels = 1
    assert y.shape == (batch, 1, H // 8, W // 8), y.shape
    assert y.dtype == jnp.float32

    print("KERNEL_OK")
</pallas_src>

<mosaic_0001>
module attributes {stable_mosaic.version = 11 : i64} {
  func.func @_conv_mm_kernel(%arg0: i32, %arg1: i32, %arg2: i32, %arg3: memref<128x128xbf16, #tpu.memory_space<vmem>>, %arg4: memref<128x128xbf16, #tpu.memory_space<vmem>>, %arg5: memref<1x128xf32, #tpu.memory_space<vmem>>, %arg6: memref<128x128xbf16, #tpu.memory_space<vmem>>, %arg7: memref<128x128xf32, #tpu.memory_space<vmem>>) attributes {dimension_semantics = [#tpu.dimension_semantics<parallel>, #tpu.dimension_semantics<parallel>, #tpu.dimension_semantics<arbitrary>], iteration_bounds = array<i64: 1, 1, 1>, scalar_prefetch = 0 : i64, scratch_operands = 1 : i64, tpu.core_type = #tpu.core_type<tc>, window_params = [{transform_indices = @transform_0, window_bounds = array<i64: 128, 128>}, {transform_indices = @transform_1, window_bounds = array<i64: 128, 128>}, {transform_indices = @transform_2, window_bounds = array<i64: 1, 128>}, {transform_indices = @transform_3, window_bounds = array<i64: 128, 128>}]} {
    %c0_i32 = arith.constant 0 : i32
    %0 = arith.cmpi eq, %arg2, %c0_i32 : i32
    %1 = arith.extui %0 : i1 to i32
    %c0_i32_0 = arith.constant 0 : i32
    %2 = arith.cmpi ne, %1, %c0_i32_0 : i32
    scf.if %2 {
      %cst_10 = arith.constant 0.000000e+00 : f32
      %12 = vector.broadcast %cst_10 : f32 to vector<128x128xf32>
      %c0_11 = arith.constant 0 : index
      %c0_12 = arith.constant 0 : index
      %13 = vector.load %arg7[%c0_11, %c0_12] : memref<128x128xf32, #tpu.memory_space<vmem>>, vector<128x128xf32>
      tpu.vector_store %arg7[%c0_11, %c0_12], %12 {strides = array<i32>} : memref<128x128xf32, #tpu.memory_space<vmem>>, vector<128x128xf32>,
    } else {
    }
    %c0 = arith.constant 0 : index
    %c0_1 = arith.constant 0 : index
    %3 = vector.load %arg7[%c0, %c0_1] : memref<128x128xf32, #tpu.memory_space<vmem>>, vector<128x128xf32>
    %c0_2 = arith.constant 0 : index
    %c0_3 = arith.constant 0 : index
    %4 = vector.load %arg3[%c0_2, %c0_3] : memref<128x128xbf16, #tpu.memory_space<vmem>>, vector<128x128xbf16>
    %c0_4 = arith.constant 0 : index
    %c0_5 = arith.constant 0 : index
    %5 = vector.load %arg4[%c0_4, %c0_5] : memref<128x128xbf16, #tpu.memory_space<vmem>>, vector<128x128xbf16>
    %cst = arith.constant dense<0.000000e+00> : vector<128x128xf32>
    %6 = tpu.matmul %4, %5, %cst {dimension_numbers = #tpu.dot_dimension_numbers<[1], [0], [0], [1], [0, 0, 1, 1], [], []>} : vector<128x128xbf16>, vector<128x128xbf16>, vector<128x128xf32> -> vector<128x128xf32>
    %7 = arith.addf %3, %6 : vector<128x128xf32>
    %c0_6 = arith.constant 0 : index
    %c0_7 = arith.constant 0 : index
    %8 = vector.load %arg7[%c0_6, %c0_7] : memref<128x128xf32, #tpu.memory_space<vmem>>, vector<128x128xf32>
    tpu.vector_store %arg7[%c0_6, %c0_7], %7 {strides = array<i32>} : memref<128x128xf32, #tpu.memory_space<vmem>>, vector<128x128xf32>,
    %c0_i32_8 = arith.constant 0 : i32
    %9 = arith.cmpi eq, %arg2, %c0_i32_8 : i32
    %10 = arith.extui %9 : i1 to i32
    %c0_i32_9 = arith.constant 0 : i32
    %11 = arith.cmpi ne, %10, %c0_i32_9 : i32
    scf.if %11 {
      %c0_10 = arith.constant 0 : index
      %c0_11 = arith.constant 0 : index
      %12 = vector.load %arg7[%c0_10, %c0_11] : memref<128x128xf32, #tpu.memory_space<vmem>>, vector<128x128xf32>
      %c0_12 = arith.constant 0 : index
      %c0_13 = arith.constant 0 : index
      %13 = vector.load %arg5[%c0_12, %c0_13] : memref<1x128xf32, #tpu.memory_space<vmem>>, vector<1x128xf32>
      %14 = vector.broadcast %13 : vector<1x128xf32> to vector<128x128xf32>
      %15 = arith.addf %12, %14 : vector<128x128xf32>
      %cst_14 = arith.constant 0.000000e+00 : f32
      %16 = vector.broadcast %cst_14 : f32 to vector<128x128xf32>
      %17 = arith.cmpf oge, %15, %16 : vector<128x128xf32>
      %cst_15 = arith.constant 1.000000e-01 : f32
      %18 = vector.broadcast %cst_15 : f32 to vector<128x128xf32>
      %19 = arith.mulf %18, %15 : vector<128x128xf32>
      %20 = arith.select %17, %15, %19 : vector<128x128xi1>, vector<128x128xf32>
      %21 = arith.truncf %20 : vector<128x128xf32> to vector<128x128xbf16>
      %c0_16 = arith.constant 0 : index
      %c0_17 = arith.constant 0 : index
      %22 = vector.load %arg6[%c0_16, %c0_17] : memref<128x128xbf16, #tpu.memory_space<vmem>>, vector<128x128xbf16>
      tpu.vector_store %arg6[%c0_16, %c0_17], %21 {strides = array<i32>} : memref<128x128xbf16, #tpu.memory_space<vmem>>, vector<128x128xbf16>,
    } else {
    }
    return
  }
  func.func @transform_0(%arg0: i32, %arg1: i32, %arg2: i32) -> (i32, i32) {
    %c0_i32 = arith.constant 0 : i32
    return %arg0, %arg2 : i32, i32
  }
  func.func @transform_1(%arg0: i32, %arg1: i32, %arg2: i32) -> (i32, i32) {
    %c0_i32 = arith.constant 0 : i32
    return %arg2, %arg1 : i32, i32
  }
  func.func @transform_2(%arg0: i32, %arg1: i32, %arg2: i32) -> (i32, i32) {
    %c0_i32 = arith.constant 0 : i32
    %c0_i32_0 = arith.constant 0 : i32
    return %c0_i32, %arg1 : i32, i32
  }
  func.func @transform_3(%arg0: i32, %arg1: i32, %arg2: i32) -> (i32, i32) {
    %c0_i32 = arith.constant 0 : i32
    return %arg0, %arg1 : i32, i32
  }
}

module attributes {stable_mosaic.version = 11 : i64} {
  func.func @_conv_mm_skip_kernel(%arg0: i32, %arg1: i32, %arg2: i32, %arg3: memref<128x384xbf16, #tpu.memory_space<vmem>>, %arg4: memref<128x128xbf16, #tpu.memory_space<vmem>>, %arg5: memref<384x128xbf16, #tpu.memory_space<vmem>>, %arg6: memref<128x128xbf16, #tpu.memory_space<vmem>>, %arg7: memref<1x128xf32, #tpu.memory_space<vmem>>, %arg8: memref<128x128xbf16, #tpu.memory_space<vmem>>, %arg9: memref<128x128xf32, #tpu.memory_space<vmem>>) attributes {dimension_semantics = [#tpu.dimension_semantics<parallel>, #tpu.dimension_semantics<parallel>, #tpu.dimension_semantics<arbitrary>], iteration_bounds = array<i64: 1, 1, 3>, scalar_prefetch = 0 : i64, scratch_operands = 1 : i64, tpu.core_type = #tpu.core_type<tc>, window_params = [{transform_indices = @transform_0, window_bounds = array<i64: 128, 384>}, {transform_indices = @transform_1, window_bounds = array<i64: 128, 128>}, {transform_indices = @transform_2, window_bounds = array<i64: 384, 128>}, {transform_indices = @transform_3, window_bounds = array<i64: 128, 128>}, {transform_indices = @transform_4, window_bounds = array<i64: 1, 128>}, {transform_indices = @transform_5, window_bounds = array<i64: 128, 128>}]} {
    %c0_i32 = arith.constant 0 : i32
    %0 = arith.cmpi eq, %arg2, %c0_i32 : i32
    %1 = arith.extui %0 : i1 to i32
    %c0_i32_0 = arith.constant 0 : i32
    %2 = arith.cmpi ne, %1, %c0_i32_0 : i32
    scf.if %2 {
      %c0_9 = arith.constant 0 : index
      %c0_10 = arith.constant 0 : index
      %12 = vector.load %arg4[%c0_9, %c0_10] : memref<128x128xbf16, #tpu.memory_space<vmem>>, vector<128x128xbf16>
      %c0_11 = arith.constant 0 : index
      %c0_12 = arith.constant 0 : index
      %13 = vector.load %arg6[%c0_11, %c0_12] : memref<128x128xbf16, #tpu.memory_space<vmem>>, vector<128x128xbf16>
      %cst_13 = arith.constant dense<0.000000e+00> : vector<128x128xf32>
      %14 = tpu.matmul %12, %13, %cst_13 {dimension_numbers = #tpu.dot_dimension_numbers<[1], [0], [0], [1], [0, 0, 1, 1], [], []>} : vector<128x128xbf16>, vector<128x128xbf16>, vector<128x128xf32> -> vector<128x128xf32>
      %c0_14 = arith.constant 0 : index
      %c0_15 = arith.constant 0 : index
      %15 = vector.load %arg9[%c0_14, %c0_15] : memref<128x128xf32, #tpu.memory_space<vmem>>, vector<128x128xf32>
      tpu.vector_store %arg9[%c0_14, %c0_15], %14 {strides = array<i32>} : memref<128x128xf32, #tpu.memory_space<vmem>>, vector<128x128xf32>,
    } else {
    }
    %c0 = arith.constant 0 : index
    %c0_1 = arith.constant 0 : index
    %3 = vector.load %arg9[%c0, %c0_1] : memref<128x128xf32, #tpu.memory_space<vmem>>, vector<128x128xf32>
    %c0_2 = arith.constant 0 : index
    %c0_3 = arith.constant 0 : index
    %4 = vector.load %arg3[%c0_2, %c0_3] : memref<128x384xbf16, #tpu.memory_space<vmem>>, vector<128x384xbf16>
    %c0_4 = arith.constant 0 : index
    %c0_5 = arith.constant 0 : index
    %5 = vector.load %arg5[%c0_4, %c0_5] : memref<384x128xbf16, #tpu.memory_space<vmem>>, vector<384x128xbf16>
    %cst = arith.constant dense<0.000000e+00> : vector<128x128xf32>
    %6 = tpu.matmul %4, %5, %cst {dimension_numbers = #tpu.dot_dimension_numbers<[1], [0], [0], [1], [0, 0, 1, 1], [], []>} : vector<128x384xbf16>, vector<384x128xbf16>, vector<128x128xf32> -> vector<128x128xf32>
    %7 = arith.addf %3, %6 : vector<128x128xf32>
    %c0_6 = arith.constant 0 : index
    %c0_7 = arith.constant 0 : index
    %8 = vector.load %arg9[%c0_6, %c0_7] : memref<128x128xf32, #tpu.memory_space<vmem>>, vector<128x128xf32>
    tpu.vector_store %arg9[%c0_6, %c0_7], %7 {strides = array<i32>} : memref<128x128xf32, #tpu.memory_space<vmem>>, vector<128x128xf32>,
    %c2_i32 = arith.constant 2 : i32
    %9 = arith.cmpi eq, %arg2, %c2_i32 : i32
    %10 = arith.extui %9 : i1 to i32
    %c0_i32_8 = arith.constant 0 : i32
    %11 = arith.cmpi ne, %10, %c0_i32_8 : i32
    scf.if %11 {
      %c0_9 = arith.constant 0 : index
      %c0_10 = arith.constant 0 : index
      %12 = vector.load %arg9[%c0_9, %c0_10] : memref<128x128xf32, #tpu.memory_space<vmem>>, vector<128x128xf32>
      %c0_11 = arith.constant 0 : index
      %c0_12 = arith.constant 0 : index
      %13 = vector.load %arg7[%c0_11, %c0_12] : memref<1x128xf32, #tpu.memory_space<vmem>>, vector<1x128xf32>
      %14 = vector.broadcast %13 : vector<1x128xf32> to vector<128x128xf32>
      %15 = arith.addf %12, %14 : vector<128x128xf32>
      %cst_13 = arith.constant 0.000000e+00 : f32
      %16 = vector.broadcast %cst_13 : f32 to vector<128x128xf32>
      %17 = arith.cmpf oge, %15, %16 : vector<128x128xf32>
      %cst_14 = arith.constant 1.000000e-01 : f32
      %18 = vector.broadcast %cst_14 : f32 to vector<128x128xf32>
      %19 = arith.mulf %18, %15 : vector<128x128xf32>
      %20 = arith.select %17, %15, %19 : vector<128x128xi1>, vector<128x128xf32>
      %21 = arith.truncf %20 : vector<128x128xf32> to vector<128x128xbf16>
      %c0_15 = arith.constant 0 : index
      %c0_16 = arith.constant 0 : index
      %22 = vector.load %arg8[%c0_15, %c0_16] : memref<128x128xbf16, #tpu.memory_space<vmem>>, vector<128x128xbf16>
      tpu.vector_store %arg8[%c0_15, %c0_16], %21 {strides = array<i32>} : memref<128x128xbf16, #tpu.memory_space<vmem>>, vector<128x128xbf16>,
    } else {
    }
    return
  }
  func.func @transform_0(%arg0: i32, %arg1: i32, %arg2: i32) -> (i32, i32) {
    %c0_i32 = arith.constant 0 : i32
    return %arg0, %arg2 : i32, i32
  }
  func.func @transform_1(%arg0: i32, %arg1: i32, %arg2: i32) -> (i32, i32) {
    %c0_i32 = arith.constant 0 : i32
    %c0_i32_0 = arith.constant 0 : i32
    return %arg0, %c0_i32 : i32, i32
  }
  func.func @transform_2(%arg0: i32, %arg1: i32, %arg2: i32) -> (i32, i32) {
    %c0_i32 = arith.constant 0 : i32
    return %arg2, %arg1 : i32, i32
  }
  func.func @transform_3(%arg0: i32, %arg1: i32, %arg2: i32) -> (i32, i32) {
    %c0_i32 = arith.constant 0 : i32
    %c0_i32_0 = arith.constant 0 : i32
    return %c0_i32, %arg1 : i32, i32
  }
  func.func @transform_4(%arg0: i32, %arg1: i32, %arg2: i32) -> (i32, i32) {
    %c0_i32 = arith.constant 0 : i32
    %c0_i32_0 = arith.constant 0 : i32
    return %c0_i32, %arg1 : i32, i32
  }
  func.func @transform_5(%arg0: i32, %arg1: i32, %arg2: i32) -> (i32, i32) {
    %c0_i32 = arith.constant 0 : i32
    return %arg0, %arg1 : i32, i32
  }
}

module attributes {stable_mosaic.version = 11 : i64} {
  func.func @_conv_mm_kernel(%arg0: i32, %arg1: i32, %arg2: i32, %arg3: memref<32x384xbf16, #tpu.memory_space<vmem>>, %arg4: memref<384x128xbf16, #tpu.memory_space<vmem>>, %arg5: memref<1x128xf32, #tpu.memory_space<vmem>>, %arg6: memref<32x128xbf16, #tpu.memory_space<vmem>>, %arg7: memref<32x128xf32, #tpu.memory_space<vmem>>) attributes {dimension_semantics = [#tpu.dimension_semantics<parallel>, #tpu.dimension_semantics<parallel>, #tpu.dimension_semantics<arbitrary>], iteration_bounds = array<i64: 1, 1, 3>, scalar_prefetch = 0 : i64, scratch_operands = 1 : i64, tpu.core_type = #tpu.core_type<tc>, window_params = [{transform_indices = @transform_0, window_bounds = array<i64: 32, 384>}, {transform_indices = @transform_1, window_bounds = array<i64: 384, 128>}, {transform_indices = @transform_2, window_bounds = array<i64: 1, 128>}, {transform_indices = @transform_3, window_bounds = array<i64: 32, 128>}]} {
    %c0_i32 = arith.constant 0 : i32
    %0 = arith.cmpi eq, %arg2, %c0_i32 : i32
    %1 = arith.extui %0 : i1 to i32
    %c0_i32_0 = arith.constant 0 : i32
    %2 = arith.cmpi ne, %1, %c0_i32_0 : i32
    scf.if %2 {
      %cst_9 = arith.constant 0.000000e+00 : f32
      %12 = vector.broadcast %cst_9 : f32 to vector<32x128xf32>
      %c0_10 = arith.constant 0 : index
      %c0_11 = arith.constant 0 : index
      %13 = vector.load %arg7[%c0_10, %c0_11] : memref<32x128xf32, #tpu.memory_space<vmem>>, vector<32x128xf32>
      tpu.vector_store %arg7[%c0_10, %c0_11], %12 {strides = array<i32>} : memref<32x128xf32, #tpu.memory_space<vmem>>, vector<32x128xf32>,
    } else {
    }
    %c0 = arith.constant 0 : index
    %c0_1 = arith.constant 0 : index
    %3 = vector.load %arg7[%c0, %c0_1] : memref<32x128xf32, #tpu.memory_space<vmem>>, vector<32x128xf32>
    %c0_2 = arith.constant 0 : index
    %c0_3 = arith.constant 0 : index
    %4 = vector.load %arg3[%c0_2, %c0_3] : memref<32x384xbf16, #tpu.memory_space<vmem>>, vector<32x384xbf16>
    %c0_4 = arith.constant 0 : index
    %c0_5 = arith.constant 0 : index
    %5 = vector.load %arg4[%c0_4, %c0_5] : memref<384x128xbf16, #tpu.memory_space<vmem>>, vector<384x128xbf16>
    %cst = arith.constant dense<0.000000e+00> : vector<32x128xf32>
    %6 = tpu.matmul %4, %5, %cst {dimension_numbers = #tpu.dot_dimension_numbers<[1], [0], [0], [1], [0, 0, 1, 1], [], []>} : vector<32x384xbf16>, vector<384x128xbf16>, vector<32x128xf32> -> vector<32x128xf32>
    %7 = arith.addf %3, %6 : vector<32x128xf32>
    %c0_6 = arith.constant 0 : index
    %c0_7 = arith.constant 0 : index
    %8 = vector.load %arg7[%c0_6, %c0_7] : memref<32x128xf32, #tpu.memory_space<vmem>>, vector<32x128xf32>
    tpu.vector_store %arg7[%c0_6, %c0_7], %7 {strides = array<i32>} : memref<32x128xf32, #tpu.memory_space<vmem>>, vector<32x128xf32>,
    %c2_i32 = arith.constant 2 : i32
    %9 = arith.cmpi eq, %arg2, %c2_i32 : i32
    %10 = arith.extui %9 : i1 to i32
    %c0_i32_8 = arith.constant 0 : i32
    %11 = arith.cmpi ne, %10, %c0_i32_8 : i32
    scf.if %11 {
      %c0_9 = arith.constant 0 : index
      %c0_10 = arith.constant 0 : index
      %12 = vector.load %arg7[%c0_9, %c0_10] : memref<32x128xf32, #tpu.memory_space<vmem>>, vector<32x128xf32>
      %c0_11 = arith.constant 0 : index
      %c0_12 = arith.constant 0 : index
      %13 = vector.load %arg5[%c0_11, %c0_12] : memref<1x128xf32, #tpu.memory_space<vmem>>, vector<1x128xf32>
      %14 = vector.broadcast %13 : vector<1x128xf32> to vector<32x128xf32>
      %15 = arith.addf %12, %14 : vector<32x128xf32>
      %cst_13 = arith.constant 0.000000e+00 : f32
      %16 = vector.broadcast %cst_13 : f32 to vector<32x128xf32>
      %17 = arith.cmpf oge, %15, %16 : vector<32x128xf32>
      %cst_14 = arith.constant 1.000000e-01 : f32
      %18 = vector.broadcast %cst_14 : f32 to vector<32x128xf32>
      %19 = arith.mulf %18, %15 : vector<32x128xf32>
      %20 = arith.select %17, %15, %19 : vector<32x128xi1>, vector<32x128xf32>
      %21 = arith.truncf %20 : vector<32x128xf32> to vector<32x128xbf16>
      %c0_15 = arith.constant 0 : index
      %c0_16 = arith.constant 0 : index
      %22 = vector.load %arg6[%c0_15, %c0_16] : memref<32x128xbf16, #tpu.memory_space<vmem>>, vector<32x128xbf16>
      tpu.vector_store %arg6[%c0_15, %c0_16], %21 {strides = array<i32>} : memref<32x128xbf16, #tpu.memory_space<vmem>>, vector<32x128xbf16>,
    } else {
    }
    return
  }
  func.func @transform_0(%arg0: i32, %arg1: i32, %arg2: i32) -> (i32, i32) {
    %c0_i32 = arith.constant 0 : i32
    return %arg0, %arg2 : i32, i32
  }
  func.func @transform_1(%arg0: i32, %arg1: i32, %arg2: i32) -> (i32, i32) {
    %c0_i32 = arith.constant 0 : i32
    return %arg2, %arg1 : i32, i32
  }
  func.func @transform_2(%arg0: i32, %arg1: i32, %arg2: i32) -> (i32, i32) {
    %c0_i32 = arith.constant 0 : i32
    %c0_i32_0 = arith.constant 0 : i32
    return %c0_i32, %arg1 : i32, i32
  }
  func.func @transform_3(%arg0: i32, %arg1: i32, %arg2: i32) -> (i32, i32) {
    %c0_i32 = arith.constant 0 : i32
    return %arg0, %arg1 : i32, i32
  }
}

module attributes {stable_mosaic.version = 11 : i64} {
  func.func @_conv_mm_skip_kernel(%arg0: i32, %arg1: i32, %arg2: i32, %arg3: memref<32x384xbf16, #tpu.memory_space<vmem>>, %arg4: memref<32x128xbf16, #tpu.memory_space<vmem>>, %arg5: memref<384x128xbf16, #tpu.memory_space<vmem>>, %arg6: memref<128x128xbf16, #tpu.memory_space<vmem>>, %arg7: memref<1x128xf32, #tpu.memory_space<vmem>>, %arg8: memref<32x128xbf16, #tpu.memory_space<vmem>>, %arg9: memref<32x128xf32, #tpu.memory_space<vmem>>) attributes {dimension_semantics = [#tpu.dimension_semantics<parallel>, #tpu.dimension_semantics<parallel>, #tpu.dimension_semantics<arbitrary>], iteration_bounds = array<i64: 1, 1, 3>, scalar_prefetch = 0 : i64, scratch_operands = 1 : i64, tpu.core_type = #tpu.core_type<tc>, window_params = [{transform_indices = @transform_0, window_bounds = array<i64: 32, 384>}, {transform_indices = @transform_1, window_bounds = array<i64: 32, 128>}, {transform_indices = @transform_2, window_bounds = array<i64: 384, 128>}, {transform_indices = @transform_3, window_bounds = array<i64: 128, 128>}, {transform_indices = @transform_4, window_bounds = array<i64: 1, 128>}, {transform_indices = @transform_5, window_bounds = array<i64: 32, 128>}]} {
    %c0_i32 = arith.constant 0 : i32
    %0 = arith.cmpi eq, %arg2, %c0_i32 : i32
    %1 = arith.extui %0 : i1 to i32
    %c0_i32_0 = arith.constant 0 : i32
    %2 = arith.cmpi ne, %1, %c0_i32_0 : i32
    scf.if %2 {
      %c0_9 = arith.constant 0 : index
      %c0_10 = arith.constant 0 : index
      %12 = vector.load %arg4[%c0_9, %c0_10] : memref<32x128xbf16, #tpu.memory_space<vmem>>, vector<32x128xbf16>
      %c0_11 = arith.constant 0 : index
      %c0_12 = arith.constant 0 : index
      %13 = vector.load %arg6[%c0_11, %c0_12] : memref<128x128xbf16, #tpu.memory_space<vmem>>, vector<128x128xbf16>
      %cst_13 = arith.constant dense<0.000000e+00> : vector<32x128xf32>
      %14 = tpu.matmul %12, %13, %cst_13 {dimension_numbers = #tpu.dot_dimension_numbers<[1], [0], [0], [1], [0, 0, 1, 1], [], []>} : vector<32x128xbf16>, vector<128x128xbf16>, vector<32x128xf32> -> vector<32x128xf32>
      %c0_14 = arith.constant 0 : index
      %c0_15 = arith.constant 0 : index
      %15 = vector.load %arg9[%c0_14, %c0_15] : memref<32x128xf32, #tpu.memory_space<vmem>>, vector<32x128xf32>
      tpu.vector_store %arg9[%c0_14, %c0_15], %14 {strides = array<i32>} : memref<32x128xf32, #tpu.memory_space<vmem>>, vector<32x128xf32>,
    } else {
    }
    %c0 = arith.constant 0 : index
    %c0_1 = arith.constant 0 : index
    %3 = vector.load %arg9[%c0, %c0_1] : memref<32x128xf32, #tpu.memory_space<vmem>>, vector<32x128xf32>
    %c0_2 = arith.constant 0 : index
    %c0_3 = arith.constant 0 : index
    %4 = vector.load %arg3[%c0_2, %c0_3] : memref<32x384xbf16, #tpu.memory_space<vmem>>, vector<32x384xbf16>
    %c0_4 = arith.constant 0 : index
    %c0_5 = arith.constant 0 : index
    %5 = vector.load %arg5[%c0_4, %c0_5] : memref<384x128xbf16, #tpu.memory_space<vmem>>, vector<384x128xbf16>
    %cst = arith.constant dense<0.000000e+00> : vector<32x128xf32>
    %6 = tpu.matmul %4, %5, %cst {dimension_numbers = #tpu.dot_dimension_numbers<[1], [0], [0], [1], [0, 0, 1, 1], [], []>} : vector<32x384xbf16>, vector<384x128xbf16>, vector<32x128xf32> -> vector<32x128xf32>
    %7 = arith.addf %3, %6 : vector<32x128xf32>
    %c0_6 = arith.constant 0 : index
    %c0_7 = arith.constant 0 : index
    %8 = vector.load %arg9[%c0_6, %c0_7] : memref<32x128xf32, #tpu.memory_space<vmem>>, vector<32x128xf32>
    tpu.vector_store %arg9[%c0_6, %c0_7], %7 {strides = array<i32>} : memref<32x128xf32, #tpu.memory_space<vmem>>, vector<32x128xf32>,
    %c2_i32 = arith.constant 2 : i32
    %9 = arith.cmpi eq, %arg2, %c2_i32 : i32
    %10 = arith.extui %9 : i1 to i32
    %c0_i32_8 = arith.constant 0 : i32
    %11 = arith.cmpi ne, %10, %c0_i32_8 : i32
    scf.if %11 {
      %c0_9 = arith.constant 0 : index
      %c0_10 = arith.constant 0 : index
      %12 = vector.load %arg9[%c0_9, %c0_10] : memref<32x128xf32, #tpu.memory_space<vmem>>, vector<32x128xf32>
      %c0_11 = arith.constant 0 : index
      %c0_12 = arith.constant 0 : index
      %13 = vector.load %arg7[%c0_11, %c0_12] : memref<1x128xf32, #tpu.memory_space<vmem>>, vector<1x128xf32>
      %14 = vector.broadcast %13 : vector<1x128xf32> to vector<32x128xf32>
      %15 = arith.addf %12, %14 : vector<32x128xf32>
      %cst_13 = arith.constant 0.000000e+00 : f32
      %16 = vector.broadcast %cst_13 : f32 to vector<32x128xf32>
      %17 = arith.cmpf oge, %15, %16 : vector<32x128xf32>
      %cst_14 = arith.constant 1.000000e-01 : f32
      %18 = vector.broadcast %cst_14 : f32 to vector<32x128xf32>
      %19 = arith.mulf %18, %15 : vector<32x128xf32>
      %20 = arith.select %17, %15, %19 : vector<32x128xi1>, vector<32x128xf32>
      %21 = arith.truncf %20 : vector<32x128xf32> to vector<32x128xbf16>
      %c0_15 = arith.constant 0 : index
      %c0_16 = arith.constant 0 : index
      %22 = vector.load %arg8[%c0_15, %c0_16] : memref<32x128xbf16, #tpu.memory_space<vmem>>, vector<32x128xbf16>
      tpu.vector_store %arg8[%c0_15, %c0_16], %21 {strides = array<i32>} : memref<32x128xbf16, #tpu.memory_space<vmem>>, vector<32x128xbf16>,
    } else {
    }
    return
  }
  func.func @transform_0(%arg0: i32, %arg1: i32, %arg2: i32) -> (i32, i32) {
    %c0_i32 = arith.constant 0 : i32
    return %arg0, %arg2 : i32, i32
  }
  func.func @transform_1(%arg0: i32, %arg1: i32, %arg2: i32) -> (i32, i32) {
    %c0_i32 = arith.constant 0 : i32
    %c0_i32_0 = arith.constant 0 : i32
    return %arg0, %c0_i32 : i32, i32
  }
  func.func @transform_2(%arg0: i32, %arg1: i32, %arg2: i32) -> (i32, i32) {
    %c0_i32 = arith.constant 0 : i32
    return %arg2, %arg1 : i32, i32
  }
  func.func @transform_3(%arg0: i32, %arg1: i32, %arg2: i32) -> (i32, i32) {
    %c0_i32 = arith.constant 0 : i32
    %c0_i32_0 = arith.constant 0 : i32
    return %c0_i32, %arg1 : i32, i32
  }
  func.func @transform_4(%arg0: i32, %arg1: i32, %arg2: i32) -> (i32, i32) {
    %c0_i32 = arith.constant 0 : i32
    %c0_i32_0 = arith.constant 0 : i32
    return %c0_i32, %arg1 : i32, i32
  }
  func.func @transform_5(%arg0: i32, %arg1: i32, %arg2: i32) -> (i32, i32) {
    %c0_i32 = arith.constant 0 : i32
    return %arg0, %arg1 : i32, i32
  }
}

module attributes {stable_mosaic.version = 11 : i64} {
  func.func @_conv_mm_kernel(%arg0: i32, %arg1: i32, %arg2: i32, %arg3: memref<8x384xbf16, #tpu.memory_space<vmem>>, %arg4: memref<384x256xbf16, #tpu.memory_space<vmem>>, %arg5: memref<1x256xf32, #tpu.memory_space<vmem>>, %arg6: memref<8x256xbf16, #tpu.memory_space<vmem>>, %arg7: memref<8x256xf32, #tpu.memory_space<vmem>>) attributes {dimension_semantics = [#tpu.dimension_semantics<parallel>, #tpu.dimension_semantics<parallel>, #tpu.dimension_semantics<arbitrary>], iteration_bounds = array<i64: 1, 1, 3>, scalar_prefetch = 0 : i64, scratch_operands = 1 : i64, tpu.core_type = #tpu.core_type<tc>, window_params = [{transform_indices = @transform_0, window_bounds = array<i64: 8, 384>}, {transform_indices = @transform_1, window_bounds = array<i64: 384, 256>}, {transform_indices = @transform_2, window_bounds = array<i64: 1, 256>}, {transform_indices = @transform_3, window_bounds = array<i64: 8, 256>}]} {
    %c0_i32 = arith.constant 0 : i32
    %0 = arith.cmpi eq, %arg2, %c0_i32 : i32
    %1 = arith.extui %0 : i1 to i32
    %c0_i32_0 = arith.constant 0 : i32
    %2 = arith.cmpi ne, %1, %c0_i32_0 : i32
    scf.if %2 {
      %cst_9 = arith.constant 0.000000e+00 : f32
      %12 = vector.broadcast %cst_9 : f32 to vector<8x256xf32>
      %c0_10 = arith.constant 0 : index
      %c0_11 = arith.constant 0 : index
      %13 = vector.load %arg7[%c0_10, %c0_11] : memref<8x256xf32, #tpu.memory_space<vmem>>, vector<8x256xf32>
      tpu.vector_store %arg7[%c0_10, %c0_11], %12 {strides = array<i32>} : memref<8x256xf32, #tpu.memory_space<vmem>>, vector<8x256xf32>,
    } else {
    }
    %c0 = arith.constant 0 : index
    %c0_1 = arith.constant 0 : index
    %3 = vector.load %arg7[%c0, %c0_1] : memref<8x256xf32, #tpu.memory_space<vmem>>, vector<8x256xf32>
    %c0_2 = arith.constant 0 : index
    %c0_3 = arith.constant 0 : index
    %4 = vector.load %arg3[%c0_2, %c0_3] : memref<8x384xbf16, #tpu.memory_space<vmem>>, vector<8x384xbf16>
    %c0_4 = arith.constant 0 : index
    %c0_5 = arith.constant 0 : index
    %5 = vector.load %arg4[%c0_4, %c0_5] : memref<384x256xbf16, #tpu.memory_space<vmem>>, vector<384x256xbf16>
    %cst = arith.constant dense<0.000000e+00> : vector<8x256xf32>
    %6 = tpu.matmul %4, %5, %cst {dimension_numbers = #tpu.dot_dimension_numbers<[1], [0], [0], [1], [0, 0, 1, 1], [], []>} : vector<8x384xbf16>, vector<384x256xbf16>, vector<8x256xf32> -> vector<8x256xf32>
    %7 = arith.addf %3, %6 : vector<8x256xf32>
    %c0_6 = arith.constant 0 : index
    %c0_7 = arith.constant 0 : index
    %8 = vector.load %arg7[%c0_6, %c0_7] : memref<8x256xf32, #tpu.memory_space<vmem>>, vector<8x256xf32>
    tpu.vector_store %arg7[%c0_6, %c0_7], %7 {strides = array<i32>} : memref<8x256xf32, #tpu.memory_space<vmem>>, vector<8x256xf32>,
    %c2_i32 = arith.constant 2 : i32
    %9 = arith.cmpi eq, %arg2, %c2_i32 : i32
    %10 = arith.extui %9 : i1 to i32
    %c0_i32_8 = arith.constant 0 : i32
    %11 = arith.cmpi ne, %10, %c0_i32_8 : i32
    scf.if %11 {
      %c0_9 = arith.constant 0 : index
      %c0_10 = arith.constant 0 : index
      %12 = vector.load %arg7[%c0_9, %c0_10] : memref<8x256xf32, #tpu.memory_space<vmem>>, vector<8x256xf32>
      %c0_11 = arith.constant 0 : index
      %c0_12 = arith.constant 0 : index
      %13 = vector.load %arg5[%c0_11, %c0_12] : memref<1x256xf32, #tpu.memory_space<vmem>>, vector<1x256xf32>
      %14 = vector.broadcast %13 : vector<1x256xf32> to vector<8x256xf32>
      %15 = arith.addf %12, %14 : vector<8x256xf32>
      %cst_13 = arith.constant 0.000000e+00 : f32
      %16 = vector.broadcast %cst_13 : f32 to vector<8x256xf32>
      %17 = arith.cmpf oge, %15, %16 : vector<8x256xf32>
      %cst_14 = arith.constant 1.000000e-01 : f32
      %18 = vector.broadcast %cst_14 : f32 to vector<8x256xf32>
      %19 = arith.mulf %18, %15 : vector<8x256xf32>
      %20 = arith.select %17, %15, %19 : vector<8x256xi1>, vector<8x256xf32>
      %21 = arith.truncf %20 : vector<8x256xf32> to vector<8x256xbf16>
      %c0_15 = arith.constant 0 : index
      %c0_16 = arith.constant 0 : index
      %22 = vector.load %arg6[%c0_15, %c0_16] : memref<8x256xbf16, #tpu.memory_space<vmem>>, vector<8x256xbf16>
      tpu.vector_store %arg6[%c0_15, %c0_16], %21 {strides = array<i32>} : memref<8x256xbf16, #tpu.memory_space<vmem>>, vector<8x256xbf16>,
    } else {
    }
    return
  }
  func.func @transform_0(%arg0: i32, %arg1: i32, %arg2: i32) -> (i32, i32) {
    %c0_i32 = arith.constant 0 : i32
    return %arg0, %arg2 : i32, i32
  }
  func.func @transform_1(%arg0: i32, %arg1: i32, %arg2: i32) -> (i32, i32) {
    %c0_i32 = arith.constant 0 : i32
    return %arg2, %arg1 : i32, i32
  }
  func.func @transform_2(%arg0: i32, %arg1: i32, %arg2: i32) -> (i32, i32) {
    %c0_i32 = arith.constant 0 : i32
    %c0_i32_0 = arith.constant 0 : i32
    return %c0_i32, %arg1 : i32, i32
  }
  func.func @transform_3(%arg0: i32, %arg1: i32, %arg2: i32) -> (i32, i32) {
    %c0_i32 = arith.constant 0 : i32
    return %arg0, %arg1 : i32, i32
  }
}

module attributes {stable_mosaic.version = 11 : i64} {
  func.func @_conv_mm_skip_kernel(%arg0: i32, %arg1: i32, %arg2: i32, %arg3: memref<8x768xbf16, #tpu.memory_space<vmem>>, %arg4: memref<8x128xbf16, #tpu.memory_space<vmem>>, %arg5: memref<768x256xbf16, #tpu.memory_space<vmem>>, %arg6: memref<128x256xbf16, #tpu.memory_space<vmem>>, %arg7: memref<1x256xf32, #tpu.memory_space<vmem>>, %arg8: memref<8x256xbf16, #tpu.memory_space<vmem>>, %arg9: memref<8x256xf32, #tpu.memory_space<vmem>>) attributes {dimension_semantics = [#tpu.dimension_semantics<parallel>, #tpu.dimension_semantics<parallel>, #tpu.dimension_semantics<arbitrary>], iteration_bounds = array<i64: 1, 1, 3>, scalar_prefetch = 0 : i64, scratch_operands = 1 : i64, tpu.core_type = #tpu.core_type<tc>, window_params = [{transform_indices = @transform_0, window_bounds = array<i64: 8, 768>}, {transform_indices = @transform_1, window_bounds = array<i64: 8, 128>}, {transform_indices = @transform_2, window_bounds = array<i64: 768, 256>}, {transform_indices = @transform_3, window_bounds = array<i64: 128, 256>}, {transform_indices = @transform_4, window_bounds = array<i64: 1, 256>}, {transform_indices = @transform_5, window_bounds = array<i64: 8, 256>}]} {
    %c0_i32 = arith.constant 0 : i32
    %0 = arith.cmpi eq, %arg2, %c0_i32 : i32
    %1 = arith.extui %0 : i1 to i32
    %c0_i32_0 = arith.constant 0 : i32
    %2 = arith.cmpi ne, %1, %c0_i32_0 : i32
    scf.if %2 {
      %c0_9 = arith.constant 0 : index
      %c0_10 = arith.constant 0 : index
      %12 = vector.load %arg4[%c0_9, %c0_10] : memref<8x128xbf16, #tpu.memory_space<vmem>>, vector<8x128xbf16>
      %c0_11 = arith.constant 0 : index
      %c0_12 = arith.constant 0 : index
      %13 = vector.load %arg6[%c0_11, %c0_12] : memref<128x256xbf16, #tpu.memory_space<vmem>>, vector<128x256xbf16>
      %cst_13 = arith.constant dense<0.000000e+00> : vector<8x256xf32>
      %14 = tpu.matmul %12, %13, %cst_13 {dimension_numbers = #tpu.dot_dimension_numbers<[1], [0], [0], [1], [0, 0, 1, 1], [], []>} : vector<8x128xbf16>, vector<128x256xbf16>, vector<8x256xf32> -> vector<8x256xf32>
      %c0_14 = arith.constant 0 : index
      %c0_15 = arith.constant 0 : index
      %15 = vector.load %arg9[%c0_14, %c0_15] : memref<8x256xf32, #tpu.memory_space<vmem>>, vector<8x256xf32>
      tpu.vector_store %arg9[%c0_14, %c0_15], %14 {strides = array<i32>} : memref<8x256xf32, #tpu.memory_space<vmem>>, vector<8x256xf32>,
    } else {
    }
    %c0 = arith.constant 0 : index
    %c0_1 = arith.constant 0 : index
    %3 = vector.load %arg9[%c0, %c0_1] : memref<8x256xf32, #tpu.memory_space<vmem>>, vector<8x256xf32>
    %c0_2 = arith.constant 0 : index
    %c0_3 = arith.constant 0 : index
    %4 = vector.load %arg3[%c0_2, %c0_3] : memref<8x768xbf16, #tpu.memory_space<vmem>>, vector<8x768xbf16>
    %c0_4 = arith.constant 0 : index
    %c0_5 = arith.constant 0 : index
    %5 = vector.load %arg5[%c0_4, %c0_5] : memref<768x256xbf16, #tpu.memory_space<vmem>>, vector<768x256xbf16>
    %cst = arith.constant dense<0.000000e+00> : vector<8x256xf32>
    %6 = tpu.matmul %4, %5, %cst {dimension_numbers = #tpu.dot_dimension_numbers<[1], [0], [0], [1], [0, 0, 1, 1], [], []>} : vector<8x768xbf16>, vector<768x256xbf16>, vector<8x256xf32> -> vector<8x256xf32>
    %7 = arith.addf %3, %6 : vector<8x256xf32>
    %c0_6 = arith.constant 0 : index
    %c0_7 = arith.constant 0 : index
    %8 = vector.load %arg9[%c0_6, %c0_7] : memref<8x256xf32, #tpu.memory_space<vmem>>, vector<8x256xf32>
    tpu.vector_store %arg9[%c0_6, %c0_7], %7 {strides = array<i32>} : memref<8x256xf32, #tpu.memory_space<vmem>>, vector<8x256xf32>,
    %c2_i32 = arith.constant 2 : i32
    %9 = arith.cmpi eq, %arg2, %c2_i32 : i32
    %10 = arith.extui %9 : i1 to i32
    %c0_i32_8 = arith.constant 0 : i32
    %11 = arith.cmpi ne, %10, %c0_i32_8 : i32
    scf.if %11 {
      %c0_9 = arith.constant 0 : index
      %c0_10 = arith.constant 0 : index
      %12 = vector.load %arg9[%c0_9, %c0_10] : memref<8x256xf32, #tpu.memory_space<vmem>>, vector<8x256xf32>
      %c0_11 = arith.constant 0 : index
      %c0_12 = arith.constant 0 : index
      %13 = vector.load %arg7[%c0_11, %c0_12] : memref<1x256xf32, #tpu.memory_space<vmem>>, vector<1x256xf32>
      %14 = vector.broadcast %13 : vector<1x256xf32> to vector<8x256xf32>
      %15 = arith.addf %12, %14 : vector<8x256xf32>
      %cst_13 = arith.constant 0.000000e+00 : f32
      %16 = vector.broadcast %cst_13 : f32 to vector<8x256xf32>
      %17 = arith.cmpf oge, %15, %16 : vector<8x256xf32>
      %cst_14 = arith.constant 1.000000e-01 : f32
      %18 = vector.broadcast %cst_14 : f32 to vector<8x256xf32>
      %19 = arith.mulf %18, %15 : vector<8x256xf32>
      %20 = arith.select %17, %15, %19 : vector<8x256xi1>, vector<8x256xf32>
      %21 = arith.truncf %20 : vector<8x256xf32> to vector<8x256xbf16>
      %c0_15 = arith.constant 0 : index
      %c0_16 = arith.constant 0 : index
      %22 = vector.load %arg8[%c0_15, %c0_16] : memref<8x256xbf16, #tpu.memory_space<vmem>>, vector<8x256xbf16>
      tpu.vector_store %arg8[%c0_15, %c0_16], %21 {strides = array<i32>} : memref<8x256xbf16, #tpu.memory_space<vmem>>, vector<8x256xbf16>,
    } else {
    }
    return
  }
  func.func @transform_0(%arg0: i32, %arg1: i32, %arg2: i32) -> (i32, i32) {
    %c0_i32 = arith.constant 0 : i32
    return %arg0, %arg2 : i32, i32
  }
  func.func @transform_1(%arg0: i32, %arg1: i32, %arg2: i32) -> (i32, i32) {
    %c0_i32 = arith.constant 0 : i32
    %c0_i32_0 = arith.constant 0 : i32
    return %arg0, %c0_i32 : i32, i32
  }
  func.func @transform_2(%arg0: i32, %arg1: i32, %arg2: i32) -> (i32, i32) {
    %c0_i32 = arith.constant 0 : i32
    return %arg2, %arg1 : i32, i32
  }
  func.func @transform_3(%arg0: i32, %arg1: i32, %arg2: i32) -> (i32, i32) {
    %c0_i32 = arith.constant 0 : i32
    %c0_i32_0 = arith.constant 0 : i32
    return %c0_i32, %arg1 : i32, i32
  }
  func.func @transform_4(%arg0: i32, %arg1: i32, %arg2: i32) -> (i32, i32) {
    %c0_i32 = arith.constant 0 : i32
    %c0_i32_0 = arith.constant 0 : i32
    return %c0_i32, %arg1 : i32, i32
  }
  func.func @transform_5(%arg0: i32, %arg1: i32, %arg2: i32) -> (i32, i32) {
    %c0_i32 = arith.constant 0 : i32
    return %arg0, %arg1 : i32, i32
  }
}

module attributes {stable_mosaic.version = 11 : i64} {
  func.func @_head_kernel(%arg0: i32, %arg1: i32, %arg2: memref<8x768xbf16, #tpu.memory_space<vmem>>, %arg3: memref<768x512xbf16, #tpu.memory_space<vmem>>, %arg4: memref<1x512xf32, #tpu.memory_space<vmem>>, %arg5: memref<512x128xf32, #tpu.memory_space<vmem>>, %arg6: memref<1x128xf32, #tpu.memory_space<vmem>>, %arg7: memref<8x128xf32, #tpu.memory_space<vmem>>, %arg8: memref<8x512xf32, #tpu.memory_space<vmem>>) attributes {dimension_semantics = [#tpu.dimension_semantics<parallel>, #tpu.dimension_semantics<arbitrary>], iteration_bounds = array<i64: 1, 3>, scalar_prefetch = 0 : i64, scratch_operands = 1 : i64, tpu.core_type = #tpu.core_type<tc>, window_params = [{transform_indices = @transform_0, window_bounds = array<i64: 8, 768>}, {transform_indices = @transform_1, window_bounds = array<i64: 768, 512>}, {pipeline_mode = #tpu.pipeline_mode<synchronous>, transform_indices = @transform_2, window_bounds = array<i64: 1, 512>}, {pipeline_mode = #tpu.pipeline_mode<synchronous>, transform_indices = @transform_3, window_bounds = array<i64: 512, 128>}, {pipeline_mode = #tpu.pipeline_mode<synchronous>, transform_indices = @transform_4, window_bounds = array<i64: 1, 128>}, {transform_indices = @transform_5, window_bounds = array<i64: 8, 128>}]} {
    %c0_i32 = arith.constant 0 : i32
    %0 = arith.cmpi eq, %arg1, %c0_i32 : i32
    %1 = arith.extui %0 : i1 to i32
    %c0_i32_0 = arith.constant 0 : i32
    %2 = arith.cmpi ne, %1, %c0_i32_0 : i32
    scf.if %2 {
      %cst_9 = arith.constant 0.000000e+00 : f32
      %12 = vector.broadcast %cst_9 : f32 to vector<8x512xf32>
      %c0_10 = arith.constant 0 : index
      %c0_11 = arith.constant 0 : index
      %13 = vector.load %arg8[%c0_10, %c0_11] : memref<8x512xf32, #tpu.memory_space<vmem>>, vector<8x512xf32>
      tpu.vector_store %arg8[%c0_10, %c0_11], %12 {strides = array<i32>} : memref<8x512xf32, #tpu.memory_space<vmem>>, vector<8x512xf32>,
    } else {
    }
    %c0 = arith.constant 0 : index
    %c0_1 = arith.constant 0 : index
    %3 = vector.load %arg8[%c0, %c0_1] : memref<8x512xf32, #tpu.memory_space<vmem>>, vector<8x512xf32>
    %c0_2 = arith.constant 0 : index
    %c0_3 = arith.constant 0 : index
    %4 = vector.load %arg2[%c0_2, %c0_3] : memref<8x768xbf16, #tpu.memory_space<vmem>>, vector<8x768xbf16>
    %c0_4 = arith.constant 0 : index
    %c0_5 = arith.constant 0 : index
    %5 = vector.load %arg3[%c0_4, %c0_5] : memref<768x512xbf16, #tpu.memory_space<vmem>>, vector<768x512xbf16>
    %cst = arith.constant dense<0.000000e+00> : vector<8x512xf32>
    %6 = tpu.matmul %4, %5, %cst {dimension_numbers = #tpu.dot_dimension_numbers<[1], [0], [0], [1], [0, 0, 1, 1], [], []>} : vector<8x768xbf16>, vector<768x512xbf16>, vector<8x512xf32> -> vector<8x512xf32>
    %7 = arith.addf %3, %6 : vector<8x512xf32>
    %c0_6 = arith.constant 0 : index
    %c0_7 = arith.constant 0 : index
    %8 = vector.load %arg8[%c0_6, %c0_7] : memref<8x512xf32, #tpu.memory_space<vmem>>, vector<8x512xf32>
    tpu.vector_store %arg8[%c0_6, %c0_7], %7 {strides = array<i32>} : memref<8x512xf32, #tpu.memory_space<vmem>>, vector<8x512xf32>,
    %c2_i32 = arith.constant 2 : i32
    %9 = arith.cmpi eq, %arg1, %c2_i32 : i32
    %10 = arith.extui %9 : i1 to i32
    %c0_i32_8 = arith.constant 0 : i32
    %11 = arith.cmpi ne, %10, %c0_i32_8 : i32
    scf.if %11 {
      %c0_9 = arith.constant 0 : index
      %c0_10 = arith.constant 0 : index
      %12 = vector.load %arg8[%c0_9, %c0_10] : memref<8x512xf32, #tpu.memory_space<vmem>>, vector<8x512xf32>
      %c0_11 = arith.constant 0 : index
      %c0_12 = arith.constant 0 : index
      %13 = vector.load %arg4[%c0_11, %c0_12] : memref<1x512xf32, #tpu.memory_space<vmem>>, vector<1x512xf32>
      %14 = vector.broadcast %13 : vector<1x512xf32> to vector<8x512xf32>
      %15 = arith.addf %12, %14 : vector<8x512xf32>
      %cst_13 = arith.constant 0.000000e+00 : f32
      %16 = vector.broadcast %cst_13 : f32 to vector<8x512xf32>
      %17 = arith.cmpf oge, %15, %16 : vector<8x512xf32>
      %cst_14 = arith.constant 0.00999999977 : f32
      %18 = vector.broadcast %cst_14 : f32 to vector<8x512xf32>
      %19 = arith.mulf %18, %15 : vector<8x512xf32>
      %20 = arith.select %17, %15, %19 : vector<8x512xi1>, vector<8x512xf32>
      %c0_15 = arith.constant 0 : index
      %c0_16 = arith.constant 0 : index
      %21 = vector.load %arg5[%c0_15, %c0_16] : memref<512x128xf32, #tpu.memory_space<vmem>>, vector<512x128xf32>
      %cst_17 = arith.constant dense<0.000000e+00> : vector<8x128xf32>
      %22 = tpu.matmul %20, %21, %cst_17 {dimension_numbers = #tpu.dot_dimension_numbers<[1], [0], [0], [1], [0, 0, 1, 1], [], []>} : vector<8x512xf32>, vector<512x128xf32>, vector<8x128xf32> -> vector<8x128xf32>
      %c0_18 = arith.constant 0 : index
      %c0_19 = arith.constant 0 : index
      %23 = vector.load %arg6[%c0_18, %c0_19] : memref<1x128xf32, #tpu.memory_space<vmem>>, vector<1x128xf32>
      %24 = vector.broadcast %23 : vector<1x128xf32> to vector<8x128xf32>
      %25 = arith.addf %22, %24 : vector<8x128xf32>
      %c0_20 = arith.constant 0 : index
      %c0_21 = arith.constant 0 : index
      %26 = vector.load %arg7[%c0_20, %c0_21] : memref<8x128xf32, #tpu.memory_space<vmem>>, vector<8x128xf32>
      tpu.vector_store %arg7[%c0_20, %c0_21], %25 {strides = array<i32>} : memref<8x128xf32, #tpu.memory_space<vmem>>, vector<8x128xf32>,
    } else {
    }
    return
  }
  func.func @transform_0(%arg0: i32, %arg1: i32) -> (i32, i32) {
    %c0_i32 = arith.constant 0 : i32
    return %arg0, %arg1 : i32, i32
  }
  func.func @transform_1(%arg0: i32, %arg1: i32) -> (i32, i32) {
    %c0_i32 = arith.constant 0 : i32
    %c0_i32_0 = arith.constant 0 : i32
    return %arg1, %c0_i32 : i32, i32
  }
  func.func @transform_2(%arg0: i32, %arg1: i32) -> (i32, i32) {
    %c0_i32 = arith.constant 0 : i32
    %c0_i32_0 = arith.constant 0 : i32
    %c0_i32_1 = arith.constant 0 : i32
    return %c0_i32, %c0_i32_0 : i32, i32
  }
  func.func @transform_3(%arg0: i32, %arg1: i32) -> (i32, i32) {
    %c0_i32 = arith.constant 0 : i32
    %c0_i32_0 = arith.constant 0 : i32
    %c0_i32_1 = arith.constant 0 : i32
    return %c0_i32, %c0_i32_0 : i32, i32
  }
  func.func @transform_4(%arg0: i32, %arg1: i32) -> (i32, i32) {
    %c0_i32 = arith.constant 0 : i32
    %c0_i32_0 = arith.constant 0 : i32
    %c0_i32_1 = arith.constant 0 : i32
    return %c0_i32, %c0_i32_0 : i32, i32
  }
  func.func @transform_5(%arg0: i32, %arg1: i32) -> (i32, i32) {
    %c0_i32 = arith.constant 0 : i32
    %c0_i32_0 = arith.constant 0 : i32
    return %arg0, %c0_i32 : i32, i32
  }
}

</mosaic_0001>

<bundles_post_ra>
// kernel: discriminator_forward.7
= control target key start
LH: loop header
LB: loop body
LE: loop exit
PB: predicated region body
PF: predicated region fallthrough
CT: control target
= control target key end

     0   :  { %s647_s1 = inlined_call_operand.vmem [shape: bf16[128,128], index: 1, kind: input, shape index: {}]   ;;  %s648_s2 = inlined_call_operand.vmem [shape: f32[1,128], index: 2, kind: input, shape index: {}]   ;;  %s649_s0 = inlined_call_operand.vmem [shape: bf16[128,128], index: 0, kind: input, shape index: {}]   ;;  %s650_s3 = inlined_call_operand.vmem [shape: bf16[128,128], index: 3, kind: output, shape index: {}]  }
   0x1   :  { %v461_v0 = vld [vmem:[%s647_s1 + $0x38] sm:$0xff]  ;;  %v460_v1 = vld [vmem:[%s647_s1 + $0x30] sm:$0xff]  ;;  %v459_v2 = vld [vmem:[%s647_s1 + $0x28] sm:$0xff] }
   0x2   :  { %178 = vmatpush.bf16.msra.mxu0 %v461_v0  ;;  %509 = vmatpush.bf16.msra.mxu1 %v461_v0  ;;  %v458_v3 = vld [vmem:[%s647_s1 + $0x20] sm:$0xff]  ;;  %v457_v4 = vld [vmem:[%s647_s1 + $0x18] sm:$0xff]  ;;  %v456_v5 = vld [vmem:[%s647_s1 + $0x10] sm:$0xff] }
   0x3   :  { %510 = vmatpush.bf16.msra.mxu2 %v461_v0  ;;  %511 = vmatpush.bf16.msra.mxu3 %v461_v0  ;;  %v455_v6 = vld [vmem:[%s647_s1 + $0x8] sm:$0xff]  ;;  %v454_v7 = vld [vmem:[%s647_s1] sm:$0xff]  ;;  %v448_v9 = vld [vmem:[%s649_s0 + $0x10] sm:$0xff] }
   0x4   :  { %v446_v8 = vld [vmem:[%s649_s0] sm:$0xff]  ;;  %v452_v11 = vld [vmem:[%s649_s0 + $0x30] sm:$0xff]  ;;  %v447_v12 = vld [vmem:[%s649_s0 + $0x8] sm:$0xff] }
   0x5   :  { %v450_v10 = vld [vmem:[%s649_s0 + $0x20] sm:$0xff]  ;;  %v449_v13 = vld [vmem:[%s649_s0 + $0x18] sm:$0xff]  ;;  %v451_v14 = vld [vmem:[%s649_s0 + $0x28] sm:$0xff] }
   0x6   :  { %179 = vmatpush.bf16.msra.mxu0 %v460_v1  ;;  %512 = vmatpush.bf16.msra.mxu1 %v460_v1  ;;  %v453_v15 = vld [vmem:[%s649_s0 + $0x38] sm:$0xff]  ;;  %v605_v18 = vld [vmem:[%s648_s2] ss:$0 sm:$0xff] }
   0x7   :  { %513 = vmatpush.bf16.msra.mxu2 %v460_v1  ;;  %514 = vmatpush.bf16.msra.mxu3 %v460_v1 }
   0xa   :  { %180 = vmatpush.bf16.msra.mxu0 %v459_v2  ;;  %515 = vmatpush.bf16.msra.mxu1 %v459_v2 }
   0xb   :  { %516 = vmatpush.bf16.msra.mxu2 %v459_v2  ;;  %517 = vmatpush.bf16.msra.mxu3 %v459_v2 }
   0xe   :  { %181 = vmatpush.bf16.msra.mxu0 %v458_v3  ;;  %518 = vmatpush.bf16.msra.mxu1 %v458_v3 }
   0xf   :  { %519 = vmatpush.bf16.msra.mxu2 %v458_v3  ;;  %520 = vmatpush.bf16.msra.mxu3 %v458_v3 }
  0x12   :  { %182 = vmatpush.bf16.msra.mxu0 %v457_v4  ;;  %521 = vmatpush.bf16.msra.mxu1 %v457_v4 }
  0x13   :  { %522 = vmatpush.bf16.msra.mxu2 %v457_v4  ;;  %523 = vmatpush.bf16.msra.mxu3 %v457_v4 }
  0x16   :  { %183 = vmatpush.bf16.msra.mxu0 %v456_v5  ;;  %524 = vmatpush.bf16.msra.mxu1 %v456_v5 }
  0x17   :  { %525 = vmatpush.bf16.msra.mxu2 %v456_v5  ;;  %526 = vmatpush.bf16.msra.mxu3 %v456_v5 }
  0x1a   :  { %184 = vmatpush.bf16.msra.mxu0 %v455_v6  ;;  %527 = vmatpush.bf16.msra.mxu1 %v455_v6 }
  0x1b   :  { %528 = vmatpush.bf16.msra.mxu2 %v455_v6  ;;  %529 = vmatpush.bf16.msra.mxu3 %v455_v6 }
  0x1e   :  { %185 = vmatpush.bf16.msra.mxu0 %v454_v7  ;;  %530 = vmatpush.bf16.msra.mxu1 %v454_v7 }
  0x1f   :  { %531 = vmatpush.bf16.msra.mxu2 %v454_v7  ;;  %532 = vmatpush.bf16.msra.mxu3 %v454_v7 }
  0x21   :  { %186 = vmatmul.bf16.vlgmr.msra.gmra.mxu0 %v446_v8  ;;  %196 = vmatmul.bf16.vlgmr.msra.gmra.mxu1 %v448_v9 }
  0x22   :  { %206 = vmatmul.bf16.vlgmr.msra.gmra.mxu2 %v450_v10  ;;  %216 = vmatmul.bf16.vlgmr.msra.gmra.mxu3 %v452_v11 }
  0x31   :  { %191 = vmatmul.bf16.gmra.mxu0 %v447_v12  ;;  %201 = vmatmul.bf16.gmra.mxu1 %v449_v13 }
  0x32   :  { %211 = vmatmul.bf16.gmra.mxu2 %v451_v14  ;;  %221 = vmatmul.bf16.gmra.mxu3 %v453_v15 }
  0x9e   :  { %v187_v16 = vpop.f32.mrf.mxu0  ;;  %v197_v17 = vpop.f32.mrf.mxu1 }
  0x9f   :  { %v282_v19 = vadd.f32 %v605_v18, %v187_v16  ;;  %v286_v20 = vadd.f32 %v605_v18, %v197_v17 }
  0xa1   :  { %v314_v25 = vmul.f32 0.1, %v282_v19  ;;  %v318_v26 = vmul.f32 0.1, %v286_v20  ;;  %vm298_vm0 = vcmp.ge.f32.partialorder %v282_v19, 0.0  ;;  %vm302_vm1 = vcmp.ge.f32.partialorder %v286_v20, 0.0 }
  0xa3   :  { %v330_v33 = vsel %vm298_vm0, %v282_v19, %v314_v25  ;;  %v334_v34 = vsel %vm302_vm1, %v286_v20, %v318_v26 }
  0xa5   :  { %v207_v21 = vpop.f32.mrf.mxu2  ;;  %v217_v22 = vpop.f32.mrf.mxu3 }
  0xa6   :  { %v189_v23 = vpop.f32.mrf.mxu0  ;;  %v199_v24 = vpop.f32.mrf.mxu1  ;;  %v290_v31 = vadd.f32 %v605_v18, %v207_v21  ;;  %v294_v32 = vadd.f32 %v605_v18, %v217_v22 }
  0xa7   :  { %v283_v27 = vadd.f32 %v605_v18, %v189_v23  ;;  %v287_v28 = vadd.f32 %v605_v18, %v199_v24 }
  0xa8   :  { %v322_v41 = vmul.f32 0.1, %v290_v31  ;;  %v326_v42 = vmul.f32 0.1, %v294_v32  ;;  %vm306_vm4 = vcmp.ge.f32.partialorder %v290_v31, 0.0  ;;  %vm310_vm5 = vcmp.ge.f32.partialorder %v294_v32, 0.0 }
  0xa9   :  { %vm299_vm2 = vcmp.ge.f32.partialorder %v283_v27, 0.0  ;;  %v315_v29 = vmul.f32 0.1, %v283_v27  ;;  %vm303_vm3 = vcmp.ge.f32.partialorder %v287_v28, 0.0  ;;  %v319_v30 = vmul.f32 0.1, %v287_v28 }
  0xaa   :  { %v338_v49 = vsel %vm306_vm4, %v290_v31, %v322_v41  ;;  %v342_v50 = vsel %vm310_vm5, %v294_v32, %v326_v42 }
  0xab   :  { %v331_v35 = vsel %vm299_vm2, %v283_v27, %v315_v29  ;;  %v335_v36 = vsel %vm303_vm3, %v287_v28, %v319_v30 }
  0xac   :  { %v465_v37 = vpack.c.bf16 %v331_v35, %v330_v33  ;;  %v475_v38 = vpack.c.bf16 %v335_v36, %v334_v34 }
  0xad   :  { %v209_v39 = vpop.f32.mrf.mxu2  ;;  %v219_v40 = vpop.f32.mrf.mxu3 }
  0xae   :  { %466 = vst [vmem:[%s650_s3] sm:$0xff] %v465_v37   ;;  %v291_v43 = vadd.f32 %v605_v18, %v209_v39  ;;  %v295_v44 = vadd.f32 %v605_v18, %v219_v40  ;;  %v192_v45 = vpop.f32.mrf.mxu0  ;;  %v202_v46 = vpop.f32.mrf.mxu1 }
  0xaf   :  { %503 = vst [vmem:[%s650_s3 + $0x10] sm:$0xff] %v475_v38   ;;  %v284_v55 = vadd.f32 %v605_v18, %v192_v45  ;;  %v288_v56 = vadd.f32 %v605_v18, %v202_v46 }
  0xb0   :  { %vm307_vm6 = vcmp.ge.f32.partialorder %v291_v43, 0.0  ;;  %v323_v47 = vmul.f32 0.1, %v291_v43  ;;  %vm311_vm7 = vcmp.ge.f32.partialorder %v295_v44, 0.0  ;;  %v327_v48 = vmul.f32 0.1, %v295_v44 }
  0xb1   :  { %v316_v61 = vmul.f32 0.1, %v284_v55  ;;  %v320_v62 = vmul.f32 0.1, %v288_v56  ;;  %vm300_vm8 = vcmp.ge.f32.partialorder %v284_v55, 0.0  ;;  %vm304_vm9 = vcmp.ge.f32.partialorder %v288_v56, 0.0 }
  0xb2   :  { %v339_v51 = vsel %vm307_vm6, %v291_v43, %v323_v47  ;;  %v343_v52 = vsel %vm311_vm7, %v295_v44, %v327_v48 }
  0xb3   :  { %v485_v53 = vpack.c.bf16 %v339_v51, %v338_v49  ;;  %v495_v54 = vpack.c.bf16 %v343_v52, %v342_v50  ;;  %v332_v5 = vsel %vm300_vm8, %v284_v55, %v316_v61  ;;  %v336_v6 = vsel %vm304_vm9, %v288_v56, %v320_v62 }
  0xb5   :  { %505 = vst [vmem:[%s650_s3 + $0x20] sm:$0xff] %v485_v53   ;;  %v212_v57 = vpop.f32.mrf.mxu2  ;;  %v222_v58 = vpop.f32.mrf.mxu3 }
  0xb6   :  { %507 = vst [vmem:[%s650_s3 + $0x30] sm:$0xff] %v495_v54   ;;  %v194_v59 = vpop.f32.mrf.mxu0  ;;  %v204_v60 = vpop.f32.mrf.mxu1  ;;  %v292_v3 = vadd.f32 %v605_v18, %v212_v57  ;;  %v296_v4 = vadd.f32 %v605_v18, %v222_v58 }
  0xb7   :  { %v285_v63 = vadd.f32 %v605_v18, %v194_v59  ;;  %v289_v0 = vadd.f32 %v605_v18, %v204_v60 }
  0xb8   :  { %v324_v13 = vmul.f32 0.1, %v292_v3  ;;  %v328_v14 = vmul.f32 0.1, %v296_v4  ;;  %vm308_vm12 = vcmp.ge.f32.partialorder %v292_v3, 0.0  ;;  %vm312_vm13 = vcmp.ge.f32.partialorder %v296_v4, 0.0 }
  0xb9   :  { %vm301_vm10 = vcmp.ge.f32.partialorder %v285_v63, 0.0  ;;  %v317_v1 = vmul.f32 0.1, %v285_v63  ;;  %vm305_vm11 = vcmp.ge.f32.partialorder %v289_v0, 0.0  ;;  %v321_v2 = vmul.f32 0.1, %v289_v0 }
  0xba   :  { %v340_v20 = vsel %vm308_vm12, %v292_v3, %v324_v13  ;;  %v344_v21 = vsel %vm312_vm13, %v296_v4, %v328_v14 }
  0xbb   :  { %v333_v7 = vsel %vm301_vm10, %v285_v63, %v317_v1  ;;  %v337_v8 = vsel %vm305_vm11, %v289_v0, %v321_v2 }
  0xbc   :  { %v470_v9 = vpack.c.bf16 %v333_v7, %v332_v5  ;;  %v480_v10 = vpack.c.bf16 %v337_v8, %v336_v6 }
  0xbd   :  { %v214_v11 = vpop.f32.mrf.mxu2  ;;  %v224_v12 = vpop.f32.mrf.mxu3 }
  0xbe   :  { %502 = vst [vmem:[%s650_s3 + $0x8] sm:$0xff] %v470_v9   ;;  %v293_v15 = vadd.f32 %v605_v18, %v214_v11  ;;  %v297_v16 = vadd.f32 %v605_v18, %v224_v12 }
  0xbf   :  { %504 = vst [vmem:[%s650_s3 + $0x18] sm:$0xff] %v480_v10  }
  0xc0   :  { %vm309_vm14 = vcmp.ge.f32.partialorder %v293_v15, 0.0  ;;  %v325_v17 = vmul.f32 0.1, %v293_v15  ;;  %vm313_vm15 = vcmp.ge.f32.partialorder %v297_v16, 0.0  ;;  %v329_v19 = vmul.f32 0.1, %v297_v16 }
  0xc2   :  { %v341_v22 = vsel %vm309_vm14, %v293_v15, %v325_v17  ;;  %v345_v23 = vsel %vm313_vm15, %v297_v16, %v329_v19 }
  0xc3   :  { %v490_v24 = vpack.c.bf16 %v341_v22, %v340_v20  ;;  %v500_v25 = vpack.c.bf16 %v345_v23, %v344_v21 }
  0xc5   :  { %506 = vst [vmem:[%s650_s3 + $0x28] sm:$0xff] %v490_v24  }
  0xc6   :  { %508 = vst [vmem:[%s650_s3 + $0x38] sm:$0xff] %v500_v25  }

// kernel: discriminator_forward.8
= control target key start
LH: loop header
LB: loop body
LE: loop exit
PB: predicated region body
PF: predicated region fallthrough
CT: control target
= control target key end

     0   :  { %s2023_s18 = smov 0   ;;  %s2025_s19 = smov 0   ;;  %s2380_s0 = inlined_call_operand.vmem [shape: bf16[128,1152], index: 0, kind: input, shape index: {}]   ;;  %s2381_s1 = inlined_call_operand.vmem [shape: bf16[128,128], index: 1, kind: input, shape index: {}]   ;;  %s2382_s2 = inlined_call_operand.vmem [shape: bf16[1152,128], index: 2, kind: input, shape index: {}]   ;;  %s2383_s3 = inlined_call_operand.vmem [shape: bf16[128,128], index: 3, kind: input, shape index: {}]   ;;  %s2384_s4 = inlined_call_operand.vmem [shape: f32[1,128], index: 4, kind: input, shape index: {}]   ;;  %s2385_s5 = inlined_call_operand.vmem [shape: bf16[128,128], index: 5, kind: output, shape index: {}]  }
   0x1   :  { %s2027_s20 = smov 0   ;;  %s2029_s21 = smov 0  }
   0x2   :  { %s2031_s22 = smov 0  }
   0x3 LB: > { %s27_s23 = sadd.s32 1, %s1987_s21  ;;  %p50_p1 = scmp.ne.s32.totalorder %s1979_s19, %s1975_s18  ;;  %s1991_s22 = sphi %s2031_s22, %s15_s22   ;;  %s1987_s21 = sphi %s2029_s21, %s2389_s21   ;;  %s1983_s20 = sphi %s2027_s20, %s2388_s20   ;;  %s1979_s19 = sphi %s2025_s19, %s2387_s19   ;;  %s1975_s18 = sphi %s2023_s18, %s2386_s18  }
   0x4   : > { %p28_p0 = scmp.ge.s32.totalorder %s27_s23, 3  ;;  %p51_p2 = scmp.eq.s32.totalorder %s1991_s22, 0 }
   0x5   : > { %s43_s25 = sadd.s32 1, %s1979_s19  ;;  %p1452_p5 = scmp.ge.s32.totalorder %s1991_s22, 3 }
   0x6   : > { %s2391_s23 = smov (%p28_p0, %s27_s23), 0  ;;  %p52_p3 = por %p51_p2, %p50_p1 }
   0x7   : > { %s39_s24 = ssub.s32 %s1987_s21, %s2391_s23  ;;  %232 = sbr.rel (%p1452_p5) target bundleno = 49 (0x31), region = 28 }
   0x8   : > { %p41_p4 = scmp.eq.s32.totalorder %s39_s24, 0 }
   0xa   : > { %s2058_s26 = scalar_select %p41_p4, %s1979_s19, %s43_s25  }
   0xc   : > { %235 = sbr.rel (!%p52_p3) target bundleno = 49 (0x31), region = 32  ;;  %s237_s27 = sand.u32 (%p52_p3), 1, %s1979_s19  }
   0xd   : > { %s1750_s28 = smul.u32 (%p52_p3), 12, %s1987_s21 }
   0xe   : > { %s1910_s29 = smul.u32 (%p52_p3), 192, %s237_s27 }
   0xf   : > { %s2066_s7 = scalar_lea.vmem (%p52_p3), %s2380_s0, %s1750_s28 }
  0x10   : > { %v260_v0 = vld [vmem:[%s2066_s7] sm:$0xff] (%p52_p3)  ;;  %v264_v2 = vld [vmem:[%s2066_s7 + $0x48] sm:$0xff] (%p52_p3)  ;;  %s2071_s8 = scalar_lea.vmem (%p52_p3), [#allocation3], %s1910_s29  ;;  %v268_v4 = vld [vmem:[%s2066_s7 + $0x90] sm:$0xff] (%p52_p3) }
  0x11   : > { %v262_v1 = vld [vmem:[%s2066_s7 + $0x24] sm:$0xff]  ;;  %261 = vst [vmem:[%s2071_s8] sm:$0xff] %v260_v0  ;;  %v266_v3 = vld [vmem:[%s2066_s7 + $0x6c] sm:$0xff]  ;;  %v270_v5 = vld [vmem:[%s2066_s7 + $0xb4] sm:$0xff] }
  0x12   : > { %263 = vst [vmem:[%s2071_s8 + $0xc] sm:$0xff] %v262_v1  ;;  %v272_v6 = vld [vmem:[%s2066_s7 + $0xd8] sm:$0xff]  ;;  %v276_v8 = vld [vmem:[%s2066_s7 + $0x120] sm:$0xff]  ;;  %v280_v10 = vld [vmem:[%s2066_s7 + $0x168] sm:$0xff] }
  0x13   : > { %265 = vst [vmem:[%s2071_s8 + $0x18] sm:$0xff] %v264_v2  ;;  %v274_v7 = vld [vmem:[%s2066_s7 + $0xfc] sm:$0xff]  ;;  %v278_v9 = vld [vmem:[%s2066_s7 + $0x144] sm:$0xff]  ;;  %v282_v11 = vld [vmem:[%s2066_s7 + $0x18c] sm:$0xff] }
  0x14   : > { %267 = vst [vmem:[%s2071_s8 + $0x24] sm:$0xff] %v266_v3  ;;  %v284_v12 = vld [vmem:[%s2066_s7 + $0x1b0] sm:$0xff]  ;;  %v288_v14 = vld [vmem:[%s2066_s7 + $0x1f8] sm:$0xff]  ;;  %v1454_v16 = vld [vmem:[%s2066_s7 + $0x8] sm:$0xf] }
  0x15   : > { %269 = vst [vmem:[%s2071_s8 + $0x30] sm:$0xff] %v268_v4  ;;  %v286_v13 = vld [vmem:[%s2066_s7 + $0x1d4] sm:$0xff]  ;;  %v290_v15 = vld [vmem:[%s2066_s7 + $0x21c] sm:$0xff]  ;;  %v1456_v17 = vld [vmem:[%s2066_s7 + $0x2c] sm:$0xf] }
  0x16   : > { %271 = vst [vmem:[%s2071_s8 + $0x3c] sm:$0xff] %v270_v5  ;;  %v1458_v18 = vld [vmem:[%s2066_s7 + $0x50] sm:$0xf]  ;;  %v1460_v19 = vld [vmem:[%s2066_s7 + $0x74] sm:$0xf] }
  0x17   : > { %273 = vst [vmem:[%s2071_s8 + $0x48] sm:$0xff] %v272_v6  ;;  %v1462_v20 = vld [vmem:[%s2066_s7 + $0x98] sm:$0xf]  ;;  %v1464_v21 = vld [vmem:[%s2066_s7 + $0xbc] sm:$0xf] }
  0x18   : > { %275 = vst [vmem:[%s2071_s8 + $0x54] sm:$0xff] %v274_v7  ;;  %v1466_v22 = vld [vmem:[%s2066_s7 + $0xe0] sm:$0xf]  ;;  %v1468_v23 = vld [vmem:[%s2066_s7 + $0x104] sm:$0xf] }
  0x19   : > { %277 = vst [vmem:[%s2071_s8 + $0x60] sm:$0xff] %v276_v8  ;;  %v1470_v24 = vld [vmem:[%s2066_s7 + $0x128] sm:$0xf]  ;;  %v1472_v25 = vld [vmem:[%s2066_s7 + $0x14c] sm:$0xf] }
  0x1a   : > { %279 = vst [vmem:[%s2071_s8 + $0x6c] sm:$0xff] %v278_v9  ;;  %v1474_v26 = vld [vmem:[%s2066_s7 + $0x170] sm:$0xf]  ;;  %v1476_v27 = vld [vmem:[%s2066_s7 + $0x194] sm:$0xf] }
  0x1b   : > { %281 = vst [vmem:[%s2071_s8 + $0x78] sm:$0xff] %v280_v10  ;;  %v1478_v28 = vld [vmem:[%s2066_s7 + $0x1b8] sm:$0xf]  ;;  %v1480_v29 = vld [vmem:[%s2066_s7 + $0x1dc] sm:$0xf] }
  0x1c   : > { %283 = vst [vmem:[%s2071_s8 + $0x84] sm:$0xff] %v282_v11  ;;  %v1482_v30 = vld [vmem:[%s2066_s7 + $0x200] sm:$0xf]  ;;  %v1484_v31 = vld [vmem:[%s2066_s7 + $0x224] sm:$0xf] }
  0x1d   : > { %285 = vst [vmem:[%s2071_s8 + $0x90] sm:$0xff] %v284_v12 }
  0x1e   : > { %287 = vst [vmem:[%s2071_s8 + $0x9c] sm:$0xff] %v286_v13 }
  0x1f   : > { %289 = vst [vmem:[%s2071_s8 + $0xa8] sm:$0xff] %v288_v14 }
  0x20   : > { %291 = vst [vmem:[%s2071_s8 + $0xb4] sm:$0xff] %v290_v15 }
  0x21   : > { %1455 = vst [vmem:[%s2071_s8 + $0x8] sm:$0xf] %v1454_v16 }
  0x22   : > { %1457 = vst [vmem:[%s2071_s8 + $0x14] sm:$0xf] %v1456_v17 }
  0x23   : > { %1459 = vst [vmem:[%s2071_s8 + $0x20] sm:$0xf] %v1458_v18 }
  0x24   : > { %1461 = vst [vmem:[%s2071_s8 + $0x2c] sm:$0xf] %v1460_v19 }
  0x25   : > { %1463 = vst [vmem:[%s2071_s8 + $0x38] sm:$0xf] %v1462_v20 }
  0x26   : > { %1465 = vst [vmem:[%s2071_s8 + $0x44] sm:$0xf] %v1464_v21 }
  0x27   : > { %1467 = vst [vmem:[%s2071_s8 + $0x50] sm:$0xf] %v1466_v22 }
  0x28   : > { %1469 = vst [vmem:[%s2071_s8 + $0x5c] sm:$0xf] %v1468_v23 }
  0x29   : > { %1471 = vst [vmem:[%s2071_s8 + $0x68] sm:$0xf] %v1470_v24 }
  0x2a   : > { %1473 = vst [vmem:[%s2071_s8 + $0x74] sm:$0xf] %v1472_v25 }
  0x2b   : > { %1475 = vst [vmem:[%s2071_s8 + $0x80] sm:$0xf] %v1474_v26 }
  0x2c   : > { %1477 = vst [vmem:[%s2071_s8 + $0x8c] sm:$0xf] %v1476_v27 }
  0x2d   : > { %1479 = vst [vmem:[%s2071_s8 + $0x98] sm:$0xf] %v1478_v28 }
  0x2e   : > { %1481 = vst [vmem:[%s2071_s8 + $0xa4] sm:$0xf] %v1480_v29 }
  0x2f   : > { %1483 = vst [vmem:[%s2071_s8 + $0xb0] sm:$0xf] %v1482_v30 }
  0x30   : > { %1485 = vst [vmem:[%s2071_s8 + $0xbc] sm:$0xf] %v1484_v31 }
  0x31 PF: > { %p1486_p6 = scmp.ge.s32.totalorder %s1991_s22, 1  ;;  %p348_p7 = scmp.lt.s32.totalorder %s1991_s22, 4 }
  0x33   : > { %p349_p8 = pnand %p1486_p6, %p348_p7 }
  0x34   : > { %s355_s9 = sand.u32 (!%p349_p8), 1, %s1975_s18   ;;  %s413_s10 = smul.u32 (!%p349_p8), 48, %s1983_s20 }
  0x35   : > { %352 = sbr.rel (%p349_p8) target bundleno = 538 (0x21a), region = 62  ;;  %p1488_p10 = scmp.ne.s32.totalorder (!%p349_p8), %s1983_s20, 0 }
  0x36   : > { %s1911_s11 = smul.u32 (!%p349_p8), 192, %s355_s9  ;;  %p414_p9 = scmp.lt.s32.totalorder (!%p349_p8), %s413_s10, 143 }
  0x38   : > { %s2143_s16 = scalar_lea.vmem (!%p349_p8), [#allocation3], %s1911_s11 }
  0x3a   : > { %s2393_s10 = smov (!%p414_p9, %s413_s10), 143  ;;  %441 = sbr.rel (%p1488_p10) target bundleno = 254 (0xfe), region = 70 }
  0x3b   : > { %s1487_s12 = sshll.u32 %s2393_s10, 2 }
  0x3c   : > { %s2141_s15 = scalar_lea.vmem %s2382_s2, %s1487_s12 }
  0x3f   : > { %v1766_v32 = vld [vmem:[%s2383_s3 + $0x38] sm:$0xff]  ;;  %v1765_v33 = vld [vmem:[%s2383_s3 + $0x30] sm:$0xff]  ;;  %v1764_v34 = vld [vmem:[%s2383_s3 + $0x28] sm:$0xff] }
  0x40   : > { %570 = vmatpush.bf16.msra.mxu0 %v1766_v32  ;;  %1862 = vmatpush.bf16.msra.mxu1 %v1766_v32  ;;  %v1763_v35 = vld [vmem:[%s2383_s3 + $0x20] sm:$0xff]  ;;  %v1762_v36 = vld [vmem:[%s2383_s3 + $0x18] sm:$0xff]  ;;  %v1761_v37 = vld [vmem:[%s2383_s3 + $0x10] sm:$0xff] }
  0x41   : > { %1863 = vmatpush.bf16.msra.mxu2 %v1766_v32  ;;  %1864 = vmatpush.bf16.msra.mxu3 %v1766_v32  ;;  %v1760_v38 = vld [vmem:[%s2383_s3 + $0x8] sm:$0xff]  ;;  %v1759_v39 = vld [vmem:[%s2383_s3] sm:$0xff]  ;;  %v1753_v41 = vld [vmem:[%s2381_s1 + $0x10] sm:$0xff] }
  0x42   : > { %v1751_v40 = vld [vmem:[%s2381_s1] sm:$0xff]  ;;  %v1757_v43 = vld [vmem:[%s2381_s1 + $0x30] sm:$0xff]  ;;  %v1752_v44 = vld [vmem:[%s2381_s1 + $0x8] sm:$0xff] }
  0x43   : > { %v1755_v42 = vld [vmem:[%s2381_s1 + $0x20] sm:$0xff]  ;;  %v1754_v45 = vld [vmem:[%s2381_s1 + $0x18] sm:$0xff]  ;;  %v1756_v46 = vld [vmem:[%s2381_s1 + $0x28] sm:$0xff] }
  0x44   : > { %571 = vmatpush.bf16.msra.mxu0 %v1765_v33  ;;  %1865 = vmatpush.bf16.msra.mxu1 %v1765_v33  ;;  %v1758_v47 = vld [vmem:[%s2381_s1 + $0x38] sm:$0xff] }
  0x45   : > { %1866 = vmatpush.bf16.msra.mxu2 %v1765_v33  ;;  %1867 = vmatpush.bf16.msra.mxu3 %v1765_v33 }
  0x48   : > { %572 = vmatpush.bf16.msra.mxu0 %v1764_v34  ;;  %1868 = vmatpush.bf16.msra.mxu1 %v1764_v34 }
  0x49   : > { %1869 = vmatpush.bf16.msra.mxu2 %v1764_v34  ;;  %1870 = vmatpush.bf16.msra.mxu3 %v1764_v34 }
  0x4c   : > { %573 = vmatpush.bf16.msra.mxu0 %v1763_v35  ;;  %1871 = vmatpush.bf16.msra.mxu1 %v1763_v35 }
  0x4d   : > { %1872 = vmatpush.bf16.msra.mxu2 %v1763_v35  ;;  %1873 = vmatpush.bf16.msra.mxu3 %v1763_v35 }
  0x50   : > { %574 = vmatpush.bf16.msra.mxu0 %v1762_v36  ;;  %1874 = vmatpush.bf16.msra.mxu1 %v1762_v36 }
  0x51   : > { %1875 = vmatpush.bf16.msra.mxu2 %v1762_v36  ;;  %1876 = vmatpush.bf16.msra.mxu3 %v1762_v36 }
  0x54   : > { %575 = vmatpush.bf16.msra.mxu0 %v1761_v37  ;;  %1877 = vmatpush.bf16.msra.mxu1 %v1761_v37 }
  0x55   : > { %1878 = vmatpush.bf16.msra.mxu2 %v1761_v37  ;;  %1879 = vmatpush.bf16.msra.mxu3 %v1761_v37 }
  0x58   : > { %576 = vmatpush.bf16.msra.mxu0 %v1760_v38  ;;  %1880 = vmatpush.bf16.msra.mxu1 %v1760_v38 }
  0x59   : > { %1881 = vmatpush.bf16.msra.mxu2 %v1760_v38  ;;  %1882 = vmatpush.bf16.msra.mxu3 %v1760_v38 }
  0x5c   : > { %577 = vmatpush.bf16.msra.mxu0 %v1759_v39  ;;  %1883 = vmatpush.bf16.msra.mxu1 %v1759_v39 }
  0x5d   : > { %1884 = vmatpush.bf16.msra.mxu2 %v1759_v39  ;;  %1885 = vmatpush.bf16.msra.mxu3 %v1759_v39 }
  0x5f   : > { %578 = vmatmul.bf16.vlgmr.msra.gmra.mxu0 %v1751_v40  ;;  %588 = vmatmul.bf16.vlgmr.msra.gmra.mxu1 %v1753_v41 }
  0x60   : > { %598 = vmatmul.bf16.vlgmr.msra.gmra.mxu2 %v1755_v42  ;;  %608 = vmatmul.bf16.vlgmr.msra.gmra.mxu3 %v1757_v43 }
  0x6f   : > { %583 = vmatmul.bf16.gmra.mxu0 %v1752_v44  ;;  %593 = vmatmul.bf16.gmra.mxu1 %v1754_v45 }
  0x70   : > { %603 = vmatmul.bf16.gmra.mxu2 %v1756_v46  ;;  %613 = vmatmul.bf16.gmra.mxu3 %v1758_v47 }
  0xdc   : > { %v579_v48 = vpop.f32.mrf.mxu0  ;;  %v589_v49 = vpop.f32.mrf.mxu1 }
  0xdd   : > { %619 = vst [vmem:[#allocation2 + $0x30] sm:$0xff] %v579_v48 }
  0xde   : > { %623 = vst [vmem:[#allocation2 + $0x50] sm:$0xff] %v589_v49 }
  0xe3   : > { %v599_v50 = vpop.f32.mrf.mxu2  ;;  %v609_v51 = vpop.f32.mrf.mxu3 }
  0xe4   : > { %627 = vst [vmem:[#allocation2 + $0x40] sm:$0xff] %v599_v50  ;;  %v581_v52 = vpop.f32.mrf.mxu0  ;;  %v591_v53 = vpop.f32.mrf.mxu1 }
  0xe5   : > { %631 = vst [vmem:[#allocation2 + $0x60] sm:$0xff] %v609_v51 }
  0xe6   : > { %620 = vst [vmem:[#allocation2] sm:$0xff] %v581_v52 }
  0xe7   : > { %624 = vst [vmem:[#allocation2 + $0x68] sm:$0xff] %v591_v53 }
  0xeb   : > { %v601_v54 = vpop.f32.mrf.mxu2  ;;  %v611_v55 = vpop.f32.mrf.mxu3 }
  0xec   : > { %628 = vst [vmem:[#allocation2 + $0x20] sm:$0xff] %v601_v54  ;;  %v584_v56 = vpop.f32.mrf.mxu0  ;;  %v594_v57 = vpop.f32.mrf.mxu1 }
  0xed   : > { %632 = vst [vmem:[#allocation2 + $0x70] sm:$0xff] %v611_v55 }
  0xee   : > { %621 = vst [vmem:[#allocation2 + $0x58] sm:$0xff] %v584_v56 }
  0xef   : > { %625 = vst [vmem:[#allocation2 + $0x8] sm:$0xff] %v594_v57 }
  0xf3   : > { %v604_v58 = vpop.f32.mrf.mxu2  ;;  %v614_v59 = vpop.f32.mrf.mxu3 }
  0xf4   : > { %629 = vst [vmem:[#allocation2 + $0x10] sm:$0xff] %v604_v58  ;;  %v586_v60 = vpop.f32.mrf.mxu0  ;;  %v596_v61 = vpop.f32.mrf.mxu1 }
  0xf5   : > { %633 = vst [vmem:[#allocation2 + $0x78] sm:$0xff] %v614_v59 }
  0xf6   : > { %622 = vst [vmem:[#allocation2 + $0x18] sm:$0xff] %v586_v60 }
  0xf7   : > { %626 = vst [vmem:[#allocation2 + $0x48] sm:$0xff] %v596_v61 }
  0xfb   : > { %v606_v62 = vpop.f32.mrf.mxu2  ;;  %v616_v63 = vpop.f32.mrf.mxu3 }
  0xfc   : > { %630 = vst [vmem:[#allocation2 + $0x38] sm:$0xff] %v606_v62 }
  0xfd   : > { %634 = vst [vmem:[#allocation2 + $0x28] sm:$0xff] %v616_v63 }
  0xfe PF: > { %v1798_v0 = vld [vmem:[%s2141_s15 + $0x38] sm:$0xff]  ;;  %v1797_v3 = vld [vmem:[%s2141_s15 + $0x30] sm:$0xff]  ;;  %v1796_v6 = vld [vmem:[%s2141_s15 + $0x28] sm:$0xff]  ;;  %p1745_p11 = scmp.ne.s32.totalorder %s1983_s20, 2 }
  0xff   : > { %v2196_v1 = vld [vmem:[%s2141_s15 + $0x78] sm:$0xff]  ;;  %1003 = vmatpush.bf16.msra.mxu0 %v1798_v0  ;;  %1886 = vmatpush.bf16.msra.mxu3 %v1798_v0  ;;  %v2205_v4 = vld [vmem:[%s2141_s15 + $0x70] sm:$0xff]  ;;  %v1804_v7 = vld [vmem:[%s2141_s15 + $0x68] sm:$0xff] }
 0x100   : > { %v2199_v2 = vld [vmem:[%s2141_s15 + $0xb8] sm:$0xff]  ;;  %1052 = vmatpush.bf16.msra.mxu1 %v2196_v1  ;;  %v2208_v5 = vld [vmem:[%s2141_s15 + $0xb0] sm:$0xff]  ;;  %v2215_v8 = vld [vmem:[%s2141_s15 + $0xa8] sm:$0xff] }
 0x101   : > { %1101 = vmatpush.bf16.msra.mxu2 %v2199_v2  ;;  %v1795_v9 = vld [vmem:[%s2141_s15 + $0x20] sm:$0xff]  ;;  %v1794_v12 = vld [vmem:[%s2141_s15 + $0x18] sm:$0xff]  ;;  %v1793_v15 = vld [vmem:[%s2141_s15 + $0x10] sm:$0xff] }
 0x102   : > { %v1803_v10 = vld [vmem:[%s2141_s15 + $0x60] sm:$0xff]  ;;  %v1802_v13 = vld [vmem:[%s2141_s15 + $0x58] sm:$0xff]  ;;  %v1801_v16 = vld [vmem:[%s2141_s15 + $0x50] sm:$0xff] }
 0x103   : > { %1004 = vmatpush.bf16.msra.mxu0 %v1797_v3  ;;  %1887 = vmatpush.bf16.msra.mxu3 %v1797_v3  ;;  %v2221_v11 = vld [vmem:[%s2141_s15 + $0xa0] sm:$0xff]  ;;  %v2227_v14 = vld [vmem:[%s2141_s15 + $0x98] sm:$0xff]  ;;  %v2233_v17 = vld [vmem:[%s2141_s15 + $0x90] sm:$0xff] }
 0x104   : > { %1053 = vmatpush.bf16.msra.mxu1 %v2205_v4  ;;  %v1792_v18 = vld [vmem:[%s2141_s15 + $0x8] sm:$0xff]  ;;  %v1791_v21 = vld [vmem:[%s2141_s15] sm:$0xff]  ;;  %v1627_v26 = vld [vmem:[%s2143_s16 + $0x90] sm:$0xf] }
 0x105   : > { %1102 = vmatpush.bf16.msra.mxu2 %v2208_v5  ;;  %v1800_v19 = vld [vmem:[%s2141_s15 + $0x48] sm:$0xff]  ;;  %v1799_v22 = vld [vmem:[%s2141_s15 + $0x40] sm:$0xff]  ;;  %v1786_v27 = vld [vmem:[%s2143_s16 + $0x98] sm:$0xf0] }
 0x106   : > { %v2239_v20 = vld [vmem:[%s2141_s15 + $0x88] sm:$0xff]  ;;  %v2244_v23 = vld [vmem:[%s2141_s15 + $0x80] sm:$0xff]  ;;  %v1557_v29 = vld [vmem:[%s2143_s16 + $0xc] sm:$0xf0]  ;;  %v1628_v33 = vor.u32 %v1786_v27, %v1627_v26 }
 0x107   : > { %1005 = vmatpush.bf16.msra.mxu0 %v1796_v6  ;;  %1888 = vmatpush.bf16.msra.mxu3 %v1796_v6  ;;  %v1555_v24 = vld [vmem:[%s2143_s16] sm:$0xf]  ;;  %v1768_v25 = vld [vmem:[%s2143_s16 + $0x8] sm:$0xf0]  ;;  %v1767_v28 = vld [vmem:[%s2143_s16 + $0x4] sm:$0xf] }
 0x108   : > { %1054 = vmatpush.bf16.msra.mxu1 %v1804_v7  ;;  %v1563_v30 = vld [vmem:[%s2143_s16 + $0x8] sm:$0xf]  ;;  %v1769_v31 = vld [vmem:[%s2143_s16 + $0x10] sm:$0xf0]  ;;  %v1556_v32 = vor.u32 %v1768_v25, %v1555_v24  ;;  %v1560_v34 = vor.u32 %v1767_v28, %v1557_v29  ;;  %v1567_v36 = vld [vmem:[%s2143_s16 + $0x18] sm:$0xf] }
 0x109   : > { %1103 = vmatpush.bf16.msra.mxu2 %v2215_v8  ;;  %v1564_v35 = vor.u32 %v1769_v31, %v1563_v30  ;;  %v1771_v37 = vld [vmem:[%s2143_s16 + $0x20] sm:$0xf0]  ;;  %v1639_v38 = vld [vmem:[%s2143_s16 + $0xa8] sm:$0xf]  ;;  %v1789_v39 = vld [vmem:[%s2143_s16 + $0xb0] sm:$0xf0] }
 0x10a   : > { %v1770_v40 = vld [vmem:[%s2143_s16 + $0x1c] sm:$0xf]  ;;  %v1569_v41 = vld [vmem:[%s2143_s16 + $0x24] sm:$0xf0]  ;;  %v1575_v42 = vld [vmem:[%s2143_s16 + $0x20] sm:$0xf]  ;;  %v1568_v44 = vor.u32 %v1771_v37, %v1567_v36  ;;  %v1640_v45 = vor.u32 %v1789_v39, %v1639_v38 }
 0x10b   : > { %1006 = vmatpush.bf16.msra.mxu0 %v1795_v9  ;;  %1889 = vmatpush.bf16.msra.mxu3 %v1795_v9  ;;  %v1772_v43 = vld [vmem:[%s2143_s16 + $0x28] sm:$0xf0]  ;;  %v1572_v46 = vor.u32 %v1770_v40, %v1569_v41  ;;  %v1579_v48 = vld [vmem:[%s2143_s16 + $0x30] sm:$0xf]  ;;  %v1774_v49 = vld [vmem:[%s2143_s16 + $0x38] sm:$0xf0] }
 0x10c   : > { %1055 = vmatpush.bf16.msra.mxu1 %v1803_v10  ;;  %v1576_v47 = vor.u32 %v1772_v43, %v1575_v42  ;;  %v1773_v50 = vld [vmem:[%s2143_s16 + $0x34] sm:$0xf]  ;;  %v1629_v52 = vld [vmem:[%s2143_s16 + $0x9c] sm:$0xf0]  ;;  %v1587_v54 = vld [vmem:[%s2143_s16 + $0x38] sm:$0xf]  ;;  %v1580_v56 = vor.u32 %v1774_v49, %v1579_v48 }
 0x10d   : > { %1104 = vmatpush.bf16.msra.mxu2 %v2221_v11  ;;  %v1785_v51 = vld [vmem:[%s2143_s16 + $0x94] sm:$0xf]  ;;  %v1581_v53 = vld [vmem:[%s2143_s16 + $0x3c] sm:$0xf0]  ;;  %v1775_v55 = vld [vmem:[%s2143_s16 + $0x40] sm:$0xf0] }
 0x10e   : > { %v1632_v57 = vor.u32 %v1785_v51, %v1629_v52  ;;  %v1584_v58 = vor.u32 %v1773_v50, %v1581_v53  ;;  %v1588_v59 = vor.u32 %v1775_v55, %v1587_v54  ;;  %v1591_v60 = vld [vmem:[%s2143_s16 + $0x48] sm:$0xf]  ;;  %v1777_v61 = vld [vmem:[%s2143_s16 + $0x50] sm:$0xf0]  ;;  %v1776_v62 = vld [vmem:[%s2143_s16 + $0x4c] sm:$0xf] }
 0x10f   : > { %1007 = vmatpush.bf16.msra.mxu0 %v1794_v12  ;;  %1890 = vmatpush.bf16.msra.mxu3 %v1794_v12  ;;  %v1788_v63 = vld [vmem:[%s2143_s16 + $0xac] sm:$0xf]  ;;  %v1641_v0 = vld [vmem:[%s2143_s16 + $0xb4] sm:$0xf0]  ;;  %v1778_v3 = vld [vmem:[%s2143_s16 + $0x58] sm:$0xf0] }
 0x110   : > { %1056 = vmatpush.bf16.msra.mxu1 %v1802_v13  ;;  %v1644_v6 = vor.u32 %v1788_v63, %v1641_v0  ;;  %v1780_v9 = vld [vmem:[%s2143_s16 + $0x68] sm:$0xf0]  ;;  %v1787_v12 = vld [vmem:[%s2143_s16 + $0xa0] sm:$0xf0]  ;;  %v1647_v24 = vld [vmem:[%s2143_s16 + $0xb0] sm:$0xf] }
 0x111   : > { %1105 = vmatpush.bf16.msra.mxu2 %v2227_v14  ;;  %v1617_v25 = vld [vmem:[%s2143_s16 + $0x84] sm:$0xf0]  ;;  %v1623_v26 = vld [vmem:[%s2143_s16 + $0x80] sm:$0xf]  ;;  %v1784_v27 = vld [vmem:[%s2143_s16 + $0x88] sm:$0xf0] }
 0x112   : > { %v1624_v31 = vor.u32 %v1784_v27, %v1623_v26  ;;  %v635_v36 = vld [vmem:[#allocation2 + $0x30] sm:$0xff]  ;;  %v637_v52 = vld [vmem:[#allocation2 + $0x58] sm:$0xff] }
 0x113   : > { %1008 = vmatpush.bf16.msra.mxu0 %v1793_v15  ;;  %1891 = vmatpush.bf16.msra.mxu3 %v1793_v15  ;;  %v1781_v15 = vld [vmem:[%s2143_s16 + $0x70] sm:$0xf0] }
 0x114   : > { %1057 = vmatpush.bf16.msra.mxu1 %v1801_v16 }
 0x115   : > { %1106 = vmatpush.bf16.msra.mxu2 %v2233_v17 }
 0x117   : > { %1009 = vmatpush.bf16.msra.mxu0 %v1792_v18  ;;  %1892 = vmatpush.bf16.msra.mxu3 %v1792_v18 }
 0x118   : > { %1058 = vmatpush.bf16.msra.mxu1 %v1800_v19 }
 0x119   : > { %1107 = vmatpush.bf16.msra.mxu2 %v2239_v20 }
 0x11b   : > { %1010 = vmatpush.bf16.msra.mxu0 %v1791_v21  ;;  %1893 = vmatpush.bf16.msra.mxu3 %v1791_v21  ;;  %v1783_v21 = vld [vmem:[%s2143_s16 + $0x80] sm:$0xf0] }
 0x11c   : > { %1059 = vmatpush.bf16.msra.mxu1 %v1799_v22 }
 0x11d   : > { %1108 = vmatpush.bf16.msra.mxu2 %v2244_v23 }
 0x11e   : > { %1011 = vmatmul.bf16.vlgmr.msra.gmra.mxu0 %v1556_v32  ;;  %1041 = vmatmul.bf16.vlgmr.msra.gmra.mxu3 %v1628_v33 }
 0x11f   : > { %1894 = vmatpush.bf16.msrb.mxu3 %v2196_v1  ;;  %1060 = vmatmul.bf16.vlgmr.msra.gmra.mxu1 %v1560_v34  ;;  %v1593_v1 = vld [vmem:[%s2143_s16 + $0x54] sm:$0xf0] }
 0x120   : > { %1109 = vmatmul.bf16.vlgmr.msra.gmra.mxu2 %v1564_v35 }
 0x123   : > { %1895 = vmatpush.bf16.msrb.mxu3 %v2205_v4  ;;  %v1592_v4 = vor.u32 %v1777_v61, %v1591_v60  ;;  %v638_v60 = vld [vmem:[#allocation2 + $0x18] sm:$0xff] }
 0x127   : > { %1896 = vmatpush.bf16.msrb.mxu3 %v1804_v7 }
 0x12b   : > { %1897 = vmatpush.bf16.msrb.mxu3 %v1803_v10  ;;  %v1779_v10 = vld [vmem:[%s2143_s16 + $0x64] sm:$0xf] }
 0x12e   : > { %1016 = vmatmul.bf16.gmra.mxu0 %v1568_v44  ;;  %1046 = vmatmul.bf16.gmra.mxu3 %v1640_v45  ;;  %v636_v44 = vld [vmem:[#allocation2] sm:$0xff] }
 0x12f   : > { %1898 = vmatpush.bf16.msrb.mxu3 %v1802_v13  ;;  %1065 = vmatmul.bf16.gmra.mxu1 %v1572_v46  ;;  %v1605_v13 = vld [vmem:[%s2143_s16 + $0x6c] sm:$0xf0] }
 0x130   : > { %1114 = vmatmul.bf16.gmra.mxu2 %v1576_v47  ;;  %v1608_v18 = vor.u32 %v1779_v10, %v1605_v13 }
 0x133   : > { %1899 = vmatpush.bf16.msrb.mxu3 %v1801_v16 }
 0x137   : > { %1900 = vmatpush.bf16.msrb.mxu3 %v1800_v19 }
 0x13b   : > { %1901 = vmatpush.bf16.msrb.mxu3 %v1799_v22  ;;  %v1782_v22 = vld [vmem:[%s2143_s16 + $0x7c] sm:$0xf] }
 0x13c   : > { %v1620_v30 = vor.u32 %v1782_v22, %v1617_v25 }
 0x13e   : > { %1021 = vmatmul.bf16.gmra.mxu0 %v1580_v56  ;;  %1090 = vmatmul.bf16.vlgmr.msrb.gmra.mxu3 %v1632_v57 }
 0x13f   : > { %1902 = vmatpush.bf16.msra.mxu3 %v2199_v2  ;;  %1070 = vmatmul.bf16.gmra.mxu1 %v1584_v58  ;;  %v1599_v2 = vld [vmem:[%s2143_s16 + $0x50] sm:$0xf] }
 0x140   : > { %1119 = vmatmul.bf16.gmra.mxu2 %v1588_v59  ;;  %v1600_v7 = vor.u32 %v1778_v3, %v1599_v2 }
 0x143   : > { %1903 = vmatpush.bf16.msra.mxu3 %v2208_v5  ;;  %v1596_v5 = vor.u32 %v1776_v62, %v1593_v1 }
 0x147   : > { %1904 = vmatpush.bf16.msra.mxu3 %v2215_v8  ;;  %v1603_v8 = vld [vmem:[%s2143_s16 + $0x60] sm:$0xf] }
 0x148   : > { %v1604_v16 = vor.u32 %v1780_v9, %v1603_v8 }
 0x14b   : > { %1905 = vmatpush.bf16.msra.mxu3 %v2221_v11  ;;  %v1635_v11 = vld [vmem:[%s2143_s16 + $0x98] sm:$0xf] }
 0x14e   : > { %1026 = vmatmul.bf16.gmra.mxu0 %v1592_v4  ;;  %1095 = vmatmul.bf16.gmra.mxu3 %v1644_v6  ;;  %v639_v4 = vld [vmem:[#allocation2 + $0x50] sm:$0xff] }
 0x14f   : > { %1906 = vmatpush.bf16.msra.mxu3 %v2227_v14  ;;  %1075 = vmatmul.bf16.gmra.mxu1 %v1596_v5  ;;  %v1611_v14 = vld [vmem:[%s2143_s16 + $0x68] sm:$0xf] }
 0x150   : > { %1124 = vmatmul.bf16.gmra.mxu2 %v1600_v7  ;;  %v1612_v19 = vor.u32 %v1781_v15, %v1611_v14 }
 0x153   : > { %1907 = vmatpush.bf16.msra.mxu3 %v2233_v17  ;;  %v1636_v17 = vor.u32 %v1787_v12, %v1635_v11  ;;  %v640_v12 = vld [vmem:[#allocation2 + $0x68] sm:$0xff] }
 0x157   : > { %1908 = vmatpush.bf16.msra.mxu3 %v2239_v20  ;;  %v1615_v20 = vld [vmem:[%s2143_s16 + $0x78] sm:$0xf] }
 0x158   : > { %v1616_v28 = vor.u32 %v1783_v21, %v1615_v20  ;;  %v641_v20 = vld [vmem:[#allocation2 + $0x8] sm:$0xff] }
 0x15b   : > { %1909 = vmatpush.bf16.msra.mxu3 %v2244_v23  ;;  %v1790_v23 = vld [vmem:[%s2143_s16 + $0xb8] sm:$0xf0] }
 0x15c   : > { %v1648_v29 = vor.u32 %v1790_v23, %v1647_v24 }
 0x15e   : > { %1031 = vmatmul.bf16.gmra.mxu0 %v1604_v16  ;;  %1139 = vmatmul.bf16.vlgmr.msra.gmra.mxu3 %v1636_v17 }
 0x15f   : > { %1080 = vmatmul.bf16.gmra.mxu1 %v1608_v18 }
 0x160   : > { %1129 = vmatmul.bf16.gmra.mxu2 %v1612_v19 }
 0x16e   : > { %1036 = vmatmul.bf16.gmra.mxu0 %v1616_v28  ;;  %1144 = vmatmul.bf16.gmra.mxu3 %v1648_v29  ;;  %v642_v28 = vld [vmem:[#allocation2 + $0x48] sm:$0xff] }
 0x16f   : > { %1085 = vmatmul.bf16.gmra.mxu1 %v1620_v30 }
 0x170   : > { %1134 = vmatmul.bf16.gmra.mxu2 %v1624_v31 }
 0x19b   : > { %v1012_v32 = vpop.f32.mrf.mxu0 }
 0x19c   : > { %v1061_v33 = vpop.f32.mrf.mxu1 }
 0x19d   : > { %v1062_v34 = vadd.f32 %v1061_v33, %v1012_v32 }
 0x1a1   : > { %v2306_v35 = vpop.f32.mrf.mxu3 }
 0x1a3   : > { %v1110_v37 = vpop.f32.mrf.mxu2  ;;  %v1014_v39 = vpop.f32.mrf.mxu0 }
 0x1a4   : > { %v1111_v38 = vadd.f32 %v1110_v37, %v1062_v34  ;;  %v1063_v40 = vpop.f32.mrf.mxu1  ;;  %v647_v37 = vld [vmem:[#allocation2 + $0x60] sm:$0xff] }
 0x1a5   : > { %v1064_v42 = vadd.f32 %v1063_v40, %v1014_v39  ;;  %v643_v39 = vld [vmem:[#allocation2 + $0x40] sm:$0xff] }
 0x1a6   : > { %v1150_v41 = vadd.f32 %v1111_v38, %v635_v36 }
 0x1a8   : > { %1166 = vst [vmem:[#allocation2 + $0x30] sm:$0xff] %v1150_v41 }
 0x1a9   : > { %v2308_v43 = vpop.f32.mrf.mxu3 }
 0x1ab   : > { %v1112_v45 = vpop.f32.mrf.mxu2  ;;  %v1017_v47 = vpop.f32.mrf.mxu0 }
 0x1ac   : > { %v1113_v46 = vadd.f32 %v1112_v45, %v1064_v42  ;;  %v1066_v48 = vpop.f32.mrf.mxu1 }
 0x1ad   : > { %v1067_v50 = vadd.f32 %v1066_v48, %v1017_v47 }
 0x1ae   : > { %v1151_v49 = vadd.f32 %v1113_v46, %v636_v44 }
 0x1b0   : > { %1167 = vst [vmem:[#allocation2] sm:$0xff] %v1151_v49 }
 0x1b1   : > { %v2310_v51 = vpop.f32.mrf.mxu3 }
 0x1b3   : > { %v1115_v53 = vpop.f32.mrf.mxu2  ;;  %v1019_v55 = vpop.f32.mrf.mxu0 }
 0x1b4   : > { %v1116_v54 = vadd.f32 %v1115_v53, %v1067_v50  ;;  %v1068_v56 = vpop.f32.mrf.mxu1  ;;  %v648_v50 = vld [vmem:[#allocation2 + $0x70] sm:$0xff]  ;;  %v644_v53 = vld [vmem:[#allocation2 + $0x20] sm:$0xff] }
 0x1b5   : > { %v1069_v58 = vadd.f32 %v1068_v56, %v1019_v55 }
 0x1b6   : > { %v1152_v57 = vadd.f32 %v1116_v54, %v637_v52 }
 0x1b8   : > { %1168 = vst [vmem:[#allocation2 + $0x58] sm:$0xff] %v1152_v57 }
 0x1b9   : > { %v2312_v59 = vpop.f32.mrf.mxu3 }
 0x1bb   : > { %v1117_v61 = vpop.f32.mrf.mxu2  ;;  %v1022_v63 = vpop.f32.mrf.mxu0 }
 0x1bc   : > { %v1118_v62 = vadd.f32 %v1117_v61, %v1069_v58  ;;  %v1071_v0 = vpop.f32.mrf.mxu1 }
 0x1bd   : > { %v1072_v2 = vadd.f32 %v1071_v0, %v1022_v63  ;;  %v649_v63 = vld [vmem:[#allocation2 + $0x78] sm:$0xff] }
 0x1be   : > { %v1153_v1 = vadd.f32 %v1118_v62, %v638_v60 }
 0x1c0   : > { %1169 = vst [vmem:[#allocation2 + $0x18] sm:$0xff] %v1153_v1  ;;  %v645_v1 = vld [vmem:[#allocation2 + $0x10] sm:$0xff] }
 0x1c1   : > { %v1091_v3 = vpop.f32.mrf.mxu3 }
 0x1c2   : > { %v1092_v36 = vadd.f32 %v1091_v3, %v2306_v35 }
 0x1c3   : > { %v1120_v6 = vpop.f32.mrf.mxu2  ;;  %v1024_v7 = vpop.f32.mrf.mxu0 }
 0x1c4   : > { %v1121_v5 = vadd.f32 %v1120_v6, %v1072_v2  ;;  %v1073_v8 = vpop.f32.mrf.mxu1 }
 0x1c5   : > { %v1074_v10 = vadd.f32 %v1073_v8, %v1024_v7 }
 0x1c6   : > { %v1154_v9 = vadd.f32 %v1121_v5, %v639_v4 }
 0x1c8   : > { %1170 = vst [vmem:[#allocation2 + $0x50] sm:$0xff] %v1154_v9 }
 0x1c9   : > { %v1093_v11 = vpop.f32.mrf.mxu3 }
 0x1ca   : > { %v1094_v48 = vadd.f32 %v1093_v11, %v2308_v43 }
 0x1cb   : > { %v1122_v13 = vpop.f32.mrf.mxu2  ;;  %v1027_v15 = vpop.f32.mrf.mxu0 }
 0x1cc   : > { %v1123_v14 = vadd.f32 %v1122_v13, %v1074_v10  ;;  %v1076_v16 = vpop.f32.mrf.mxu1  ;;  %v650_v10 = vld [vmem:[#allocation2 + $0x28] sm:$0xff] }
 0x1cd   : > { %v1077_v18 = vadd.f32 %v1076_v16, %v1027_v15 }
 0x1ce   : > { %v1155_v17 = vadd.f32 %v1123_v14, %v640_v12  ;;  %v646_v12 = vld [vmem:[#allocation2 + $0x38] sm:$0xff] }
 0x1d0   : > { %1171 = vst [vmem:[#allocation2 + $0x68] sm:$0xff] %v1155_v17 }
 0x1d1   : > { %v1096_v19 = vpop.f32.mrf.mxu3 }
 0x1d2   : > { %v1097_v62 = vadd.f32 %v1096_v19, %v2310_v51 }
 0x1d3   : > { %v1125_v21 = vpop.f32.mrf.mxu2  ;;  %v1029_v24 = vpop.f32.mrf.mxu0 }
 0x1d4   : > { %v1126_v22 = vadd.f32 %v1125_v21, %v1077_v18  ;;  %v1078_v23 = vpop.f32.mrf.mxu1 }
 0x1d5   : > { %v1079_v26 = vadd.f32 %v1078_v23, %v1029_v24 }
 0x1d6   : > { %v1156_v25 = vadd.f32 %v1126_v22, %v641_v20 }
 0x1d8   : > { %1172 = vst [vmem:[#allocation2 + $0x8] sm:$0xff] %v1156_v25 }
 0x1d9   : > { %v1098_v27 = vpop.f32.mrf.mxu3 }
 0x1da   : > { %v1099_v8 = vadd.f32 %v1098_v27, %v2312_v59 }
 0x1db   : > { %v1127_v29 = vpop.f32.mrf.mxu2  ;;  %v1032_v31 = vpop.f32.mrf.mxu0 }
 0x1dc   : > { %v1128_v30 = vadd.f32 %v1127_v29, %v1079_v26  ;;  %v1081_v32 = vpop.f32.mrf.mxu1 }
 0x1dd   : > { %v1082_v34 = vadd.f32 %v1081_v32, %v1032_v31 }
 0x1de   : > { %v1157_v33 = vadd.f32 %v1128_v30, %v642_v28 }
 0x1e0   : > { %1173 = vst [vmem:[#allocation2 + $0x48] sm:$0xff] %v1157_v33 }
 0x1e1   : > { %v1140_v38 = vpop.f32.mrf.mxu3 }
 0x1e2   : > { %v1141_v41 = vadd.f32 %v1140_v38, %v1092_v36 }
 0x1e3   : > { %v1130_v40 = vpop.f32.mrf.mxu2  ;;  %v1034_v44 = vpop.f32.mrf.mxu0 }
 0x1e4   : > { %v1131_v42 = vadd.f32 %v1130_v40, %v1082_v34  ;;  %v1162_v45 = vadd.f32 %v1141_v41, %v647_v37  ;;  %v1083_v46 = vpop.f32.mrf.mxu1 }
 0x1e5   : > { %v1084_v49 = vadd.f32 %v1083_v46, %v1034_v44 }
 0x1e6   : > { %v1158_v47 = vadd.f32 %v1131_v42, %v643_v39  ;;  %1178 = vst [vmem:[#allocation2 + $0x60] sm:$0xff] %v1162_v45 }
 0x1e8   : > { %1174 = vst [vmem:[#allocation2 + $0x40] sm:$0xff] %v1158_v47 }
 0x1e9   : > { %v1142_v52 = vpop.f32.mrf.mxu3 }
 0x1ea   : > { %v1143_v35 = vadd.f32 %v1142_v52, %v1094_v48 }
 0x1eb   : > { %v1132_v54 = vpop.f32.mrf.mxu2  ;;  %v1037_v57 = vpop.f32.mrf.mxu0 }
 0x1ec   : > { %v1133_v55 = vadd.f32 %v1132_v54, %v1084_v49  ;;  %v1163_v56 = vadd.f32 %v1143_v35, %v648_v50  ;;  %v1086_v58 = vpop.f32.mrf.mxu1 }
 0x1ed   : > { %v1087_v61 = vadd.f32 %v1086_v58, %v1037_v57 }
 0x1ee   : > { %v1159_v60 = vadd.f32 %v1133_v55, %v644_v53  ;;  %1179 = vst [vmem:[#allocation2 + $0x70] sm:$0xff] %v1163_v56 }
 0x1f0   : > { %1175 = vst [vmem:[#allocation2 + $0x20] sm:$0xff] %v1159_v60 }
 0x1f1   : > { %v1145_v0 = vpop.f32.mrf.mxu3 }
 0x1f2   : > { %v1146_v2 = vadd.f32 %v1145_v0, %v1097_v62 }
 0x1f3   : > { %v1135_v43 = vpop.f32.mrf.mxu2  ;;  %v1039_v5 = vpop.f32.mrf.mxu0 }
 0x1f4   : > { %v1136_v3 = vadd.f32 %v1135_v43, %v1087_v61  ;;  %v1164_v4 = vadd.f32 %v1146_v2, %v649_v63  ;;  %v1088_v7 = vpop.f32.mrf.mxu1 }
 0x1f5   : > { %v1089_v9 = vadd.f32 %v1088_v7, %v1039_v5 }
 0x1f6   : > { %v1160_v6 = vadd.f32 %v1136_v3, %v645_v1  ;;  %1180 = vst [vmem:[#allocation2 + $0x78] sm:$0xff] %v1164_v4 }
 0x1f8   : > { %1176 = vst [vmem:[#allocation2 + $0x10] sm:$0xff] %v1160_v6 }
 0x1f9   : > { %v1147_v11 = vpop.f32.mrf.mxu3 }
 0x1fa   : > { %v1148_v51 = vadd.f32 %v1147_v11, %v1099_v8 }
 0x1fb   : > { %v1137_v13 = vpop.f32.mrf.mxu2 }
 0x1fc   : > { %v1138_v14 = vadd.f32 %v1137_v13, %v1089_v9  ;;  %v1165_v15 = vadd.f32 %v1148_v51, %v650_v10  ;;  %1185 = sbr.rel (%p1745_p11) target bundleno = 538 (0x21a), region = 74 }
 0x1fe   : > { %v1161_v16 = vadd.f32 %v1138_v14, %v646_v12  ;;  %1181 = vst [vmem:[#allocation2 + $0x28] sm:$0xff] %v1165_v15 }
 0x200   : > { %1177 = vst [vmem:[#allocation2 + $0x38] sm:$0xff] %v1161_v16 }
 0x201   : > { %v1186_v17 = vld [vmem:[#allocation2 + $0x30] sm:$0xff]  ;;  %v1187_v18 = vld [vmem:[#allocation2] sm:$0xff]  ;;  %v1188_v19 = vld [vmem:[#allocation2 + $0x58] sm:$0xff] }
 0x202   : > { %v2322_v59 = vld [vmem:[%s2384_s4] ss:$0 sm:$0xff]  ;;  %v1189_v20 = vld [vmem:[#allocation2 + $0x18] sm:$0xff]  ;;  %v1190_v21 = vld [vmem:[#allocation2 + $0x50] sm:$0xff] }
 0x203   : > { %v1191_v22 = vld [vmem:[#allocation2 + $0x68] sm:$0xff]  ;;  %v1206_v23 = vadd.f32 %v2322_v59, %v1186_v17  ;;  %v1207_v25 = vadd.f32 %v2322_v59, %v1187_v18  ;;  %v1208_v26 = vadd.f32 %v2322_v59, %v1188_v19  ;;  %v1209_v27 = vadd.f32 %v2322_v59, %v1189_v20  ;;  %v1194_v40 = vld [vmem:[#allocation2 + $0x40] sm:$0xff]  ;;  %v1196_v47 = vld [vmem:[#allocation2 + $0x10] sm:$0xff] }
 0x204   : > { %v1192_v24 = vld [vmem:[#allocation2 + $0x8] sm:$0xff]  ;;  %v1210_v29 = vadd.f32 %v2322_v59, %v1190_v21  ;;  %v1211_v30 = vadd.f32 %v2322_v59, %v1191_v22  ;;  %v1195_v46 = vld [vmem:[#allocation2 + $0x20] sm:$0xff]  ;;  %v1214_v35 = vadd.f32 %v2322_v59, %v1194_v40  ;;  %v1216_v57 = vadd.f32 %v2322_v59, %v1196_v47  ;;  %v1199_v0 = vld [vmem:[#allocation2 + $0x70] sm:$0xff] }
 0x205   : > { %v1193_v28 = vld [vmem:[#allocation2 + $0x48] sm:$0xff]  ;;  %v1212_v31 = vadd.f32 %v2322_v59, %v1192_v24  ;;  %vm1222_vm0 = vcmp.ge.f32.partialorder %v1206_v23, 0.0  ;;  %vm1223_vm1 = vcmp.ge.f32.partialorder %v1207_v25, 0.0  ;;  %v1238_v33 = vmul.f32 0.1, %v1206_v23  ;;  %v1198_v60 = vld [vmem:[#allocation2 + $0x60] sm:$0xff] }
 0x206   : > { %v1213_v32 = vadd.f32 %v2322_v59, %v1193_v28  ;;  %v1239_v34 = vmul.f32 0.1, %v1207_v25  ;;  %vm1224_vm2 = vcmp.ge.f32.partialorder %v1208_v26, 0.0  ;;  %vm1225_vm3 = vcmp.ge.f32.partialorder %v1209_v27, 0.0  ;;  %v1200_v6 = vld [vmem:[#allocation2 + $0x78] sm:$0xff]  ;;  %v1201_v10 = vld [vmem:[#allocation2 + $0x28] sm:$0xff] }
 0x207   : > { %v1240_v36 = vmul.f32 0.1, %v1208_v26  ;;  %v1241_v37 = vmul.f32 0.1, %v1209_v27  ;;  %v1254_v38 = vsel %vm1222_vm0, %v1206_v23, %v1238_v33  ;;  %vm1226_vm4 = vcmp.ge.f32.partialorder %v1210_v29, 0.0  ;;  %v1197_v48 = vld [vmem:[#allocation2 + $0x38] sm:$0xff] }
 0x208   : > { %v1255_v39 = vsel %vm1223_vm1, %v1207_v25, %v1239_v34  ;;  %vm1227_vm5 = vcmp.ge.f32.partialorder %v1211_v30, 0.0  ;;  %v1242_v45 = vmul.f32 0.1, %v1210_v29  ;;  %v1243_v50 = vmul.f32 0.1, %v1211_v30 }
 0x209   : > { %v1818_v41 = vpack.c.bf16 %v1255_v39, %v1254_v38  ;;  %v1256_v42 = vsel %vm1224_vm2, %v1208_v26, %v1240_v36  ;;  %v1257_v44 = vsel %vm1225_vm3, %v1209_v27, %v1241_v37  ;;  %vm1228_vm6 = vcmp.ge.f32.partialorder %v1212_v31, 0.0 }
 0x20a   : > { %v1823_v49 = vpack.c.bf16 %v1257_v44, %v1256_v42  ;;  %vm1229_vm7 = vcmp.ge.f32.partialorder %v1213_v32, 0.0  ;;  %v1258_v52 = vsel %vm1226_vm4, %v1210_v29, %v1242_v45  ;;  %v1244_v53 = vmul.f32 0.1, %v1212_v31 }
 0x20b   : > { %1819 = vst [vmem:[%s2385_s5] sm:$0xff] %v1818_v41   ;;  %v1245_v54 = vmul.f32 0.1, %v1213_v32  ;;  %v1259_v55 = vsel %vm1227_vm5, %v1211_v30, %v1243_v50  ;;  %v1215_v56 = vadd.f32 %v2322_v59, %v1195_v46  ;;  %v1217_v58 = vadd.f32 %v2322_v59, %v1197_v48 }
 0x20c   : > { %1855 = vst [vmem:[%s2385_s5 + $0x8] sm:$0xff] %v1823_v49   ;;  %v1828_v61 = vpack.c.bf16 %v1259_v55, %v1258_v52  ;;  %v1260_v62 = vsel %vm1228_vm6, %v1212_v31, %v1244_v53  ;;  %vm1230_vm8 = vcmp.ge.f32.partialorder %v1214_v35, 0.0  ;;  %v1246_v43 = vmul.f32 0.1, %v1214_v35 }
 0x20d   : > { %v1261_v63 = vsel %vm1229_vm7, %v1213_v32, %v1245_v54  ;;  %vm1231_vm9 = vcmp.ge.f32.partialorder %v1215_v56, 0.0  ;;  %v1247_v2 = vmul.f32 0.1, %v1215_v56  ;;  %vm1232_vm10 = vcmp.ge.f32.partialorder %v1216_v57, 0.0 }
 0x20e   : > { %v1833_v1 = vpack.c.bf16 %v1261_v63, %v1260_v62  ;;  %1856 = vst [vmem:[%s2385_s5 + $0x10] sm:$0xff] %v1828_v61   ;;  %vm1233_vm11 = vcmp.ge.f32.partialorder %v1217_v58, 0.0  ;;  %v1248_v3 = vmul.f32 0.1, %v1216_v57  ;;  %v1218_v4 = vadd.f32 %v2322_v59, %v1198_v60 }
 0x20f   : > { %v1262_v5 = vsel %vm1230_vm8, %v1214_v35, %v1246_v43  ;;  %v1263_v7 = vsel %vm1231_vm9, %v1215_v56, %v1247_v2  ;;  %v1249_v8 = vmul.f32 0.1, %v1217_v58  ;;  %v1219_v9 = vadd.f32 %v2322_v59, %v1199_v0 }
 0x210   : > { %1857 = vst [vmem:[%s2385_s5 + $0x18] sm:$0xff] %v1833_v1   ;;  %v1838_v11 = vpack.c.bf16 %v1263_v7, %v1262_v5  ;;  %v1264_v12 = vsel %vm1232_vm10, %v1216_v57, %v1248_v3  ;;  %vm1234_vm12 = vcmp.ge.f32.partialorder %v1218_v4, 0.0  ;;  %v1250_v13 = vmul.f32 0.1, %v1218_v4 }
 0x211   : > { %v1265_v51 = vsel %vm1233_vm11, %v1217_v58, %v1249_v8  ;;  %vm1235_vm13 = vcmp.ge.f32.partialorder %v1219_v9, 0.0  ;;  %v1251_v14 = vmul.f32 0.1, %v1219_v9  ;;  %v1220_v15 = vadd.f32 %v2322_v59, %v1200_v6 }
 0x212   : > { %1858 = vst [vmem:[%s2385_s5 + $0x20] sm:$0xff] %v1838_v11   ;;  %v1843_v16 = vpack.c.bf16 %v1265_v51, %v1264_v12  ;;  %v1266_v17 = vsel %vm1234_vm12, %v1218_v4, %v1250_v13  ;;  %v1221_v18 = vadd.f32 %v2322_v59, %v1201_v10 }
 0x213   : > { %v1267_v19 = vsel %vm1235_vm13, %v1219_v9, %v1251_v14  ;;  %vm1236_vm14 = vcmp.ge.f32.partialorder %v1220_v15, 0.0  ;;  %v1252_v20 = vmul.f32 0.1, %v1220_v15 }
 0x214   : > { %1859 = vst [vmem:[%s2385_s5 + $0x28] sm:$0xff] %v1843_v16   ;;  %v1848_v21 = vpack.c.bf16 %v1267_v19, %v1266_v17  ;;  %vm1237_vm15 = vcmp.ge.f32.partialorder %v1221_v18, 0.0  ;;  %v1253_v22 = vmul.f32 0.1, %v1221_v18 }
 0x215   : > { %v1268_v24 = vsel %vm1236_vm14, %v1220_v15, %v1252_v20 }
 0x216   : > { %1860 = vst [vmem:[%s2385_s5 + $0x30] sm:$0xff] %v1848_v21   ;;  %v1269_v23 = vsel %vm1237_vm15, %v1221_v18, %v1253_v22 }
 0x217   : > { %v1853_v25 = vpack.c.bf16 %v1269_v23, %v1268_v24 }
 0x219   : > { %1861 = vst [vmem:[%s2385_s5 + $0x38] sm:$0xff] %v1853_v25  }
 0x21a PF: > { %s15_s22 = sadd.s32 1, %s1991_s22   ;;  %s2386_s18 = smov %s1979_s19 }
 0x21b   : > { %p12_p12 = scmp.ge.s32.totalorder %s15_s22, 5   ;;  %s2387_s19 = smov %s2058_s26 }
 0x21c   : > { %s2388_s20 = smov %s1987_s21  ;;  %s2389_s21 = smov %s2391_s23 }
 0x21d   :  { %14 = sbr.rel (!%p12_p12) target bundleno = 3 (0x3), region = 127 }

// kernel: discriminator_forward.9
= control target key start
LH: loop header
LB: loop body
LE: loop exit
PB: predicated region body
PF: predicated region fallthrough
CT: control target
= control target key end

     0   :  { %s1053_s12 = smov 0   ;;  %s1055_s13 = smov 0   ;;  %s1169_s0 = inlined_call_operand.vmem [shape: bf16[32,1152], index: 0, kind: input, shape index: {}]   ;;  %s1170_s1 = inlined_call_operand.vmem [shape: bf16[1152,128], index: 1, kind: input, shape index: {}]   ;;  %s1171_s2 = inlined_call_operand.vmem [shape: f32[1,128], index: 2, kind: input, shape index: {}]   ;;  %s1172_s3 = inlined_call_operand.vmem [shape: bf16[32,128], index: 3, kind: output, shape index: {}]  }
   0x1   :  { %s1057_s14 = smov 0   ;;  %s1059_s15 = smov 0  }
   0x2   :  { %s1061_s16 = smov 0  }
   0x3 LB: > { %s25_s17 = sadd.s32 1, %s1026_s15  ;;  %p48_p1 = scmp.ne.s32.totalorder %s1018_s13, %s1014_s12  ;;  %s1030_s16 = sphi %s1061_s16, %s13_s16   ;;  %s1026_s15 = sphi %s1059_s15, %s1176_s15   ;;  %s1022_s14 = sphi %s1057_s14, %s1175_s14   ;;  %s1018_s13 = sphi %s1055_s13, %s1174_s13   ;;  %s1014_s12 = sphi %s1053_s12, %s1173_s12  }
   0x4   : > { %p26_p0 = scmp.ge.s32.totalorder %s25_s17, 3  ;;  %p49_p2 = scmp.eq.s32.totalorder %s1030_s16, 0 }
   0x5   : > { %s41_s19 = sadd.s32 1, %s1018_s13  ;;  %p760_p5 = scmp.ge.s32.totalorder %s1030_s16, 3 }
   0x6   : > { %s1178_s17 = smov (%p26_p0, %s25_s17), 0  ;;  %p50_p3 = por %p49_p2, %p48_p1 }
   0x7   : > { %s37_s18 = ssub.s32 %s1026_s15, %s1178_s17  ;;  %162 = sbr.rel (%p760_p5) target bundleno = 25 (0x19), region = 20 }
   0x8   : > { %p39_p4 = scmp.eq.s32.totalorder %s37_s18, 0 }
   0xa   : > { %s1088_s20 = scalar_select %p39_p4, %s1018_s13, %s41_s19  }
   0xc   : > { %165 = sbr.rel (!%p50_p3) target bundleno = 25 (0x19), region = 24  ;;  %s167_s21 = sand.u32 (%p50_p3), 1, %s1018_s13  }
   0xd   : > { %s898_s22 = smul.u32 (%p50_p3), 12, %s1026_s15 }
   0xe   : > { %s948_s23 = smul.u32 (%p50_p3), 48, %s167_s21 }
   0xf   : > { %s175_s26 = scalar_lea.vmem (%p50_p3), %s1169_s0, %s898_s22 }
  0x10   : > { %v190_v0 = vld [vmem:[%s175_s26] sm:$0xff] (%p50_p3)  ;;  %v194_v2 = vld [vmem:[%s175_s26 + $0x48] sm:$0xff] (%p50_p3)  ;;  %s169_s27 = scalar_lea.vmem (%p50_p3), [#allocation3], %s948_s23  ;;  %v766_v6 = vld [vmem:[%s175_s26 + $0x50] sm:$0xf] (%p50_p3) }
  0x11   : > { %v192_v1 = vld [vmem:[%s175_s26 + $0x24] sm:$0xff]  ;;  %191 = vst [vmem:[%s169_s27] sm:$0xff] %v190_v0  ;;  %v196_v3 = vld [vmem:[%s175_s26 + $0x6c] sm:$0xff]  ;;  %v768_v7 = vld [vmem:[%s175_s26 + $0x74] sm:$0xf] }
  0x12   : > { %193 = vst [vmem:[%s169_s27 + $0xc] sm:$0xff] %v192_v1  ;;  %v762_v4 = vld [vmem:[%s175_s26 + $0x8] sm:$0xf]  ;;  %v764_v5 = vld [vmem:[%s175_s26 + $0x2c] sm:$0xf] }
  0x13   : > { %195 = vst [vmem:[%s169_s27 + $0x18] sm:$0xff] %v194_v2 }
  0x14   : > { %197 = vst [vmem:[%s169_s27 + $0x24] sm:$0xff] %v196_v3 }
  0x15   : > { %763 = vst [vmem:[%s169_s27 + $0x8] sm:$0xf] %v762_v4 }
  0x16   : > { %765 = vst [vmem:[%s169_s27 + $0x14] sm:$0xf] %v764_v5 }
  0x17   : > { %767 = vst [vmem:[%s169_s27 + $0x20] sm:$0xf] %v766_v6 }
  0x18   : > { %769 = vst [vmem:[%s169_s27 + $0x2c] sm:$0xf] %v768_v7 }
  0x19 PF: > { %p770_p6 = scmp.ge.s32.totalorder %s1030_s16, 1  ;;  %p230_p7 = scmp.lt.s32.totalorder %s1030_s16, 4 }
  0x1b   : > { %p231_p8 = pnand %p770_p6, %p230_p7 }
  0x1c   : > { %s237_s28 = sand.u32 (!%p231_p8), 1, %s1014_s12   ;;  %s276_s29 = smul.u32 (!%p231_p8), 48, %s1022_s14 }
  0x1d   : > { %234 = sbr.rel (%p231_p8) target bundleno = 254 (0xfe), region = 54  ;;  %p772_p10 = scmp.ne.s32.totalorder (!%p231_p8), %s1022_s14, 0 }
  0x1e   : > { %s949_s30 = smul.u32 (!%p231_p8), 48, %s237_s28  ;;  %p277_p9 = scmp.lt.s32.totalorder (!%p231_p8), %s276_s29, 143 }
  0x20   : > { %s1105_s8 = scalar_lea.vmem (!%p231_p8), [#allocation3], %s949_s30 }
  0x22   : > { %s1180_s29 = smov (!%p277_p9, %s276_s29), 143  ;;  %300 = sbr.rel (%p772_p10) target bundleno = 44 (0x2c), region = 62 }
  0x23   : > { %s771_s4 = sshll.u32 %s1180_s29, 2 }
  0x24   : > { %s1103_s7 = scalar_lea.vmem %s1170_s1, %s771_s4 }
  0x27   : > { %v1032_v8 = vmov 0.0  }
  0x28   : > { %301 = vst [vmem:[#allocation2 + $0x10] sm:$0xff] %v1032_v8 }
  0x29   : > { %302 = vst [vmem:[#allocation2] sm:$0xff] %v1032_v8 }
  0x2a   : > { %303 = vst [vmem:[#allocation2 + $0x18] sm:$0xff] %v1032_v8 }
  0x2b   : > { %304 = vst [vmem:[#allocation2 + $0x8] sm:$0xff] %v1032_v8 }
  0x2c PF: > { %v912_v9 = vld [vmem:[%s1103_s7 + $0x38] sm:$0xff]  ;;  %v911_v12 = vld [vmem:[%s1103_s7 + $0x30] sm:$0xff]  ;;  %v910_v15 = vld [vmem:[%s1103_s7 + $0x28] sm:$0xff]  ;;  %p893_p11 = scmp.ne.s32.totalorder %s1022_s14, 2 }
  0x2d   : > { %v920_v10 = vld [vmem:[%s1103_s7 + $0x78] sm:$0xff]  ;;  %541 = vmatpush.bf16.msra.mxu0 %v912_v9  ;;  %v919_v13 = vld [vmem:[%s1103_s7 + $0x70] sm:$0xff]  ;;  %940 = vmatpush.bf16.msra.mxu3 %v912_v9  ;;  %v918_v16 = vld [vmem:[%s1103_s7 + $0x68] sm:$0xff] }
  0x2e   : > { %v928_v11 = vld [vmem:[%s1103_s7 + $0xb8] sm:$0xff]  ;;  %560 = vmatpush.bf16.msra.mxu1 %v920_v10  ;;  %v927_v14 = vld [vmem:[%s1103_s7 + $0xb0] sm:$0xff]  ;;  %v926_v17 = vld [vmem:[%s1103_s7 + $0xa8] sm:$0xff] }
  0x2f   : > { %579 = vmatpush.bf16.msra.mxu2 %v928_v11  ;;  %v909_v18 = vld [vmem:[%s1103_s7 + $0x20] sm:$0xff]  ;;  %v908_v21 = vld [vmem:[%s1103_s7 + $0x18] sm:$0xff]  ;;  %v907_v24 = vld [vmem:[%s1103_s7 + $0x10] sm:$0xff] }
  0x30   : > { %v917_v19 = vld [vmem:[%s1103_s7 + $0x60] sm:$0xff]  ;;  %v916_v22 = vld [vmem:[%s1103_s7 + $0x58] sm:$0xff]  ;;  %v915_v25 = vld [vmem:[%s1103_s7 + $0x50] sm:$0xff] }
  0x31   : > { %542 = vmatpush.bf16.msra.mxu0 %v911_v12  ;;  %941 = vmatpush.bf16.msra.mxu3 %v911_v12  ;;  %v925_v20 = vld [vmem:[%s1103_s7 + $0xa0] sm:$0xff]  ;;  %v924_v23 = vld [vmem:[%s1103_s7 + $0x98] sm:$0xff]  ;;  %v923_v26 = vld [vmem:[%s1103_s7 + $0x90] sm:$0xff] }
  0x32   : > { %561 = vmatpush.bf16.msra.mxu1 %v919_v13  ;;  %v906_v27 = vld [vmem:[%s1103_s7 + $0x8] sm:$0xff]  ;;  %v905_v30 = vld [vmem:[%s1103_s7] sm:$0xff]  ;;  %v305_v54 = vld [vmem:[#allocation2 + $0x10] sm:$0xff] }
  0x33   : > { %580 = vmatpush.bf16.msra.mxu2 %v927_v14  ;;  %v914_v28 = vld [vmem:[%s1103_s7 + $0x48] sm:$0xff]  ;;  %v913_v31 = vld [vmem:[%s1103_s7 + $0x40] sm:$0xff]  ;;  %v307_v4 = vld [vmem:[#allocation2 + $0x18] sm:$0xff] }
  0x34   : > { %v922_v29 = vld [vmem:[%s1103_s7 + $0x88] sm:$0xff]  ;;  %v921_v32 = vld [vmem:[%s1103_s7 + $0x80] sm:$0xff] }
  0x35   : > { %543 = vmatpush.bf16.msra.mxu0 %v910_v15  ;;  %942 = vmatpush.bf16.msra.mxu3 %v910_v15  ;;  %v775_v33 = vld [vmem:[%s1105_s8] sm:$0xf]  ;;  %v900_v34 = vld [vmem:[%s1105_s8 + $0x8] sm:$0xf0]  ;;  %v899_v35 = vld [vmem:[%s1105_s8 + $0x4] sm:$0xf] }
  0x36   : > { %562 = vmatpush.bf16.msra.mxu1 %v918_v16  ;;  %v777_v36 = vld [vmem:[%s1105_s8 + $0xc] sm:$0xf0]  ;;  %v783_v37 = vld [vmem:[%s1105_s8 + $0x8] sm:$0xf]  ;;  %v901_v38 = vld [vmem:[%s1105_s8 + $0x10] sm:$0xf0]  ;;  %v776_v41 = vor.u32 %v900_v34, %v775_v33 }
  0x37   : > { %581 = vmatpush.bf16.msra.mxu2 %v926_v17  ;;  %v787_v39 = vld [vmem:[%s1105_s8 + $0x18] sm:$0xf]  ;;  %v903_v40 = vld [vmem:[%s1105_s8 + $0x20] sm:$0xf0]  ;;  %v780_v42 = vor.u32 %v899_v35, %v777_v36  ;;  %v784_v43 = vor.u32 %v901_v38, %v783_v37  ;;  %v902_v45 = vld [vmem:[%s1105_s8 + $0x1c] sm:$0xf] }
  0x38   : > { %v788_v44 = vor.u32 %v903_v40, %v787_v39  ;;  %v789_v46 = vld [vmem:[%s1105_s8 + $0x24] sm:$0xf0]  ;;  %v795_v47 = vld [vmem:[%s1105_s8 + $0x20] sm:$0xf]  ;;  %v904_v48 = vld [vmem:[%s1105_s8 + $0x28] sm:$0xf0] }
  0x39   : > { %544 = vmatpush.bf16.msra.mxu0 %v909_v18  ;;  %943 = vmatpush.bf16.msra.mxu3 %v909_v18  ;;  %v792_v49 = vor.u32 %v902_v45, %v789_v46  ;;  %v796_v50 = vor.u32 %v904_v48, %v795_v47  ;;  %v306_v61 = vld [vmem:[#allocation2] sm:$0xff]  ;;  %v308_v11 = vld [vmem:[#allocation2 + $0x8] sm:$0xff] }
  0x3a   : > { %563 = vmatpush.bf16.msra.mxu1 %v917_v19 }
  0x3b   : > { %582 = vmatpush.bf16.msra.mxu2 %v925_v20 }
  0x3d   : > { %545 = vmatpush.bf16.msra.mxu0 %v908_v21  ;;  %944 = vmatpush.bf16.msra.mxu3 %v908_v21 }
  0x3e   : > { %564 = vmatpush.bf16.msra.mxu1 %v916_v22 }
  0x3f   : > { %583 = vmatpush.bf16.msra.mxu2 %v924_v23 }
  0x41   : > { %546 = vmatpush.bf16.msra.mxu0 %v907_v24  ;;  %945 = vmatpush.bf16.msra.mxu3 %v907_v24 }
  0x42   : > { %565 = vmatpush.bf16.msra.mxu1 %v915_v25 }
  0x43   : > { %584 = vmatpush.bf16.msra.mxu2 %v923_v26 }
  0x45   : > { %547 = vmatpush.bf16.msra.mxu0 %v906_v27  ;;  %946 = vmatpush.bf16.msra.mxu3 %v906_v27 }
  0x46   : > { %566 = vmatpush.bf16.msra.mxu1 %v914_v28 }
  0x47   : > { %585 = vmatpush.bf16.msra.mxu2 %v922_v29 }
  0x49   : > { %548 = vmatpush.bf16.msra.mxu0 %v905_v30  ;;  %947 = vmatpush.bf16.msra.mxu3 %v905_v30 }
  0x4a   : > { %567 = vmatpush.bf16.msra.mxu1 %v913_v31 }
  0x4b   : > { %586 = vmatpush.bf16.msra.mxu2 %v921_v32 }
  0x4c   : > { %549 = vmatmul.bf16.vlgmr.msra.gmra.mxu0 %v776_v41  ;;  %554 = vmatmul.bf16.vlgmr.msra.gmra.mxu3 %v788_v44 }
  0x4d   : > { %568 = vmatmul.bf16.vlgmr.msra.gmra.mxu1 %v780_v42 }
  0x4e   : > { %587 = vmatmul.bf16.vlgmr.msra.gmra.mxu2 %v784_v43 }
  0x5d   : > { %573 = vmatmul.bf16.gmra.mxu1 %v792_v49 }
  0x5e   : > { %592 = vmatmul.bf16.gmra.mxu2 %v796_v50 }
  0xc9   : > { %v550_v52 = vpop.f32.mrf.mxu0 }
  0xca   : > { %v569_v51 = vpop.f32.mrf.mxu1 }
  0xcb   : > { %v570_v53 = vadd.f32 %v569_v51, %v550_v52 }
  0xcf   : > { %v555_v2 = vpop.f32.mrf.mxu3 }
  0xd1   : > { %v588_v55 = vpop.f32.mrf.mxu2  ;;  %v552_v59 = vpop.f32.mrf.mxu0 }
  0xd2   : > { %v589_v56 = vadd.f32 %v588_v55, %v570_v53  ;;  %v571_v57 = vpop.f32.mrf.mxu1 }
  0xd3   : > { %v572_v60 = vadd.f32 %v571_v57, %v552_v59 }
  0xd4   : > { %v598_v58 = vadd.f32 %v589_v56, %v305_v54 }
  0xd6   : > { %602 = vst [vmem:[#allocation2 + $0x10] sm:$0xff] %v598_v58 }
  0xd7   : > { %v557_v9 = vpop.f32.mrf.mxu3 }
  0xd9   : > { %v590_v62 = vpop.f32.mrf.mxu2 }
  0xda   : > { %v591_v63 = vadd.f32 %v590_v62, %v572_v60  ;;  %v574_v0 = vpop.f32.mrf.mxu1 }
  0xdb   : > { %v575_v3 = vadd.f32 %v574_v0, %v555_v2 }
  0xdc   : > { %v599_v1 = vadd.f32 %v591_v63, %v306_v61 }
  0xde   : > { %603 = vst [vmem:[#allocation2] sm:$0xff] %v599_v1 }
  0xe1   : > { %v593_v5 = vpop.f32.mrf.mxu2 }
  0xe2   : > { %v594_v6 = vadd.f32 %v593_v5, %v575_v3  ;;  %v576_v8 = vpop.f32.mrf.mxu1 }
  0xe3   : > { %v577_v10 = vadd.f32 %v576_v8, %v557_v9 }
  0xe4   : > { %v600_v7 = vadd.f32 %v594_v6, %v307_v4 }
  0xe6   : > { %604 = vst [vmem:[#allocation2 + $0x18] sm:$0xff] %v600_v7 }
  0xe9   : > { %v595_v12 = vpop.f32.mrf.mxu2 }
  0xea   : > { %v596_v13 = vadd.f32 %v595_v12, %v577_v10  ;;  %609 = sbr.rel (%p893_p11) target bundleno = 254 (0xfe), region = 66 }
  0xec   : > { %v601_v14 = vadd.f32 %v596_v13, %v308_v11 }
  0xee   : > { %605 = vst [vmem:[#allocation2 + $0x8] sm:$0xff] %v601_v14 }
  0xef   : > { %v610_v15 = vld [vmem:[#allocation2 + $0x10] sm:$0xff]  ;;  %v611_v16 = vld [vmem:[#allocation2] sm:$0xff]  ;;  %v612_v18 = vld [vmem:[#allocation2 + $0x18] sm:$0xff] }
  0xf0   : > { %v991_v17 = vld [vmem:[%s1171_s2] ss:$0 sm:$0xff] }
  0xf1   : > { %v618_v20 = vadd.f32 %v991_v17, %v610_v15  ;;  %v619_v21 = vadd.f32 %v991_v17, %v611_v16  ;;  %v620_v22 = vadd.f32 %v991_v17, %v612_v18 }
  0xf3   : > { %vm622_vm0 = vcmp.ge.f32.partialorder %v618_v20, 0.0  ;;  %vm623_vm1 = vcmp.ge.f32.partialorder %v619_v21, 0.0  ;;  %v626_v24 = vmul.f32 0.1, %v618_v20  ;;  %v627_v25 = vmul.f32 0.1, %v619_v21 }
  0xf4   : > { %vm624_vm2 = vcmp.ge.f32.partialorder %v620_v22, 0.0  ;;  %v628_v26 = vmul.f32 0.1, %v620_v22 }
  0xf5   : > { %v613_v19 = vld [vmem:[#allocation2 + $0x8] sm:$0xff]  ;;  %v630_v28 = vsel %vm622_vm0, %v618_v20, %v626_v24  ;;  %v631_v29 = vsel %vm623_vm1, %v619_v21, %v627_v25 }
  0xf6   : > { %v621_v23 = vadd.f32 %v991_v17, %v613_v19  ;;  %v932_v30 = vpack.c.bf16 %v631_v29, %v630_v28  ;;  %v632_v31 = vsel %vm624_vm2, %v620_v22, %v628_v26 }
  0xf8   : > { %vm625_vm3 = vcmp.ge.f32.partialorder %v621_v23, 0.0  ;;  %v629_v27 = vmul.f32 0.1, %v621_v23  ;;  %933 = vst [vmem:[%s1172_s3] sm:$0xff] %v932_v30  }
  0xfa   : > { %v633_v32 = vsel %vm625_vm3, %v621_v23, %v629_v27 }
  0xfb   : > { %v937_v33 = vpack.c.bf16 %v633_v32, %v632_v31 }
  0xfd   : > { %939 = vst [vmem:[%s1172_s3 + $0x8] sm:$0xff] %v937_v33  }
  0xfe PF: > { %s13_s16 = sadd.s32 1, %s1030_s16   ;;  %s1173_s12 = smov %s1018_s13 }
  0xff   : > { %p10_p12 = scmp.ge.s32.totalorder %s13_s16, 5   ;;  %s1174_s13 = smov %s1088_s20 }
 0x100   : > { %s1175_s14 = smov %s1026_s15  ;;  %s1176_s15 = smov %s1178_s17 }
 0x101   :  { %12 = sbr.rel (!%p10_p12) target bundleno = 3 (0x3), region = 113 }

// kernel: discriminator_forward.10
= control target key start
LH: loop header
LB: loop body
LE: loop exit
PB: predicated region body
PF: predicated region fallthrough
CT: control target
= control target key end

     0   :  { %s1343_s18 = smov 0   ;;  %s1345_s19 = smov 0   ;;  %s1489_s0 = inlined_call_operand.vmem [shape: bf16[32,1152], index: 0, kind: input, shape index: {}]   ;;  %s1490_s1 = inlined_call_operand.vmem [shape: bf16[32,128], index: 1, kind: input, shape index: {}]   ;;  %s1491_s2 = inlined_call_operand.vmem [shape: bf16[1152,128], index: 2, kind: input, shape index: {}]   ;;  %s1492_s3 = inlined_call_operand.vmem [shape: bf16[128,128], index: 3, kind: input, shape index: {}]   ;;  %s1493_s4 = inlined_call_operand.vmem [shape: f32[1,128], index: 4, kind: input, shape index: {}]   ;;  %s1494_s5 = inlined_call_operand.vmem [shape: bf16[32,128], index: 5, kind: output, shape index: {}]  }
   0x1   :  { %s1347_s20 = smov 0   ;;  %s1349_s21 = smov 0  }
   0x2   :  { %s1351_s22 = smov 0  }
   0x3 LB: > { %s27_s23 = sadd.s32 1, %s1307_s21  ;;  %p50_p1 = scmp.ne.s32.totalorder %s1299_s19, %s1295_s18  ;;  %s1311_s22 = sphi %s1351_s22, %s15_s22   ;;  %s1307_s21 = sphi %s1349_s21, %s1498_s21   ;;  %s1303_s20 = sphi %s1347_s20, %s1497_s20   ;;  %s1299_s19 = sphi %s1345_s19, %s1496_s19   ;;  %s1295_s18 = sphi %s1343_s18, %s1495_s18  }
   0x4   : > { %p28_p0 = scmp.ge.s32.totalorder %s27_s23, 3  ;;  %p51_p2 = scmp.eq.s32.totalorder %s1311_s22, 0 }
   0x5   : > { %s43_s25 = sadd.s32 1, %s1299_s19  ;;  %p984_p5 = scmp.ge.s32.totalorder %s1311_s22, 3 }
   0x6   : > { %s1500_s23 = smov (%p28_p0, %s27_s23), 0  ;;  %p52_p3 = por %p51_p2, %p50_p1 }
   0x7   : > { %s39_s24 = ssub.s32 %s1307_s21, %s1500_s23  ;;  %232 = sbr.rel (%p984_p5) target bundleno = 25 (0x19), region = 28 }
   0x8   : > { %p41_p4 = scmp.eq.s32.totalorder %s39_s24, 0 }
   0xa   : > { %s1378_s26 = scalar_select %p41_p4, %s1299_s19, %s43_s25  }
   0xc   : > { %235 = sbr.rel (!%p52_p3) target bundleno = 25 (0x19), region = 32  ;;  %s237_s27 = sand.u32 (%p52_p3), 1, %s1299_s19  }
   0xd   : > { %s1162_s28 = smul.u32 (%p52_p3), 12, %s1307_s21 }
   0xe   : > { %s1230_s29 = smul.u32 (%p52_p3), 48, %s237_s27 }
   0xf   : > { %s245_s7 = scalar_lea.vmem (%p52_p3), %s1489_s0, %s1162_s28 }
  0x10   : > { %v260_v0 = vld [vmem:[%s245_s7] sm:$0xff] (%p52_p3)  ;;  %v264_v2 = vld [vmem:[%s245_s7 + $0x48] sm:$0xff] (%p52_p3)  ;;  %s239_s8 = scalar_lea.vmem (%p52_p3), [#allocation3], %s1230_s29  ;;  %v990_v6 = vld [vmem:[%s245_s7 + $0x50] sm:$0xf] (%p52_p3) }
  0x11   : > { %v262_v1 = vld [vmem:[%s245_s7 + $0x24] sm:$0xff]  ;;  %261 = vst [vmem:[%s239_s8] sm:$0xff] %v260_v0  ;;  %v266_v3 = vld [vmem:[%s245_s7 + $0x6c] sm:$0xff]  ;;  %v992_v7 = vld [vmem:[%s245_s7 + $0x74] sm:$0xf] }
  0x12   : > { %263 = vst [vmem:[%s239_s8 + $0xc] sm:$0xff] %v262_v1  ;;  %v986_v4 = vld [vmem:[%s245_s7 + $0x8] sm:$0xf]  ;;  %v988_v5 = vld [vmem:[%s245_s7 + $0x2c] sm:$0xf] }
  0x13   : > { %265 = vst [vmem:[%s239_s8 + $0x18] sm:$0xff] %v264_v2 }
  0x14   : > { %267 = vst [vmem:[%s239_s8 + $0x24] sm:$0xff] %v266_v3 }
  0x15   : > { %987 = vst [vmem:[%s239_s8 + $0x8] sm:$0xf] %v986_v4 }
  0x16   : > { %989 = vst [vmem:[%s239_s8 + $0x14] sm:$0xf] %v988_v5 }
  0x17   : > { %991 = vst [vmem:[%s239_s8 + $0x20] sm:$0xf] %v990_v6 }
  0x18   : > { %993 = vst [vmem:[%s239_s8 + $0x2c] sm:$0xf] %v992_v7 }
  0x19 PF: > { %p994_p6 = scmp.ge.s32.totalorder %s1311_s22, 1  ;;  %p300_p7 = scmp.lt.s32.totalorder %s1311_s22, 4 }
  0x1b   : > { %p301_p8 = pnand %p994_p6, %p300_p7 }
  0x1c   : > { %s307_s9 = sand.u32 (!%p301_p8), 1, %s1295_s18   ;;  %s365_s10 = smul.u32 (!%p301_p8), 48, %s1303_s20 }
  0x1d   : > { %304 = sbr.rel (%p301_p8) target bundleno = 417 (0x1a1), region = 62  ;;  %p996_p10 = scmp.ne.s32.totalorder (!%p301_p8), %s1303_s20, 0 }
  0x1e   : > { %s1231_s11 = smul.u32 (!%p301_p8), 48, %s307_s9  ;;  %p366_p9 = scmp.lt.s32.totalorder (!%p301_p8), %s365_s10, 143 }
  0x20   : > { %s1395_s16 = scalar_lea.vmem (!%p301_p8), [#allocation3], %s1231_s11 }
  0x22   : > { %s1502_s10 = smov (!%p366_p9, %s365_s10), 143  ;;  %393 = sbr.rel (%p996_p10) target bundleno = 207 (0xcf), region = 70 }
  0x23   : > { %s995_s12 = sshll.u32 %s1502_s10, 2 }
  0x24   : > { %s1393_s15 = scalar_lea.vmem %s1491_s2, %s995_s12 }
  0x27   : > { %v1172_v8 = vld [vmem:[%s1492_s3 + $0x38] sm:$0xff]  ;;  %v1171_v9 = vld [vmem:[%s1492_s3 + $0x30] sm:$0xff]  ;;  %v1170_v10 = vld [vmem:[%s1492_s3 + $0x28] sm:$0xff] }
  0x28   : > { %474 = vmatpush.bf16.msra.mxu0 %v1172_v8  ;;  %1214 = vmatpush.bf16.msra.mxu1 %v1172_v8  ;;  %v1169_v11 = vld [vmem:[%s1492_s3 + $0x20] sm:$0xff]  ;;  %v1168_v12 = vld [vmem:[%s1492_s3 + $0x18] sm:$0xff]  ;;  %v1167_v13 = vld [vmem:[%s1492_s3 + $0x10] sm:$0xff] }
  0x29   : > { %v1166_v14 = vld [vmem:[%s1492_s3 + $0x8] sm:$0xff]  ;;  %v1165_v15 = vld [vmem:[%s1492_s3] sm:$0xff] }
  0x2a   : > { %v1163_v16 = vld [vmem:[%s1490_s1] sm:$0xff]  ;;  %v1164_v17 = vld [vmem:[%s1490_s1 + $0x8] sm:$0xff] }
  0x2c   : > { %475 = vmatpush.bf16.msra.mxu0 %v1171_v9  ;;  %1215 = vmatpush.bf16.msra.mxu1 %v1171_v9 }
  0x30   : > { %476 = vmatpush.bf16.msra.mxu0 %v1170_v10  ;;  %1216 = vmatpush.bf16.msra.mxu1 %v1170_v10 }
  0x34   : > { %477 = vmatpush.bf16.msra.mxu0 %v1169_v11  ;;  %1217 = vmatpush.bf16.msra.mxu1 %v1169_v11 }
  0x38   : > { %478 = vmatpush.bf16.msra.mxu0 %v1168_v12  ;;  %1218 = vmatpush.bf16.msra.mxu1 %v1168_v12 }
  0x3c   : > { %479 = vmatpush.bf16.msra.mxu0 %v1167_v13  ;;  %1219 = vmatpush.bf16.msra.mxu1 %v1167_v13 }
  0x40   : > { %480 = vmatpush.bf16.msra.mxu0 %v1166_v14  ;;  %1220 = vmatpush.bf16.msra.mxu1 %v1166_v14 }
  0x44   : > { %481 = vmatpush.bf16.msra.mxu0 %v1165_v15  ;;  %1221 = vmatpush.bf16.msra.mxu1 %v1165_v15 }
  0x47   : > { %482 = vmatmul.bf16.vlgmr.msra.gmra.mxu0 %v1163_v16  ;;  %487 = vmatmul.bf16.vlgmr.msra.gmra.mxu1 %v1164_v17 }
  0xc4   : > { %v483_v18 = vpop.f32.mrf.mxu0  ;;  %v488_v19 = vpop.f32.mrf.mxu1 }
  0xc5   : > { %493 = vst [vmem:[#allocation2 + $0x10] sm:$0xff] %v483_v18 }
  0xc6   : > { %495 = vst [vmem:[#allocation2 + $0x18] sm:$0xff] %v488_v19 }
  0xcc   : > { %v485_v20 = vpop.f32.mrf.mxu0  ;;  %v490_v21 = vpop.f32.mrf.mxu1 }
  0xcd   : > { %494 = vst [vmem:[#allocation2] sm:$0xff] %v485_v20 }
  0xce   : > { %496 = vst [vmem:[#allocation2 + $0x8] sm:$0xff] %v490_v21 }
  0xcf PF: > { %v1186_v22 = vld [vmem:[%s1393_s15 + $0x38] sm:$0xff]  ;;  %v1185_v25 = vld [vmem:[%s1393_s15 + $0x30] sm:$0xff]  ;;  %v1184_v28 = vld [vmem:[%s1393_s15 + $0x28] sm:$0xff]  ;;  %p1157_p11 = scmp.ne.s32.totalorder %s1303_s20, 2 }
  0xd0   : > { %v1194_v23 = vld [vmem:[%s1393_s15 + $0x78] sm:$0xff]  ;;  %733 = vmatpush.bf16.msra.mxu0 %v1186_v22  ;;  %v1193_v26 = vld [vmem:[%s1393_s15 + $0x70] sm:$0xff]  ;;  %1222 = vmatpush.bf16.msra.mxu3 %v1186_v22  ;;  %v1192_v29 = vld [vmem:[%s1393_s15 + $0x68] sm:$0xff] }
  0xd1   : > { %v1202_v24 = vld [vmem:[%s1393_s15 + $0xb8] sm:$0xff]  ;;  %752 = vmatpush.bf16.msra.mxu1 %v1194_v23  ;;  %v1201_v27 = vld [vmem:[%s1393_s15 + $0xb0] sm:$0xff]  ;;  %v1200_v30 = vld [vmem:[%s1393_s15 + $0xa8] sm:$0xff] }
  0xd2   : > { %771 = vmatpush.bf16.msra.mxu2 %v1202_v24  ;;  %v1183_v31 = vld [vmem:[%s1393_s15 + $0x20] sm:$0xff]  ;;  %v1182_v34 = vld [vmem:[%s1393_s15 + $0x18] sm:$0xff]  ;;  %v1181_v37 = vld [vmem:[%s1393_s15 + $0x10] sm:$0xff] }
  0xd3   : > { %v1191_v32 = vld [vmem:[%s1393_s15 + $0x60] sm:$0xff]  ;;  %v1190_v35 = vld [vmem:[%s1393_s15 + $0x58] sm:$0xff]  ;;  %v1189_v38 = vld [vmem:[%s1393_s15 + $0x50] sm:$0xff] }
  0xd4   : > { %734 = vmatpush.bf16.msra.mxu0 %v1185_v25  ;;  %1223 = vmatpush.bf16.msra.mxu3 %v1185_v25  ;;  %v1199_v33 = vld [vmem:[%s1393_s15 + $0xa0] sm:$0xff]  ;;  %v1198_v36 = vld [vmem:[%s1393_s15 + $0x98] sm:$0xff]  ;;  %v1197_v39 = vld [vmem:[%s1393_s15 + $0x90] sm:$0xff] }
  0xd5   : > { %753 = vmatpush.bf16.msra.mxu1 %v1193_v26  ;;  %v1180_v40 = vld [vmem:[%s1393_s15 + $0x8] sm:$0xff]  ;;  %v1179_v43 = vld [vmem:[%s1393_s15] sm:$0xff]  ;;  %v497_v3 = vld [vmem:[#allocation2 + $0x10] sm:$0xff] }
  0xd6   : > { %772 = vmatpush.bf16.msra.mxu2 %v1201_v27  ;;  %v1188_v41 = vld [vmem:[%s1393_s15 + $0x48] sm:$0xff]  ;;  %v1187_v44 = vld [vmem:[%s1393_s15 + $0x40] sm:$0xff]  ;;  %v499_v17 = vld [vmem:[#allocation2 + $0x18] sm:$0xff] }
  0xd7   : > { %v1196_v42 = vld [vmem:[%s1393_s15 + $0x88] sm:$0xff]  ;;  %v1195_v45 = vld [vmem:[%s1393_s15 + $0x80] sm:$0xff] }
  0xd8   : > { %735 = vmatpush.bf16.msra.mxu0 %v1184_v28  ;;  %1224 = vmatpush.bf16.msra.mxu3 %v1184_v28  ;;  %v1039_v46 = vld [vmem:[%s1395_s16] sm:$0xf]  ;;  %v1174_v47 = vld [vmem:[%s1395_s16 + $0x8] sm:$0xf0]  ;;  %v1173_v48 = vld [vmem:[%s1395_s16 + $0x4] sm:$0xf] }
  0xd9   : > { %754 = vmatpush.bf16.msra.mxu1 %v1192_v29  ;;  %v1041_v49 = vld [vmem:[%s1395_s16 + $0xc] sm:$0xf0]  ;;  %v1047_v50 = vld [vmem:[%s1395_s16 + $0x8] sm:$0xf]  ;;  %v1175_v51 = vld [vmem:[%s1395_s16 + $0x10] sm:$0xf0]  ;;  %v1040_v54 = vor.u32 %v1174_v47, %v1039_v46 }
  0xda   : > { %773 = vmatpush.bf16.msra.mxu2 %v1200_v30  ;;  %v1051_v52 = vld [vmem:[%s1395_s16 + $0x18] sm:$0xf]  ;;  %v1177_v53 = vld [vmem:[%s1395_s16 + $0x20] sm:$0xf0]  ;;  %v1044_v55 = vor.u32 %v1173_v48, %v1041_v49  ;;  %v1048_v56 = vor.u32 %v1175_v51, %v1047_v50  ;;  %v1176_v58 = vld [vmem:[%s1395_s16 + $0x1c] sm:$0xf] }
  0xdb   : > { %v1052_v57 = vor.u32 %v1177_v53, %v1051_v52  ;;  %v1053_v59 = vld [vmem:[%s1395_s16 + $0x24] sm:$0xf0]  ;;  %v1059_v60 = vld [vmem:[%s1395_s16 + $0x20] sm:$0xf]  ;;  %v1178_v61 = vld [vmem:[%s1395_s16 + $0x28] sm:$0xf0] }
  0xdc   : > { %736 = vmatpush.bf16.msra.mxu0 %v1183_v31  ;;  %1225 = vmatpush.bf16.msra.mxu3 %v1183_v31  ;;  %v1056_v62 = vor.u32 %v1176_v58, %v1053_v59  ;;  %v1060_v63 = vor.u32 %v1178_v61, %v1059_v60  ;;  %v498_v10 = vld [vmem:[#allocation2] sm:$0xff]  ;;  %v500_v24 = vld [vmem:[#allocation2 + $0x8] sm:$0xff] }
  0xdd   : > { %755 = vmatpush.bf16.msra.mxu1 %v1191_v32 }
  0xde   : > { %774 = vmatpush.bf16.msra.mxu2 %v1199_v33 }
  0xe0   : > { %737 = vmatpush.bf16.msra.mxu0 %v1182_v34  ;;  %1226 = vmatpush.bf16.msra.mxu3 %v1182_v34 }
  0xe1   : > { %756 = vmatpush.bf16.msra.mxu1 %v1190_v35 }
  0xe2   : > { %775 = vmatpush.bf16.msra.mxu2 %v1198_v36 }
  0xe4   : > { %738 = vmatpush.bf16.msra.mxu0 %v1181_v37  ;;  %1227 = vmatpush.bf16.msra.mxu3 %v1181_v37 }
  0xe5   : > { %757 = vmatpush.bf16.msra.mxu1 %v1189_v38 }
  0xe6   : > { %776 = vmatpush.bf16.msra.mxu2 %v1197_v39 }
  0xe8   : > { %739 = vmatpush.bf16.msra.mxu0 %v1180_v40  ;;  %1228 = vmatpush.bf16.msra.mxu3 %v1180_v40 }
  0xe9   : > { %758 = vmatpush.bf16.msra.mxu1 %v1188_v41 }
  0xea   : > { %777 = vmatpush.bf16.msra.mxu2 %v1196_v42 }
  0xec   : > { %740 = vmatpush.bf16.msra.mxu0 %v1179_v43  ;;  %1229 = vmatpush.bf16.msra.mxu3 %v1179_v43 }
  0xed   : > { %759 = vmatpush.bf16.msra.mxu1 %v1187_v44 }
  0xee   : > { %778 = vmatpush.bf16.msra.mxu2 %v1195_v45 }
  0xef   : > { %741 = vmatmul.bf16.vlgmr.msra.gmra.mxu0 %v1040_v54  ;;  %746 = vmatmul.bf16.vlgmr.msra.gmra.mxu3 %v1052_v57 }
  0xf0   : > { %760 = vmatmul.bf16.vlgmr.msra.gmra.mxu1 %v1044_v55 }
  0xf1   : > { %779 = vmatmul.bf16.vlgmr.msra.gmra.mxu2 %v1048_v56 }
 0x100   : > { %765 = vmatmul.bf16.gmra.mxu1 %v1056_v62 }
 0x101   : > { %784 = vmatmul.bf16.gmra.mxu2 %v1060_v63 }
 0x16c   : > { %v742_v1 = vpop.f32.mrf.mxu0 }
 0x16d   : > { %v761_v0 = vpop.f32.mrf.mxu1 }
 0x16e   : > { %v762_v2 = vadd.f32 %v761_v0, %v742_v1 }
 0x172   : > { %v747_v15 = vpop.f32.mrf.mxu3 }
 0x174   : > { %v780_v4 = vpop.f32.mrf.mxu2  ;;  %v744_v8 = vpop.f32.mrf.mxu0 }
 0x175   : > { %v781_v5 = vadd.f32 %v780_v4, %v762_v2  ;;  %v763_v6 = vpop.f32.mrf.mxu1 }
 0x176   : > { %v764_v9 = vadd.f32 %v763_v6, %v744_v8 }
 0x177   : > { %v790_v7 = vadd.f32 %v781_v5, %v497_v3 }
 0x179   : > { %794 = vst [vmem:[#allocation2 + $0x10] sm:$0xff] %v790_v7 }
 0x17a   : > { %v749_v22 = vpop.f32.mrf.mxu3 }
 0x17c   : > { %v782_v11 = vpop.f32.mrf.mxu2 }
 0x17d   : > { %v783_v12 = vadd.f32 %v782_v11, %v764_v9  ;;  %v766_v13 = vpop.f32.mrf.mxu1 }
 0x17e   : > { %v767_v16 = vadd.f32 %v766_v13, %v747_v15 }
 0x17f   : > { %v791_v14 = vadd.f32 %v783_v12, %v498_v10 }
 0x181   : > { %795 = vst [vmem:[#allocation2] sm:$0xff] %v791_v14 }
 0x184   : > { %v785_v18 = vpop.f32.mrf.mxu2 }
 0x185   : > { %v786_v19 = vadd.f32 %v785_v18, %v767_v16  ;;  %v768_v21 = vpop.f32.mrf.mxu1 }
 0x186   : > { %v769_v23 = vadd.f32 %v768_v21, %v749_v22 }
 0x187   : > { %v792_v20 = vadd.f32 %v786_v19, %v499_v17 }
 0x189   : > { %796 = vst [vmem:[#allocation2 + $0x18] sm:$0xff] %v792_v20 }
 0x18c   : > { %v787_v25 = vpop.f32.mrf.mxu2 }
 0x18d   : > { %v788_v26 = vadd.f32 %v787_v25, %v769_v23  ;;  %801 = sbr.rel (%p1157_p11) target bundleno = 417 (0x1a1), region = 74 }
 0x18f   : > { %v793_v27 = vadd.f32 %v788_v26, %v500_v24 }
 0x191   : > { %797 = vst [vmem:[#allocation2 + $0x8] sm:$0xff] %v793_v27 }
 0x192   : > { %v802_v28 = vld [vmem:[#allocation2 + $0x10] sm:$0xff]  ;;  %v803_v29 = vld [vmem:[#allocation2] sm:$0xff]  ;;  %v804_v31 = vld [vmem:[#allocation2 + $0x18] sm:$0xff] }
 0x193   : > { %v1272_v30 = vld [vmem:[%s1493_s4] ss:$0 sm:$0xff] }
 0x194   : > { %v810_v33 = vadd.f32 %v1272_v30, %v802_v28  ;;  %v811_v34 = vadd.f32 %v1272_v30, %v803_v29  ;;  %v812_v35 = vadd.f32 %v1272_v30, %v804_v31 }
 0x196   : > { %vm814_vm0 = vcmp.ge.f32.partialorder %v810_v33, 0.0  ;;  %vm815_vm1 = vcmp.ge.f32.partialorder %v811_v34, 0.0  ;;  %v818_v37 = vmul.f32 0.1, %v810_v33  ;;  %v819_v38 = vmul.f32 0.1, %v811_v34 }
 0x197   : > { %vm816_vm2 = vcmp.ge.f32.partialorder %v812_v35, 0.0  ;;  %v820_v39 = vmul.f32 0.1, %v812_v35 }
 0x198   : > { %v805_v32 = vld [vmem:[#allocation2 + $0x8] sm:$0xff]  ;;  %v822_v41 = vsel %vm814_vm0, %v810_v33, %v818_v37  ;;  %v823_v42 = vsel %vm815_vm1, %v811_v34, %v819_v38 }
 0x199   : > { %v813_v36 = vadd.f32 %v1272_v30, %v805_v32  ;;  %v1206_v43 = vpack.c.bf16 %v823_v42, %v822_v41  ;;  %v824_v44 = vsel %vm816_vm2, %v812_v35, %v820_v39 }
 0x19b   : > { %vm817_vm3 = vcmp.ge.f32.partialorder %v813_v36, 0.0  ;;  %v821_v40 = vmul.f32 0.1, %v813_v36  ;;  %1207 = vst [vmem:[%s1494_s5] sm:$0xff] %v1206_v43  }
 0x19d   : > { %v825_v45 = vsel %vm817_vm3, %v813_v36, %v821_v40 }
 0x19e   : > { %v1211_v46 = vpack.c.bf16 %v825_v45, %v824_v44 }
 0x1a0   : > { %1213 = vst [vmem:[%s1494_s5 + $0x8] sm:$0xff] %v1211_v46  }
 0x1a1 PF: > { %s15_s22 = sadd.s32 1, %s1311_s22   ;;  %s1495_s18 = smov %s1299_s19 }
 0x1a2   : > { %p12_p12 = scmp.ge.s32.totalorder %s15_s22, 5   ;;  %s1496_s19 = smov %s1378_s26 }
 0x1a3   : > { %s1497_s20 = smov %s1307_s21  ;;  %s1498_s21 = smov %s1500_s23 }
 0x1a4   :  { %14 = sbr.rel (!%p12_p12) target bundleno = 3 (0x3), region = 127 }

// kernel: discriminator_forward.11
= control target key start
LH: loop header
LB: loop body
LE: loop exit
PB: predicated region body
PF: predicated region fallthrough
CT: control target
= control target key end

     0   :  { %s1132_s12 = smov 0   ;;  %s1134_s13 = smov 0   ;;  %s1283_s0 = inlined_call_operand.vmem [shape: bf16[8,1152], index: 0, kind: input, shape index: {}]   ;;  %s1284_s1 = inlined_call_operand.vmem [shape: bf16[1152,256], index: 1, kind: input, shape index: {}]   ;;  %s1285_s2 = inlined_call_operand.vmem [shape: f32[1,256], index: 2, kind: input, shape index: {}]   ;;  %s1286_s3 = inlined_call_operand.vmem [shape: bf16[8,256], index: 3, kind: output, shape index: {}]  }
   0x1   :  { %s1136_s14 = smov 0  }
   0x2 LB: > { %s25_s15 = sadd.s32 1, %s1105_s13  ;;  %p811_p0 = scmp.ge.s32.totalorder %s1109_s14, 1  ;;  %s1109_s14 = sphi %s1136_s14, %s13_s14   ;;  %s1105_s13 = sphi %s1134_s13, %s1288_s13   ;;  %s1101_s12 = sphi %s1132_s12, %s1287_s12  }
   0x3   : > { %p26_p1 = scmp.ge.s32.totalorder %s25_s15, 3  ;;  %p194_p2 = scmp.lt.s32.totalorder %s1109_s14, 4 }
   0x5   : > { %s1290_s15 = smov (%p26_p1, %s25_s15), 0  ;;  %p195_p3 = pnand %p811_p0, %p194_p2 }
   0x6   : > { %s240_s16 = smul.u32 (!%p195_p3), 3, %s1101_s12  ;;  %p815_p6 = scmp.ne.s32.totalorder (!%p195_p3), %s1101_s12, 0 }
   0x7   : > { %198 = sbr.rel (%p195_p3) target bundleno = 237 (0xed), region = 32 }
   0x8   : > { %s250_s17 = smul.u32 (!%p195_p3), 48, %s1101_s12  ;;  %p243_p4 = scmp.lt.s32.totalorder (!%p195_p3), %s240_s16, 8 }
   0xa   : > { %p252_p5 = scmp.lt.s32.totalorder (!%p195_p3), %s250_s17, 143 }
   0xc   : > { %s1292_s16 = smov (!%p243_p4, %s240_s16), 8  ;;  %s1294_s17 = smov (!%p252_p5, %s250_s17), 143 }
   0xd   : > { %s812_s18 = sshll.u32 %s1292_s16, 2  ;;  %s1013_s22 = sshll.u32 %s1294_s17, 3 }
   0xe   : > { %s1157_s21 = scalar_lea.vmem %s1283_s0, %s812_s18  ;;  %s1162_s25 = scalar_lea.vmem %s1284_s1, %s1013_s22 }
   0xf   : > { %280 = sbr.rel (%p815_p6) target bundleno = 23 (0x17), region = 36 }
  0x14   : > { %v1111_v0 = vmov 0.0  }
  0x15   : > { %281 = vst [vmem:[#allocation2] sm:$0xff] %v1111_v0 }
  0x16   : > { %282 = vst [vmem:[#allocation2 + $0x8] sm:$0xff] %v1111_v0 }
  0x17 PF: > { %v874_v1 = vld [vmem:[%s1162_s25 + $0x70] sm:$0xf]  ;;  %v1029_v2 = vld [vmem:[%s1162_s25 + $0x74] sm:$0xf0]  ;;  %v866_v6 = vld [vmem:[%s1162_s25 + $0x60] sm:$0xf] }
  0x18   : > { %v938_v3 = vld [vmem:[%s1162_s25 + $0xf0] sm:$0xf]  ;;  %v875_v4 = vor.u32 %v1029_v2, %v874_v1  ;;  %v1045_v5 = vld [vmem:[%s1162_s25 + $0xf4] sm:$0xf0]  ;;  %v1027_v7 = vld [vmem:[%s1162_s25 + $0x64] sm:$0xf0] }
  0x19   : > { %v939_v8 = vor.u32 %v1045_v5, %v938_v3  ;;  %v930_v9 = vld [vmem:[%s1162_s25 + $0xe0] sm:$0xf]  ;;  %v1043_v10 = vld [vmem:[%s1162_s25 + $0xe4] sm:$0xf0]  ;;  %v867_v11 = vor.u32 %v1027_v7, %v866_v6  ;;  %v858_v12 = vld [vmem:[%s1162_s25 + $0x50] sm:$0xf] }
  0x1a   : > { %586 = vmatpush.bf16.msra.mxu0 %v875_v4  ;;  %v931_v13 = vor.u32 %v1043_v10, %v930_v9  ;;  %v1025_v14 = vld [vmem:[%s1162_s25 + $0x54] sm:$0xf0]  ;;  %v1002_v15 = vld [vmem:[%s1162_s25 + $0x170] sm:$0xf]  ;;  %v994_v20 = vld [vmem:[%s1162_s25 + $0x160] sm:$0xf] }
  0x1b   : > { %599 = vmatpush.bf16.msra.mxu1 %v939_v8  ;;  %v1061_v16 = vld [vmem:[%s1162_s25 + $0x174] sm:$0xf0]  ;;  %v922_v17 = vld [vmem:[%s1162_s25 + $0xd0] sm:$0xf]  ;;  %v1059_v21 = vld [vmem:[%s1162_s25 + $0x164] sm:$0xf0]  ;;  %v859_v23 = vor.u32 %v1025_v14, %v858_v12 }
  0x1c   : > { %v1041_v18 = vld [vmem:[%s1162_s25 + $0xd4] sm:$0xf0]  ;;  %v1003_v19 = vor.u32 %v1061_v16, %v1002_v15  ;;  %v1028_v22 = vld [vmem:[%s1162_s25 + $0x74] sm:$0xf]  ;;  %v850_v24 = vld [vmem:[%s1162_s25 + $0x40] sm:$0xf]  ;;  %v995_v26 = vor.u32 %v1059_v21, %v994_v20 }
  0x1d   : > { %v1023_v25 = vld [vmem:[%s1162_s25 + $0x44] sm:$0xf0]  ;;  %v876_v27 = vld [vmem:[%s1162_s25 + $0x78] sm:$0xf0]  ;;  %v923_v28 = vor.u32 %v1041_v18, %v922_v17  ;;  %v914_v29 = vld [vmem:[%s1162_s25 + $0xc0] sm:$0xf] }
  0x1e   : > { %587 = vmatpush.bf16.msra.mxu0 %v867_v11  ;;  %612 = vmatpush.bf16.msra.mxu2 %v1003_v19  ;;  %v1039_v30 = vld [vmem:[%s1162_s25 + $0xc4] sm:$0xf0]  ;;  %v879_v31 = vor.u32 %v1028_v22, %v876_v27  ;;  %v986_v32 = vld [vmem:[%s1162_s25 + $0x150] sm:$0xf]  ;;  %v1057_v33 = vld [vmem:[%s1162_s25 + $0x154] sm:$0xf0]  ;;  %v851_v37 = vor.u32 %v1023_v25, %v850_v24 }
  0x1f   : > { %600 = vmatpush.bf16.msra.mxu1 %v931_v13  ;;  %v1026_v34 = vld [vmem:[%s1162_s25 + $0x64] sm:$0xf]  ;;  %v868_v35 = vld [vmem:[%s1162_s25 + $0x68] sm:$0xf0]  ;;  %v842_v38 = vld [vmem:[%s1162_s25 + $0x30] sm:$0xf]  ;;  %v987_v40 = vor.u32 %v1057_v33, %v986_v32  ;;  %v915_v42 = vor.u32 %v1039_v30, %v914_v29 }
  0x20   : > { %625 = vmatpush.bf16.msra.mxu3 %v879_v31  ;;  %v871_v36 = vor.u32 %v1026_v34, %v868_v35  ;;  %v1021_v39 = vld [vmem:[%s1162_s25 + $0x34] sm:$0xf0]  ;;  %v978_v41 = vld [vmem:[%s1162_s25 + $0x140] sm:$0xf]  ;;  %v1055_v43 = vld [vmem:[%s1162_s25 + $0x144] sm:$0xf0] }
  0x21   : > { %v1024_v44 = vld [vmem:[%s1162_s25 + $0x54] sm:$0xf]  ;;  %v860_v45 = vld [vmem:[%s1162_s25 + $0x58] sm:$0xf0]  ;;  %v906_v46 = vld [vmem:[%s1162_s25 + $0xb0] sm:$0xf]  ;;  %v843_v49 = vor.u32 %v1021_v39, %v842_v38  ;;  %v979_v51 = vor.u32 %v1055_v43, %v978_v41 }
  0x22   : > { %588 = vmatpush.bf16.msra.mxu0 %v859_v23  ;;  %613 = vmatpush.bf16.msra.mxu2 %v995_v26  ;;  %v1037_v47 = vld [vmem:[%s1162_s25 + $0xb4] sm:$0xf0]  ;;  %v863_v48 = vor.u32 %v1024_v44, %v860_v45  ;;  %v834_v50 = vld [vmem:[%s1162_s25 + $0x20] sm:$0xf]  ;;  %v1022_v52 = vld [vmem:[%s1162_s25 + $0x44] sm:$0xf] }
  0x23   : > { %601 = vmatpush.bf16.msra.mxu1 %v923_v28  ;;  %v852_v53 = vld [vmem:[%s1162_s25 + $0x48] sm:$0xf0]  ;;  %v907_v54 = vor.u32 %v1037_v47, %v906_v46  ;;  %v1019_v55 = vld [vmem:[%s1162_s25 + $0x24] sm:$0xf0]  ;;  %v970_v56 = vld [vmem:[%s1162_s25 + $0x130] sm:$0xf] }
  0x24   : > { %626 = vmatpush.bf16.msra.mxu3 %v871_v36  ;;  %v1053_v57 = vld [vmem:[%s1162_s25 + $0x134] sm:$0xf0]  ;;  %v898_v58 = vld [vmem:[%s1162_s25 + $0xa0] sm:$0xf]  ;;  %v1035_v59 = vld [vmem:[%s1162_s25 + $0xa4] sm:$0xf0]  ;;  %v855_v60 = vor.u32 %v1022_v52, %v852_v53  ;;  %v835_v61 = vor.u32 %v1019_v55, %v834_v50 }
  0x25   : > { %v826_v62 = vld [vmem:[%s1162_s25 + $0x10] sm:$0xf]  ;;  %v971_v63 = vor.u32 %v1053_v57, %v970_v56  ;;  %v1020_v0 = vld [vmem:[%s1162_s25 + $0x34] sm:$0xf]  ;;  %v844_v1 = vld [vmem:[%s1162_s25 + $0x38] sm:$0xf0]  ;;  %v899_v2 = vor.u32 %v1035_v59, %v898_v58 }
  0x26   : > { %589 = vmatpush.bf16.msra.mxu0 %v851_v37  ;;  %614 = vmatpush.bf16.msra.mxu2 %v987_v40  ;;  %v1017_v3 = vld [vmem:[%s1162_s25 + $0x14] sm:$0xf0]  ;;  %v962_v4 = vld [vmem:[%s1162_s25 + $0x120] sm:$0xf]  ;;  %v1051_v5 = vld [vmem:[%s1162_s25 + $0x124] sm:$0xf0]  ;;  %v847_v10 = vor.u32 %v1020_v0, %v844_v1 }
  0x27   : > { %602 = vmatpush.bf16.msra.mxu1 %v915_v42  ;;  %v890_v6 = vld [vmem:[%s1162_s25 + $0x90] sm:$0xf]  ;;  %v1033_v7 = vld [vmem:[%s1162_s25 + $0x94] sm:$0xf0]  ;;  %v818_v8 = vld [vmem:[%s1162_s25] sm:$0xf]  ;;  %v827_v11 = vor.u32 %v1017_v3, %v826_v62  ;;  %v963_v12 = vor.u32 %v1051_v5, %v962_v4 }
  0x28   : > { %627 = vmatpush.bf16.msra.mxu3 %v863_v48  ;;  %v1015_v9 = vld [vmem:[%s1162_s25 + $0x4] sm:$0xf0]  ;;  %v1018_v13 = vld [vmem:[%s1162_s25 + $0x24] sm:$0xf]  ;;  %v836_v14 = vld [vmem:[%s1162_s25 + $0x28] sm:$0xf0]  ;;  %v891_v16 = vor.u32 %v1033_v7, %v890_v6 }
  0x29   : > { %v285_v15 = vld [vmem:[%s1157_s21] sm:$0xff]  ;;  %v954_v18 = vld [vmem:[%s1162_s25 + $0x110] sm:$0xf]  ;;  %v1049_v19 = vld [vmem:[%s1162_s25 + $0x114] sm:$0xf0]  ;;  %v839_v25 = vor.u32 %v1018_v13, %v836_v14  ;;  %v819_v27 = vor.u32 %v1015_v9, %v818_v8  ;;  %p1008_p7 = scmp.ne.s32.totalorder %s1101_s12, 2 }
  0x2a   : > { %590 = vmatpush.bf16.msra.mxu0 %v843_v49  ;;  %615 = vmatpush.bf16.msra.mxu2 %v979_v51  ;;  %v882_v17 = vld [vmem:[%s1162_s25 + $0x80] sm:$0xf]  ;;  %v1031_v20 = vld [vmem:[%s1162_s25 + $0x84] sm:$0xf0]  ;;  %v1044_v21 = vld [vmem:[%s1162_s25 + $0xf4] sm:$0xf]  ;;  %v337_v26 = vunpack.c.l.b16 %v285_v15  ;;  %v955_v28 = vor.u32 %v1049_v19, %v954_v18  ;;  %v338_v29 = vunpack.c.h.b16 %v285_v15 }
  0x2b   : > { %603 = vmatpush.bf16.msra.mxu1 %v907_v54  ;;  %v940_v22 = vld [vmem:[%s1162_s25 + $0xf8] sm:$0xf0]  ;;  %v1060_v23 = vld [vmem:[%s1162_s25 + $0x174] sm:$0xf]  ;;  %v286_v32 = vld [vmem:[%s1157_s21 + $0x8] sm:$0xf]  ;;  %v883_v33 = vor.u32 %v1031_v20, %v882_v17 }
  0x2c   : > { %628 = vmatpush.bf16.msra.mxu3 %v855_v60  ;;  %v1004_v24 = vld [vmem:[%s1162_s25 + $0x178] sm:$0xf0]  ;;  %v1016_v30 = vld [vmem:[%s1162_s25 + $0x14] sm:$0xf]  ;;  %v943_v34 = vor.u32 %v1044_v21, %v940_v22  ;;  %v946_v35 = vld [vmem:[%s1162_s25 + $0x100] sm:$0xf]  ;;  %v340_v42 = vpack.c.b16 %v337_v26, %v337_v26  ;;  %v339_v44 = vunpack.c.l.b16 %v286_v32  ;;  %v1237_v45 = vpack.c.b16 %v338_v29, %v338_v29 }
  0x2d   : > { %v828_v31 = vld [vmem:[%s1162_s25 + $0x18] sm:$0xf0]  ;;  %v1047_v36 = vld [vmem:[%s1162_s25 + $0x104] sm:$0xf0]  ;;  %v1007_v37 = vor.u32 %v1060_v23, %v1004_v24  ;;  %v1042_v38 = vld [vmem:[%s1162_s25 + $0xe4] sm:$0xf] }
  0x2e   : > { %591 = vmatpush.bf16.msra.mxu0 %v835_v61  ;;  %616 = vmatpush.bf16.msra.mxu2 %v971_v63  ;;  %v932_v39 = vld [vmem:[%s1162_s25 + $0xe8] sm:$0xf0]  ;;  %v1058_v40 = vld [vmem:[%s1162_s25 + $0x164] sm:$0xf]  ;;  %v831_v43 = vor.u32 %v1016_v30, %v828_v31  ;;  %v947_v46 = vor.u32 %v1047_v36, %v946_v35  ;;  %v1040_v51 = vld [vmem:[%s1162_s25 + $0xd4] sm:$0xf]  ;;  %v342_v55 = vpack.c.b16 %v339_v44, %v339_v44 }
  0x2f   : > { %604 = vmatpush.bf16.msra.mxu1 %v899_v2  ;;  %v996_v41 = vld [vmem:[%s1162_s25 + $0x168] sm:$0xf0]  ;;  %v1014_v47 = vld [vmem:[%s1162_s25 + $0x4] sm:$0xf]  ;;  %v935_v49 = vor.u32 %v1042_v38, %v932_v39  ;;  %v924_v52 = vld [vmem:[%s1162_s25 + $0xd8] sm:$0xf0] }
  0x30   : > { %629 = vmatpush.bf16.msra.mxu3 %v847_v10  ;;  %v820_v48 = vld [vmem:[%s1162_s25 + $0x8] sm:$0xf0]  ;;  %v999_v50 = vor.u32 %v1058_v40, %v996_v41  ;;  %v1056_v53 = vld [vmem:[%s1162_s25 + $0x154] sm:$0xf]  ;;  %v988_v54 = vld [vmem:[%s1162_s25 + $0x158] sm:$0xf0]  ;;  %v927_v57 = vor.u32 %v1040_v51, %v924_v52 }
  0x31   : > { %v823_v56 = vor.u32 %v1014_v47, %v820_v48  ;;  %v991_v58 = vor.u32 %v1056_v53, %v988_v54  ;;  %v1038_v59 = vld [vmem:[%s1162_s25 + $0xc4] sm:$0xf]  ;;  %v916_v60 = vld [vmem:[%s1162_s25 + $0xc8] sm:$0xf0]  ;;  %v1036_v1 = vld [vmem:[%s1162_s25 + $0xb4] sm:$0xf] }
  0x32   : > { %592 = vmatpush.bf16.msra.mxu0 %v827_v11  ;;  %617 = vmatpush.bf16.msra.mxu2 %v963_v12  ;;  %v1054_v61 = vld [vmem:[%s1162_s25 + $0x144] sm:$0xf]  ;;  %v980_v62 = vld [vmem:[%s1162_s25 + $0x148] sm:$0xf0]  ;;  %v919_v63 = vor.u32 %v1038_v59, %v916_v60  ;;  %v908_v2 = vld [vmem:[%s1162_s25 + $0xb8] sm:$0xf0] }
  0x33   : > { %605 = vmatpush.bf16.msra.mxu1 %v891_v16  ;;  %v983_v0 = vor.u32 %v1054_v61, %v980_v62  ;;  %v1052_v3 = vld [vmem:[%s1162_s25 + $0x134] sm:$0xf]  ;;  %v972_v4 = vld [vmem:[%s1162_s25 + $0x138] sm:$0xf0]  ;;  %v911_v5 = vor.u32 %v1036_v1, %v908_v2  ;;  %v1034_v7 = vld [vmem:[%s1162_s25 + $0xa4] sm:$0xf] }
  0x34   : > { %630 = vmatpush.bf16.msra.mxu3 %v839_v25  ;;  %v975_v6 = vor.u32 %v1052_v3, %v972_v4  ;;  %v900_v8 = vld [vmem:[%s1162_s25 + $0xa8] sm:$0xf0]  ;;  %v1050_v9 = vld [vmem:[%s1162_s25 + $0x124] sm:$0xf]  ;;  %v1032_v13 = vld [vmem:[%s1162_s25 + $0x94] sm:$0xf] }
  0x35   : > { %v964_v10 = vld [vmem:[%s1162_s25 + $0x128] sm:$0xf0]  ;;  %v903_v11 = vor.u32 %v1034_v7, %v900_v8  ;;  %v892_v14 = vld [vmem:[%s1162_s25 + $0x98] sm:$0xf0]  ;;  %v1048_v15 = vld [vmem:[%s1162_s25 + $0x114] sm:$0xf] }
  0x36   : > { %593 = vmatpush.bf16.msra.mxu0 %v819_v27  ;;  %618 = vmatpush.bf16.msra.mxu2 %v955_v28  ;;  %v967_v12 = vor.u32 %v1050_v9, %v964_v10  ;;  %v956_v16 = vld [vmem:[%s1162_s25 + $0x118] sm:$0xf0]  ;;  %v895_v17 = vor.u32 %v1032_v13, %v892_v14  ;;  %v1030_v19 = vld [vmem:[%s1162_s25 + $0x84] sm:$0xf]  ;;  %v884_v20 = vld [vmem:[%s1162_s25 + $0x88] sm:$0xf0] }
  0x37   : > { %606 = vmatpush.bf16.msra.mxu1 %v883_v33  ;;  %v959_v18 = vor.u32 %v1048_v15, %v956_v16  ;;  %v1046_v21 = vld [vmem:[%s1162_s25 + $0x104] sm:$0xf]  ;;  %v948_v22 = vld [vmem:[%s1162_s25 + $0x108] sm:$0xf0]  ;;  %v887_v23 = vor.u32 %v1030_v19, %v884_v20 }
  0x38   : > { %631 = vmatpush.bf16.msra.mxu3 %v831_v43  ;;  %v951_v24 = vor.u32 %v1046_v21, %v948_v22  ;;  %v283_v30 = vld [vmem:[#allocation2] sm:$0xff]  ;;  %v284_v40 = vld [vmem:[#allocation2 + $0x8] sm:$0xff] }
  0x39   : > { %594 = vmatmul.bf16.vlgmr.msra.gmra.mxu0 %v340_v42 }
  0x3a   : > { %638 = vmatpush.bf16.msrb.mxu0 %v943_v34  ;;  %607 = vmatmul.bf16.vlgmr.msra.gmra.mxu1 %v1237_v45 }
  0x3b   : > { %651 = vmatpush.bf16.msrb.mxu1 %v1007_v37  ;;  %619 = vmatpush.bf16.msra.mxu2 %v947_v46 }
  0x3c   : > { %632 = vmatpush.bf16.msra.mxu3 %v823_v56 }
  0x3e   : > { %639 = vmatpush.bf16.msrb.mxu0 %v935_v49  ;;  %620 = vmatmul.bf16.vlgmr.msra.gmra.mxu2 %v342_v55 }
  0x3f   : > { %652 = vmatpush.bf16.msrb.mxu1 %v999_v50  ;;  %633 = vmatmul.bf16.vlgmr.msra.gmra.mxu3 %v340_v42 }
  0x42   : > { %640 = vmatpush.bf16.msrb.mxu0 %v927_v57 }
  0x43   : > { %653 = vmatpush.bf16.msrb.mxu1 %v991_v58 }
  0x46   : > { %641 = vmatpush.bf16.msrb.mxu0 %v919_v63 }
  0x47   : > { %654 = vmatpush.bf16.msrb.mxu1 %v983_v0 }
  0x4a   : > { %642 = vmatpush.bf16.msrb.mxu0 %v911_v5 }
  0x4b   : > { %655 = vmatpush.bf16.msrb.mxu1 %v975_v6 }
  0x4e   : > { %643 = vmatpush.bf16.msrb.mxu0 %v903_v11 }
  0x4f   : > { %656 = vmatpush.bf16.msrb.mxu1 %v967_v12 }
  0x52   : > { %644 = vmatpush.bf16.msrb.mxu0 %v895_v17 }
  0x53   : > { %657 = vmatpush.bf16.msrb.mxu1 %v959_v18 }
  0x56   : > { %645 = vmatpush.bf16.msrb.mxu0 %v887_v23 }
  0x57   : > { %658 = vmatpush.bf16.msrb.mxu1 %v951_v24 }
  0x59   : > { %646 = vmatmul.bf16.vlgmr.msrb.gmra.mxu0 %v1237_v45 }
  0x5a   : > { %659 = vmatmul.bf16.vlgmr.msrb.gmra.mxu1 %v342_v55 }
  0xb6   : > { %v595_v25 = vpop.f32.mrf.mxu0 }
  0xb7   : > { %v608_v26 = vpop.f32.mrf.mxu1 }
  0xb8   : > { %v609_v27 = vadd.f32 %v608_v26, %v595_v25 }
  0xbe   : > { %v597_v28 = vpop.f32.mrf.mxu0 }
  0xbf   : > { %v610_v29 = vpop.f32.mrf.mxu1 }
  0xc1   : > { %v621_v31 = vpop.f32.mrf.mxu2 }
  0xc2   : > { %v622_v32 = vadd.f32 %v621_v31, %v609_v27  ;;  %v634_v34 = vpop.f32.mrf.mxu3 }
  0xc4   : > { %v664_v33 = vadd.f32 %v622_v32, %v283_v30 }
  0xc6   : > { %666 = vst [vmem:[#allocation2] sm:$0xff] %v664_v33 }
  0xc9   : > { %v623_v35 = vpop.f32.mrf.mxu2 }
  0xca   : > { %v636_v36 = vpop.f32.mrf.mxu3 }
  0xd6   : > { %v647_v37 = vpop.f32.mrf.mxu0 }
  0xd7   : > { %v648_v38 = vadd.f32 %v647_v37, %v634_v34  ;;  %v660_v39 = vpop.f32.mrf.mxu1 }
  0xd9   : > { %v661_v41 = vadd.f32 %v660_v39, %v648_v38 }
  0xdb   : > { %v665_v42 = vadd.f32 %v661_v41, %v284_v40  ;;  %671 = sbr.rel (%p1008_p7) target bundleno = 237 (0xed), region = 40 }
  0xdd   : > { %667 = vst [vmem:[#allocation2 + $0x8] sm:$0xff] %v665_v42 }
  0xde   : > { %v649_v43 = vpop.f32.mrf.mxu0 }
  0xdf   : > { %v662_v44 = vpop.f32.mrf.mxu1 }
  0xe0   : > { %v672_v45 = vld [vmem:[#allocation2] sm:$0xff] }
  0xe1   : > { %v674_v47 = vld [vmem:[%s1285_s2] sm:$0x3] }
  0xe2   : > { %v676_v48 = vperm.slane %v674_v47, 0  ;;  %v677_v49 = vperm.slane %v674_v47, 1 }
  0xe4   : > { %v673_v46 = vld [vmem:[#allocation2 + $0x8] sm:$0xff]  ;;  %v680_v50 = vadd.f32 %v676_v48, %v672_v45 }
  0xe5   : > { %v681_v51 = vadd.f32 %v677_v49, %v673_v46 }
  0xe6   : > { %vm682_vm0 = vcmp.ge.f32.partialorder %v680_v50, 0.0  ;;  %v684_v52 = vmul.f32 0.1, %v680_v50 }
  0xe7   : > { %vm683_vm1 = vcmp.ge.f32.partialorder %v681_v51, 0.0  ;;  %v685_v53 = vmul.f32 0.1, %v681_v51 }
  0xe8   : > { %v686_v54 = vsel %vm682_vm0, %v680_v50, %v684_v52 }
  0xe9   : > { %v687_v55 = vsel %vm683_vm1, %v681_v51, %v685_v53 }
  0xea   : > { %v688_v56 = vpack.c.bf16 %v687_v55, %v686_v54 }
  0xec   : > { %689 = vst [vmem:[%s1286_s3] sm:$0xff] %v688_v56 }
  0xed PF: > { %s13_s14 = sadd.s32 1, %s1109_s14   ;;  %s1287_s12 = smov %s1105_s13 }
  0xee   : > { %p10_p8 = scmp.ge.s32.totalorder %s13_s14, 5   ;;  %s1288_s13 = smov %s1290_s15 }
  0xf0   :  { %12 = sbr.rel (!%p10_p8) target bundleno = 2 (0x2), region = 76 }

// kernel: discriminator_forward.12
= control target key start
LH: loop header
LB: loop body
LE: loop exit
PB: predicated region body
PF: predicated region fallthrough
CT: control target
= control target key end

     0   :  { %s2085_s18 = smov 0   ;;  %s2087_s19 = smov 0   ;;  %s2452_s0 = inlined_call_operand.vmem [shape: bf16[8,2304], index: 0, kind: input, shape index: {}]   ;;  %s2453_s1 = inlined_call_operand.vmem [shape: bf16[8,128], index: 1, kind: input, shape index: {}]   ;;  %s2454_s2 = inlined_call_operand.vmem [shape: bf16[2304,256], index: 2, kind: input, shape index: {}]   ;;  %s2455_s3 = inlined_call_operand.vmem [shape: bf16[128,256], index: 3, kind: input, shape index: {}]   ;;  %s2456_s4 = inlined_call_operand.vmem [shape: f32[1,256], index: 4, kind: input, shape index: {}]   ;;  %s2457_s5 = inlined_call_operand.vmem [shape: bf16[8,256], index: 5, kind: output, shape index: {}]  }
   0x1   :  { %s2089_s20 = smov 0  }
   0x2 LB: > { %s27_s21 = sadd.s32 1, %s2049_s19  ;;  %p1436_p0 = scmp.ge.s32.totalorder %s2053_s20, 1  ;;  %s2053_s20 = sphi %s2089_s20, %s15_s20   ;;  %s2049_s19 = sphi %s2087_s19, %s2459_s19   ;;  %s2045_s18 = sphi %s2085_s18, %s2458_s18  }
   0x3   : > { %p28_p1 = scmp.ge.s32.totalorder %s27_s21, 3  ;;  %p264_p2 = scmp.lt.s32.totalorder %s2053_s20, 4 }
   0x5   : > { %s2461_s21 = smov (%p28_p1, %s27_s21), 0  ;;  %p265_p3 = pnand %p1436_p0, %p264_p2 }
   0x6   : > { %s323_s22 = smul.u32 (!%p265_p3), 6, %s2045_s18  ;;  %p1440_p6 = scmp.ne.s32.totalorder (!%p265_p3), %s2045_s18, 0 }
   0x7   : > { %268 = sbr.rel (%p265_p3) target bundleno = 443 (0x1bb), region = 40 }
   0x8   : > { %s337_s23 = smul.u32 (!%p265_p3), 96, %s2045_s18  ;;  %p326_p4 = scmp.lt.s32.totalorder (!%p265_p3), %s323_s22, 17 }
   0xa   : > { %p339_p5 = scmp.lt.s32.totalorder (!%p265_p3), %s337_s23, 287 }
   0xc   : > { %s2463_s22 = smov (!%p326_p4, %s323_s22), 17  ;;  %s2465_s23 = smov (!%p339_p5, %s337_s23), 287 }
   0xd   : > { %s1437_s24 = sshll.u32 %s2463_s22, 2  ;;  %s1894_s28 = sshll.u32 %s2465_s23, 3 }
   0xe   : > { %s2110_s27 = scalar_lea.vmem %s2452_s0, %s1437_s24  ;;  %s2115_s6 = scalar_lea.vmem %s2454_s2, %s1894_s28 }
   0xf   : > { %373 = sbr.rel (%p1440_p6) target bundleno = 189 (0xbd), region = 44 }
  0x14   : > { %v1499_v0 = vld [vmem:[%s2455_s3 + $0x70] sm:$0xf]  ;;  %v1910_v1 = vld [vmem:[%s2455_s3 + $0x74] sm:$0xf0]  ;;  %v1909_v2 = vld [vmem:[%s2455_s3 + $0x74] sm:$0xf] }
  0x15   : > { %v1500_v3 = vor.u32 %v1910_v1, %v1499_v0  ;;  %v1501_v4 = vld [vmem:[%s2455_s3 + $0x78] sm:$0xf0]  ;;  %v1491_v5 = vld [vmem:[%s2455_s3 + $0x60] sm:$0xf]  ;;  %v1908_v6 = vld [vmem:[%s2455_s3 + $0x64] sm:$0xf0] }
  0x16   : > { %v1504_v7 = vor.u32 %v1909_v2, %v1501_v4  ;;  %v1907_v8 = vld [vmem:[%s2455_s3 + $0x64] sm:$0xf]  ;;  %v1493_v9 = vld [vmem:[%s2455_s3 + $0x68] sm:$0xf0]  ;;  %v1492_v10 = vor.u32 %v1908_v6, %v1491_v5  ;;  %v1483_v12 = vld [vmem:[%s2455_s3 + $0x50] sm:$0xf] }
  0x17   : > { %471 = vmatpush.bf16.msra.mxu0 %v1500_v3  ;;  %v1496_v11 = vor.u32 %v1907_v8, %v1493_v9  ;;  %v1906_v13 = vld [vmem:[%s2455_s3 + $0x54] sm:$0xf0]  ;;  %v1905_v14 = vld [vmem:[%s2455_s3 + $0x54] sm:$0xf]  ;;  %v1485_v15 = vld [vmem:[%s2455_s3 + $0x58] sm:$0xf0] }
  0x18   : > { %484 = vmatpush.bf16.msra.mxu1 %v1504_v7  ;;  %v1484_v16 = vor.u32 %v1906_v13, %v1483_v12  ;;  %v1488_v17 = vor.u32 %v1905_v14, %v1485_v15  ;;  %v1475_v18 = vld [vmem:[%s2455_s3 + $0x40] sm:$0xf]  ;;  %v1904_v19 = vld [vmem:[%s2455_s3 + $0x44] sm:$0xf0]  ;;  %v1903_v20 = vld [vmem:[%s2455_s3 + $0x44] sm:$0xf] }
  0x19   : > { %v1477_v21 = vld [vmem:[%s2455_s3 + $0x48] sm:$0xf0]  ;;  %v1476_v22 = vor.u32 %v1904_v19, %v1475_v18  ;;  %v1467_v24 = vld [vmem:[%s2455_s3 + $0x30] sm:$0xf]  ;;  %v1902_v25 = vld [vmem:[%s2455_s3 + $0x34] sm:$0xf0] }
  0x1a   : > { %v1480_v23 = vor.u32 %v1903_v20, %v1477_v21  ;;  %v1901_v26 = vld [vmem:[%s2455_s3 + $0x34] sm:$0xf]  ;;  %v1469_v27 = vld [vmem:[%s2455_s3 + $0x38] sm:$0xf0]  ;;  %v1468_v28 = vor.u32 %v1902_v25, %v1467_v24  ;;  %v1459_v30 = vld [vmem:[%s2455_s3 + $0x20] sm:$0xf] }
  0x1b   : > { %472 = vmatpush.bf16.msra.mxu0 %v1492_v10  ;;  %v1472_v29 = vor.u32 %v1901_v26, %v1469_v27  ;;  %v1900_v31 = vld [vmem:[%s2455_s3 + $0x24] sm:$0xf0]  ;;  %v1899_v32 = vld [vmem:[%s2455_s3 + $0x24] sm:$0xf]  ;;  %v1461_v33 = vld [vmem:[%s2455_s3 + $0x28] sm:$0xf0] }
  0x1c   : > { %485 = vmatpush.bf16.msra.mxu1 %v1496_v11  ;;  %v1460_v34 = vor.u32 %v1900_v31, %v1459_v30  ;;  %v1464_v35 = vor.u32 %v1899_v32, %v1461_v33  ;;  %v1451_v36 = vld [vmem:[%s2455_s3 + $0x10] sm:$0xf]  ;;  %v1898_v37 = vld [vmem:[%s2455_s3 + $0x14] sm:$0xf0]  ;;  %v1897_v38 = vld [vmem:[%s2455_s3 + $0x14] sm:$0xf] }
  0x1d   : > { %v1453_v39 = vld [vmem:[%s2455_s3 + $0x18] sm:$0xf0]  ;;  %v1452_v40 = vor.u32 %v1898_v37, %v1451_v36  ;;  %v1443_v42 = vld [vmem:[%s2455_s3] sm:$0xf]  ;;  %v1896_v43 = vld [vmem:[%s2455_s3 + $0x4] sm:$0xf0] }
  0x1e   : > { %v1456_v41 = vor.u32 %v1897_v38, %v1453_v39  ;;  %v1895_v44 = vld [vmem:[%s2455_s3 + $0x4] sm:$0xf]  ;;  %v1445_v45 = vld [vmem:[%s2455_s3 + $0x8] sm:$0xf0]  ;;  %v1444_v46 = vor.u32 %v1896_v43, %v1443_v42  ;;  %v374_v48 = vld [vmem:[%s2453_s1] sm:$0xf] }
  0x1f   : > { %473 = vmatpush.bf16.msra.mxu0 %v1484_v16  ;;  %v1448_v47 = vor.u32 %v1895_v44, %v1445_v45 }
  0x20   : > { %486 = vmatpush.bf16.msra.mxu1 %v1488_v17 }
  0x23   : > { %474 = vmatpush.bf16.msra.mxu0 %v1476_v22 }
  0x24   : > { %487 = vmatpush.bf16.msra.mxu1 %v1480_v23 }
  0x27   : > { %475 = vmatpush.bf16.msra.mxu0 %v1468_v28 }
  0x28   : > { %488 = vmatpush.bf16.msra.mxu1 %v1472_v29 }
  0x2b   : > { %476 = vmatpush.bf16.msra.mxu0 %v1460_v34 }
  0x2c   : > { %489 = vmatpush.bf16.msra.mxu1 %v1464_v35 }
  0x2f   : > { %477 = vmatpush.bf16.msra.mxu0 %v1452_v40 }
  0x30   : > { %490 = vmatpush.bf16.msra.mxu1 %v1456_v41 }
  0x33   : > { %478 = vmatpush.bf16.msra.mxu0 %v1444_v46 }
  0x34   : > { %491 = vmatpush.bf16.msra.mxu1 %v1448_v47 }
  0x36   : > { %479 = vmatmul.bf16.vlgmr.msra.gmra.mxu0 %v374_v48 }
  0x37   : > { %492 = vmatmul.bf16.vlgmr.msra.gmra.mxu1 %v374_v48 }
  0xb3   : > { %v480_v49 = vpop.f32.mrf.mxu0 }
  0xb4   : > { %497 = vst [vmem:[#allocation2] sm:$0xff] %v480_v49  ;;  %v493_v50 = vpop.f32.mrf.mxu1 }
  0xb5   : > { %498 = vst [vmem:[#allocation2 + $0x8] sm:$0xff] %v493_v50 }
  0xbb   : > { %v482_v51 = vpop.f32.mrf.mxu0 }
  0xbc   : > { %v495_v52 = vpop.f32.mrf.mxu1 }
  0xbd PF: > { %v1563_v53 = vld [vmem:[%s2115_s6 + $0x70] sm:$0xf]  ;;  %v1926_v54 = vld [vmem:[%s2115_s6 + $0x74] sm:$0xf0]  ;;  %v1555_v0 = vld [vmem:[%s2115_s6 + $0x60] sm:$0xf] }
  0xbe   : > { %v1627_v55 = vld [vmem:[%s2115_s6 + $0xf0] sm:$0xf]  ;;  %v1564_v56 = vor.u32 %v1926_v54, %v1563_v53  ;;  %v1942_v57 = vld [vmem:[%s2115_s6 + $0xf4] sm:$0xf0]  ;;  %v1924_v2 = vld [vmem:[%s2115_s6 + $0x64] sm:$0xf0] }
  0xbf   : > { %v1691_v58 = vld [vmem:[%s2115_s6 + $0x170] sm:$0xf]  ;;  %v1958_v59 = vld [vmem:[%s2115_s6 + $0x174] sm:$0xf0]  ;;  %v1628_v60 = vor.u32 %v1942_v57, %v1627_v55  ;;  %v1619_v3 = vld [vmem:[%s2115_s6 + $0xe0] sm:$0xf]  ;;  %v1556_v5 = vor.u32 %v1924_v2, %v1555_v0 }
  0xc0   : > { %v1692_v61 = vor.u32 %v1958_v59, %v1691_v58  ;;  %v1755_v62 = vld [vmem:[%s2115_s6 + $0x1f0] sm:$0xf]  ;;  %v1974_v63 = vld [vmem:[%s2115_s6 + $0x1f4] sm:$0xf0]  ;;  %1101 = vmatpush.bf16.msra.mxu0 %v1564_v56  ;;  %v1940_v4 = vld [vmem:[%s2115_s6 + $0xe4] sm:$0xf0] }
  0xc1   : > { %v1756_v1 = vor.u32 %v1974_v63, %v1755_v62  ;;  %1114 = vmatpush.bf16.msra.mxu1 %v1628_v60  ;;  %v1620_v6 = vor.u32 %v1940_v4, %v1619_v3  ;;  %v1683_v7 = vld [vmem:[%s2115_s6 + $0x160] sm:$0xf]  ;;  %v1956_v8 = vld [vmem:[%s2115_s6 + $0x164] sm:$0xf0]  ;;  %v1547_v12 = vld [vmem:[%s2115_s6 + $0x50] sm:$0xf] }
  0xc2   : > { %1127 = vmatpush.bf16.msra.mxu2 %v1692_v61  ;;  %v1747_v9 = vld [vmem:[%s2115_s6 + $0x1e0] sm:$0xf]  ;;  %v1684_v10 = vor.u32 %v1956_v8, %v1683_v7  ;;  %v1972_v11 = vld [vmem:[%s2115_s6 + $0x1e4] sm:$0xf0]  ;;  %v1922_v13 = vld [vmem:[%s2115_s6 + $0x54] sm:$0xf0] }
  0xc3   : > { %1140 = vmatpush.bf16.msra.mxu3 %v1756_v1  ;;  %v1748_v14 = vor.u32 %v1972_v11, %v1747_v9  ;;  %v1611_v15 = vld [vmem:[%s2115_s6 + $0xd0] sm:$0xf]  ;;  %v1938_v16 = vld [vmem:[%s2115_s6 + $0xd4] sm:$0xf0]  ;;  %v1548_v18 = vor.u32 %v1922_v13, %v1547_v12  ;;  %v1539_v24 = vld [vmem:[%s2115_s6 + $0x40] sm:$0xf] }
  0xc4   : > { %v1675_v17 = vld [vmem:[%s2115_s6 + $0x150] sm:$0xf]  ;;  %1102 = vmatpush.bf16.msra.mxu0 %v1556_v5  ;;  %v1954_v19 = vld [vmem:[%s2115_s6 + $0x154] sm:$0xf0]  ;;  %v1612_v22 = vor.u32 %v1938_v16, %v1611_v15  ;;  %v1920_v25 = vld [vmem:[%s2115_s6 + $0x44] sm:$0xf0] }
  0xc5   : > { %v1739_v20 = vld [vmem:[%s2115_s6 + $0x1d0] sm:$0xf]  ;;  %v1970_v21 = vld [vmem:[%s2115_s6 + $0x1d4] sm:$0xf0]  ;;  %1115 = vmatpush.bf16.msra.mxu1 %v1620_v6  ;;  %v1676_v23 = vor.u32 %v1954_v19, %v1675_v17  ;;  %v1603_v26 = vld [vmem:[%s2115_s6 + $0xc0] sm:$0xf]  ;;  %v1540_v33 = vor.u32 %v1920_v25, %v1539_v24 }
  0xc6   : > { %1128 = vmatpush.bf16.msra.mxu2 %v1684_v10  ;;  %v1740_v27 = vor.u32 %v1970_v21, %v1739_v20  ;;  %v1936_v28 = vld [vmem:[%s2115_s6 + $0xc4] sm:$0xf0]  ;;  %v1667_v29 = vld [vmem:[%s2115_s6 + $0x140] sm:$0xf]  ;;  %v1531_v36 = vld [vmem:[%s2115_s6 + $0x30] sm:$0xf] }
  0xc7   : > { %1141 = vmatpush.bf16.msra.mxu3 %v1748_v14  ;;  %v1952_v30 = vld [vmem:[%s2115_s6 + $0x144] sm:$0xf0]  ;;  %v1731_v31 = vld [vmem:[%s2115_s6 + $0x1c0] sm:$0xf]  ;;  %v1604_v34 = vor.u32 %v1936_v28, %v1603_v26  ;;  %v1918_v37 = vld [vmem:[%s2115_s6 + $0x34] sm:$0xf0] }
  0xc8   : > { %v1968_v32 = vld [vmem:[%s2115_s6 + $0x1c4] sm:$0xf0]  ;;  %1103 = vmatpush.bf16.msra.mxu0 %v1548_v18  ;;  %v1668_v35 = vor.u32 %v1952_v30, %v1667_v29  ;;  %v1595_v38 = vld [vmem:[%s2115_s6 + $0xb0] sm:$0xf]  ;;  %v1934_v40 = vld [vmem:[%s2115_s6 + $0xb4] sm:$0xf0]  ;;  %v1532_v45 = vor.u32 %v1918_v37, %v1531_v36 }
  0xc9   : > { %1116 = vmatpush.bf16.msra.mxu1 %v1612_v22  ;;  %v1732_v39 = vor.u32 %v1968_v32, %v1731_v31  ;;  %v1659_v41 = vld [vmem:[%s2115_s6 + $0x130] sm:$0xf]  ;;  %v1950_v42 = vld [vmem:[%s2115_s6 + $0x134] sm:$0xf0]  ;;  %v1596_v46 = vor.u32 %v1934_v40, %v1595_v38  ;;  %v1523_v48 = vld [vmem:[%s2115_s6 + $0x20] sm:$0xf] }
  0xca   : > { %1129 = vmatpush.bf16.msra.mxu2 %v1676_v23  ;;  %v1723_v43 = vld [vmem:[%s2115_s6 + $0x1b0] sm:$0xf]  ;;  %v1966_v44 = vld [vmem:[%s2115_s6 + $0x1b4] sm:$0xf0]  ;;  %v1660_v47 = vor.u32 %v1950_v42, %v1659_v41  ;;  %v1916_v49 = vld [vmem:[%s2115_s6 + $0x24] sm:$0xf0] }
  0xcb   : > { %1142 = vmatpush.bf16.msra.mxu3 %v1740_v27  ;;  %v1587_v50 = vld [vmem:[%s2115_s6 + $0xa0] sm:$0xf]  ;;  %v1724_v51 = vor.u32 %v1966_v44, %v1723_v43  ;;  %v1932_v52 = vld [vmem:[%s2115_s6 + $0xa4] sm:$0xf0]  ;;  %v1524_v57 = vor.u32 %v1916_v49, %v1523_v48  ;;  %v1515_v60 = vld [vmem:[%s2115_s6 + $0x10] sm:$0xf] }
  0xcc   : > { %1104 = vmatpush.bf16.msra.mxu0 %v1540_v33  ;;  %v1651_v53 = vld [vmem:[%s2115_s6 + $0x120] sm:$0xf]  ;;  %v1948_v54 = vld [vmem:[%s2115_s6 + $0x124] sm:$0xf0]  ;;  %v1588_v58 = vor.u32 %v1932_v52, %v1587_v50  ;;  %v1914_v61 = vld [vmem:[%s2115_s6 + $0x14] sm:$0xf0] }
  0xcd   : > { %1117 = vmatpush.bf16.msra.mxu1 %v1604_v34  ;;  %v1715_v55 = vld [vmem:[%s2115_s6 + $0x1a0] sm:$0xf]  ;;  %v1964_v56 = vld [vmem:[%s2115_s6 + $0x1a4] sm:$0xf0]  ;;  %v1652_v59 = vor.u32 %v1948_v54, %v1651_v53  ;;  %v1579_v62 = vld [vmem:[%s2115_s6 + $0x90] sm:$0xf]  ;;  %v1516_v5 = vor.u32 %v1914_v61, %v1515_v60 }
  0xce   : > { %1130 = vmatpush.bf16.msra.mxu2 %v1668_v35  ;;  %v1716_v63 = vor.u32 %v1964_v56, %v1715_v55  ;;  %v1930_v0 = vld [vmem:[%s2115_s6 + $0x94] sm:$0xf0]  ;;  %v1643_v1 = vld [vmem:[%s2115_s6 + $0x110] sm:$0xf]  ;;  %v1507_v6 = vld [vmem:[%s2115_s6] sm:$0xf] }
  0xcf   : > { %1143 = vmatpush.bf16.msra.mxu3 %v1732_v39  ;;  %v1946_v2 = vld [vmem:[%s2115_s6 + $0x114] sm:$0xf0]  ;;  %v1707_v3 = vld [vmem:[%s2115_s6 + $0x190] sm:$0xf]  ;;  %v1912_v7 = vld [vmem:[%s2115_s6 + $0x4] sm:$0xf0]  ;;  %v1580_v8 = vor.u32 %v1930_v0, %v1579_v62 }
  0xd0   : > { %1105 = vmatpush.bf16.msra.mxu0 %v1532_v45  ;;  %v1962_v4 = vld [vmem:[%s2115_s6 + $0x194] sm:$0xf0]  ;;  %v1644_v9 = vor.u32 %v1946_v2, %v1643_v1  ;;  %v1571_v10 = vld [vmem:[%s2115_s6 + $0x80] sm:$0xf]  ;;  %v1928_v11 = vld [vmem:[%s2115_s6 + $0x84] sm:$0xf0]  ;;  %v1508_v20 = vor.u32 %v1912_v7, %v1507_v6 }
  0xd1   : > { %1118 = vmatpush.bf16.msra.mxu1 %v1596_v46  ;;  %v1635_v12 = vld [vmem:[%s2115_s6 + $0x100] sm:$0xf]  ;;  %v1708_v13 = vor.u32 %v1962_v4, %v1707_v3  ;;  %v1944_v14 = vld [vmem:[%s2115_s6 + $0x104] sm:$0xf0]  ;;  %v1819_v17 = vld [vmem:[%s2115_s6 + $0x270] sm:$0xf]  ;;  %v1572_v24 = vor.u32 %v1928_v11, %v1571_v10 }
  0xd2   : > { %1131 = vmatpush.bf16.msra.mxu2 %v1660_v47  ;;  %v1699_v15 = vld [vmem:[%s2115_s6 + $0x180] sm:$0xf]  ;;  %v1960_v16 = vld [vmem:[%s2115_s6 + $0x184] sm:$0xf0]  ;;  %v1990_v18 = vld [vmem:[%s2115_s6 + $0x274] sm:$0xf0]  ;;  %v1636_v25 = vor.u32 %v1944_v14, %v1635_v12 }
  0xd3   : > { %1144 = vmatpush.bf16.msra.mxu3 %v1724_v51  ;;  %v1883_v19 = vld [vmem:[%s2115_s6 + $0x2f0] sm:$0xf]  ;;  %v2006_v21 = vld [vmem:[%s2115_s6 + $0x2f4] sm:$0xf0]  ;;  %v1925_v22 = vld [vmem:[%s2115_s6 + $0x74] sm:$0xf]  ;;  %v1700_v28 = vor.u32 %v1960_v16, %v1699_v15  ;;  %v1820_v29 = vor.u32 %v1990_v18, %v1819_v17 }
  0xd4   : > { %1106 = vmatpush.bf16.msra.mxu0 %v1524_v57  ;;  %v1565_v23 = vld [vmem:[%s2115_s6 + $0x78] sm:$0xf0]  ;;  %v1941_v26 = vld [vmem:[%s2115_s6 + $0xf4] sm:$0xf]  ;;  %v1884_v30 = vor.u32 %v2006_v21, %v1883_v19  ;;  %v1811_v32 = vld [vmem:[%s2115_s6 + $0x260] sm:$0xf] }
  0xd5   : > { %1119 = vmatpush.bf16.msra.mxu1 %v1588_v58  ;;  %v1629_v27 = vld [vmem:[%s2115_s6 + $0xf8] sm:$0xf0]  ;;  %v1568_v31 = vor.u32 %v1925_v22, %v1565_v23  ;;  %v1988_v33 = vld [vmem:[%s2115_s6 + $0x264] sm:$0xf0]  ;;  %v1875_v34 = vld [vmem:[%s2115_s6 + $0x2e0] sm:$0xf] }
  0xd6   : > { %1132 = vmatpush.bf16.msra.mxu2 %v1652_v59  ;;  %v1632_v35 = vor.u32 %v1941_v26, %v1629_v27  ;;  %v2004_v36 = vld [vmem:[%s2115_s6 + $0x2e4] sm:$0xf0]  ;;  %v1923_v37 = vld [vmem:[%s2115_s6 + $0x64] sm:$0xf]  ;;  %v1557_v38 = vld [vmem:[%s2115_s6 + $0x68] sm:$0xf0]  ;;  %v1812_v41 = vor.u32 %v1988_v33, %v1811_v32 }
  0xd7   : > { %1145 = vmatpush.bf16.msra.mxu3 %v1716_v63  ;;  %v1939_v39 = vld [vmem:[%s2115_s6 + $0xe4] sm:$0xf]  ;;  %v1621_v40 = vld [vmem:[%s2115_s6 + $0xe8] sm:$0xf0]  ;;  %v1803_v42 = vld [vmem:[%s2115_s6 + $0x250] sm:$0xf]  ;;  %v1876_v44 = vor.u32 %v2004_v36, %v1875_v34  ;;  %v1560_v45 = vor.u32 %v1923_v37, %v1557_v38 }
  0xd8   : > { %1107 = vmatpush.bf16.msra.mxu0 %v1516_v5  ;;  %v1986_v43 = vld [vmem:[%s2115_s6 + $0x254] sm:$0xf0]  ;;  %v1867_v46 = vld [vmem:[%s2115_s6 + $0x2d0] sm:$0xf]  ;;  %v501_v48 = vld [vmem:[%s2110_s27] sm:$0xff]  ;;  %v1624_v49 = vor.u32 %v1939_v39, %v1621_v40  ;;  %p1889_p7 = scmp.ne.s32.totalorder %s2045_s18, 2 }
  0xd9   : > { %1120 = vmatpush.bf16.msra.mxu1 %v1580_v8  ;;  %v2002_v47 = vld [vmem:[%s2115_s6 + $0x2d4] sm:$0xf0]  ;;  %v1921_v50 = vld [vmem:[%s2115_s6 + $0x54] sm:$0xf]  ;;  %v1549_v51 = vld [vmem:[%s2115_s6 + $0x58] sm:$0xf0]  ;;  %v603_v52 = vunpack.c.l.b16 %v501_v48  ;;  %v604_v54 = vunpack.c.h.b16 %v501_v48  ;;  %v1804_v59 = vor.u32 %v1986_v43, %v1803_v42 }
  0xda   : > { %1133 = vmatpush.bf16.msra.mxu2 %v1644_v9  ;;  %v502_v53 = vld [vmem:[%s2110_s27 + $0x8] sm:$0xff]  ;;  %v1937_v55 = vld [vmem:[%s2115_s6 + $0xd4] sm:$0xf]  ;;  %v1613_v56 = vld [vmem:[%s2115_s6 + $0xd8] sm:$0xf0]  ;;  %v1868_v60 = vor.u32 %v2002_v47, %v1867_v46  ;;  %v1552_v63 = vor.u32 %v1921_v50, %v1549_v51 }
  0xdb   : > { %1146 = vmatpush.bf16.msra.mxu3 %v1708_v13  ;;  %v605_v57 = vunpack.c.l.b16 %v502_v53  ;;  %v606_v58 = vunpack.c.h.b16 %v502_v53  ;;  %v2307_v61 = vpack.c.b16 %v603_v52, %v603_v52  ;;  %v2309_v62 = vpack.c.b16 %v604_v54, %v604_v54  ;;  %v1795_v0 = vld [vmem:[%s2115_s6 + $0x240] sm:$0xf]  ;;  %v1984_v1 = vld [vmem:[%s2115_s6 + $0x244] sm:$0xf0]  ;;  %v1919_v7 = vld [vmem:[%s2115_s6 + $0x44] sm:$0xf] }
  0xdc   : > { %1108 = vmatpush.bf16.msra.mxu0 %v1508_v20  ;;  %v1859_v2 = vld [vmem:[%s2115_s6 + $0x2c0] sm:$0xf]  ;;  %v1616_v5 = vor.u32 %v1937_v55, %v1613_v56  ;;  %v2000_v6 = vld [vmem:[%s2115_s6 + $0x2c4] sm:$0xf0]  ;;  %v1541_v8 = vld [vmem:[%s2115_s6 + $0x48] sm:$0xf0]  ;;  %v1796_v11 = vor.u32 %v1984_v1, %v1795_v0 }
  0xdd   : > { %1121 = vmatpush.bf16.msra.mxu1 %v1572_v24  ;;  %v2314_v3 = vpack.c.b16 %v605_v57, %v605_v57  ;;  %v2316_v4 = vpack.c.b16 %v606_v58, %v606_v58  ;;  %v1935_v9 = vld [vmem:[%s2115_s6 + $0xc4] sm:$0xf]  ;;  %v1605_v10 = vld [vmem:[%s2115_s6 + $0xc8] sm:$0xf0]  ;;  %v1860_v12 = vor.u32 %v2000_v6, %v1859_v2  ;;  %v1544_v13 = vor.u32 %v1919_v7, %v1541_v8  ;;  %v1787_v14 = vld [vmem:[%s2115_s6 + $0x230] sm:$0xf] }
  0xde   : > { %1134 = vmatpush.bf16.msra.mxu2 %v1636_v25  ;;  %v1982_v15 = vld [vmem:[%s2115_s6 + $0x234] sm:$0xf0]  ;;  %v1851_v16 = vld [vmem:[%s2115_s6 + $0x2b0] sm:$0xf]  ;;  %v1608_v17 = vor.u32 %v1935_v9, %v1605_v10  ;;  %v1917_v19 = vld [vmem:[%s2115_s6 + $0x34] sm:$0xf] }
  0xdf   : > { %1147 = vmatpush.bf16.msra.mxu3 %v1700_v28  ;;  %1109 = vmatmul.bf16.vlgmr.msra.gmra.mxu0 %v2307_v61  ;;  %v1998_v18 = vld [vmem:[%s2115_s6 + $0x2b4] sm:$0xf0]  ;;  %v1533_v20 = vld [vmem:[%s2115_s6 + $0x38] sm:$0xf0]  ;;  %v1933_v21 = vld [vmem:[%s2115_s6 + $0xb4] sm:$0xf]  ;;  %v1788_v23 = vor.u32 %v1982_v15, %v1787_v14 }
  0xe0   : > { %1153 = vmatpush.bf16.msrb.mxu0 %v1820_v29  ;;  %1122 = vmatmul.bf16.vlgmr.msra.gmra.mxu1 %v2309_v62  ;;  %v1597_v22 = vld [vmem:[%s2115_s6 + $0xb8] sm:$0xf0]  ;;  %v1852_v24 = vor.u32 %v1998_v18, %v1851_v16  ;;  %v1536_v25 = vor.u32 %v1917_v19, %v1533_v20  ;;  %v1779_v26 = vld [vmem:[%s2115_s6 + $0x220] sm:$0xf]  ;;  %v1980_v27 = vld [vmem:[%s2115_s6 + $0x224] sm:$0xf0] }
  0xe1   : > { %1166 = vmatpush.bf16.msrb.mxu1 %v1884_v30  ;;  %1135 = vmatmul.bf16.vlgmr.msra.gmra.mxu2 %v2314_v3  ;;  %v1843_v28 = vld [vmem:[%s2115_s6 + $0x2a0] sm:$0xf]  ;;  %v1600_v29 = vor.u32 %v1933_v21, %v1597_v22  ;;  %v1996_v30 = vld [vmem:[%s2115_s6 + $0x2a4] sm:$0xf0]  ;;  %v1525_v32 = vld [vmem:[%s2115_s6 + $0x28] sm:$0xf0] }
  0xe2   : > { %1179 = vmatpush.bf16.msrb.mxu2 %v1568_v31  ;;  %1148 = vmatmul.bf16.vlgmr.msra.gmra.mxu3 %v2316_v4  ;;  %v1915_v31 = vld [vmem:[%s2115_s6 + $0x24] sm:$0xf]  ;;  %v1589_v34 = vld [vmem:[%s2115_s6 + $0xa8] sm:$0xf0]  ;;  %v1844_v36 = vor.u32 %v1996_v30, %v1843_v28  ;;  %v1771_v38 = vld [vmem:[%s2115_s6 + $0x210] sm:$0xf] }
  0xe3   : > { %1192 = vmatpush.bf16.msrb.mxu3 %v1632_v35  ;;  %v1931_v33 = vld [vmem:[%s2115_s6 + $0xa4] sm:$0xf]  ;;  %v1780_v35 = vor.u32 %v1980_v27, %v1779_v26  ;;  %v1528_v37 = vor.u32 %v1915_v31, %v1525_v32  ;;  %v1978_v39 = vld [vmem:[%s2115_s6 + $0x214] sm:$0xf0]  ;;  %v1835_v40 = vld [vmem:[%s2115_s6 + $0x290] sm:$0xf] }
  0xe4   : > { %1154 = vmatpush.bf16.msrb.mxu0 %v1812_v41  ;;  %v1592_v41 = vor.u32 %v1931_v33, %v1589_v34  ;;  %v1994_v42 = vld [vmem:[%s2115_s6 + $0x294] sm:$0xf0]  ;;  %v1913_v43 = vld [vmem:[%s2115_s6 + $0x14] sm:$0xf]  ;;  %v1581_v46 = vld [vmem:[%s2115_s6 + $0x98] sm:$0xf0]  ;;  %v1772_v47 = vor.u32 %v1978_v39, %v1771_v38 }
  0xe5   : > { %1167 = vmatpush.bf16.msrb.mxu1 %v1876_v44  ;;  %v1517_v44 = vld [vmem:[%s2115_s6 + $0x18] sm:$0xf0]  ;;  %v1763_v48 = vld [vmem:[%s2115_s6 + $0x200] sm:$0xf]  ;;  %v1836_v51 = vor.u32 %v1994_v42, %v1835_v40  ;;  %v1992_v53 = vld [vmem:[%s2115_s6 + $0x284] sm:$0xf0] }
  0xe6   : > { %1180 = vmatpush.bf16.msrb.mxu2 %v1560_v45  ;;  %v1929_v45 = vld [vmem:[%s2115_s6 + $0x94] sm:$0xf]  ;;  %v1827_v50 = vld [vmem:[%s2115_s6 + $0x280] sm:$0xf]  ;;  %v1520_v52 = vor.u32 %v1913_v43, %v1517_v44  ;;  %v1911_v54 = vld [vmem:[%s2115_s6 + $0x4] sm:$0xf] }
  0xe7   : > { %1193 = vmatpush.bf16.msrb.mxu3 %v1624_v49  ;;  %v1976_v49 = vld [vmem:[%s2115_s6 + $0x204] sm:$0xf0]  ;;  %v503_v55 = vld [vmem:[%s2110_s27 + $0x10] sm:$0xff]  ;;  %v1584_v56 = vor.u32 %v1929_v45, %v1581_v46  ;;  %v1509_v57 = vld [vmem:[%s2115_s6 + $0x8] sm:$0xf0]  ;;  %v1828_v8 = vor.u32 %v1992_v53, %v1827_v50 }
  0xe8   : > { %1155 = vmatpush.bf16.msrb.mxu0 %v1804_v59  ;;  %v1927_v58 = vld [vmem:[%s2115_s6 + $0x84] sm:$0xf]  ;;  %v1573_v59 = vld [vmem:[%s2115_s6 + $0x88] sm:$0xf0]  ;;  %v1973_v0 = vld [vmem:[%s2115_s6 + $0x1f4] sm:$0xf]  ;;  %v1764_v1 = vor.u32 %v1976_v49, %v1763_v48  ;;  %v607_v7 = vunpack.c.l.b16 %v503_v55  ;;  %v1512_v9 = vor.u32 %v1911_v54, %v1509_v57  ;;  %v608_v14 = vunpack.c.h.b16 %v503_v55 }
  0xe9   : > { %1168 = vmatpush.bf16.msrb.mxu1 %v1868_v60  ;;  %v1957_v60 = vld [vmem:[%s2115_s6 + $0x174] sm:$0xf]  ;;  %v1757_v2 = vld [vmem:[%s2115_s6 + $0x1f8] sm:$0xf0]  ;;  %v1685_v18 = vld [vmem:[%s2115_s6 + $0x168] sm:$0xf0] }
  0xea   : > { %1181 = vmatpush.bf16.msrb.mxu2 %v1552_v63  ;;  %v1693_v63 = vld [vmem:[%s2115_s6 + $0x178] sm:$0xf0]  ;;  %v2005_v10 = vld [vmem:[%s2115_s6 + $0x2f4] sm:$0xf]  ;;  %v1760_v15 = vor.u32 %v1973_v0, %v1757_v2  ;;  %v1971_v19 = vld [vmem:[%s2115_s6 + $0x1e4] sm:$0xf]  ;;  %v2378_v28 = vpack.c.b16 %v608_v14, %v608_v14 }
  0xeb   : > { %1194 = vmatpush.bf16.msrb.mxu3 %v1616_v5  ;;  %v1989_v5 = vld [vmem:[%s2115_s6 + $0x274] sm:$0xf]  ;;  %v1821_v6 = vld [vmem:[%s2115_s6 + $0x278] sm:$0xf0]  ;;  %v1749_v21 = vld [vmem:[%s2115_s6 + $0x1e8] sm:$0xf0] }
  0xec   : > { %1156 = vmatpush.bf16.msrb.mxu0 %v1796_v11  ;;  %v1885_v11 = vld [vmem:[%s2115_s6 + $0x2f8] sm:$0xf0]  ;;  %v1824_v16 = vor.u32 %v1989_v5, %v1821_v6  ;;  %v1987_v22 = vld [vmem:[%s2115_s6 + $0x264] sm:$0xf]  ;;  %v1877_v26 = vld [vmem:[%s2115_s6 + $0x2e8] sm:$0xf0] }
  0xed   : > { %1169 = vmatpush.bf16.msrb.mxu1 %v1860_v12  ;;  %v1576_v12 = vor.u32 %v1927_v58, %v1573_v59  ;;  %v1888_v20 = vor.u32 %v2005_v10, %v1885_v11  ;;  %v1953_v31 = vld [vmem:[%s2115_s6 + $0x154] sm:$0xf]  ;;  %v1677_v32 = vld [vmem:[%s2115_s6 + $0x158] sm:$0xf0]  ;;  %v1951_v43 = vld [vmem:[%s2115_s6 + $0x144] sm:$0xf] }
  0xee   : > { %1182 = vmatpush.bf16.msrb.mxu2 %v1544_v13  ;;  %v1696_v13 = vor.u32 %v1957_v60, %v1693_v63  ;;  %v1969_v33 = vld [vmem:[%s2115_s6 + $0x1d4] sm:$0xf]  ;;  %v1869_v39 = vld [vmem:[%s2115_s6 + $0x2d8] sm:$0xf0]  ;;  %v1680_v40 = vor.u32 %v1953_v31, %v1677_v32  ;;  %v1967_v44 = vld [vmem:[%s2115_s6 + $0x1c4] sm:$0xf] }
  0xef   : > { %1195 = vmatpush.bf16.msrb.mxu3 %v1608_v17  ;;  %v1955_v17 = vld [vmem:[%s2115_s6 + $0x164] sm:$0xf]  ;;  %v2001_v38 = vld [vmem:[%s2115_s6 + $0x2d4] sm:$0xf]  ;;  %v1733_v45 = vld [vmem:[%s2115_s6 + $0x1c8] sm:$0xf0] }
  0xf0   : > { %1157 = vmatpush.bf16.msrb.mxu0 %v1788_v23  ;;  %v1813_v23 = vld [vmem:[%s2115_s6 + $0x268] sm:$0xf0]  ;;  %v1688_v27 = vor.u32 %v1955_v17, %v1685_v18  ;;  %v1983_v46 = vld [vmem:[%s2115_s6 + $0x244] sm:$0xf]  ;;  %v1949_v53 = vld [vmem:[%s2115_s6 + $0x134] sm:$0xf] }
  0xf1   : > { %1170 = vmatpush.bf16.msrb.mxu1 %v1852_v24  ;;  %v2374_v24 = vpack.c.b16 %v607_v7, %v607_v7  ;;  %v1816_v30 = vor.u32 %v1987_v22, %v1813_v23  ;;  %v1999_v48 = vld [vmem:[%s2115_s6 + $0x2c4] sm:$0xf]  ;;  %v1861_v49 = vld [vmem:[%s2115_s6 + $0x2c8] sm:$0xf0]  ;;  %v1661_v54 = vld [vmem:[%s2115_s6 + $0x138] sm:$0xf0] }
  0xf2   : > { %1183 = vmatpush.bf16.msrb.mxu2 %v1536_v25  ;;  %v2003_v25 = vld [vmem:[%s2115_s6 + $0x2e4] sm:$0xf]  ;;  %v1965_v55 = vld [vmem:[%s2115_s6 + $0x1b4] sm:$0xf]  ;;  %v1725_v57 = vld [vmem:[%s2115_s6 + $0x1b8] sm:$0xf0]  ;;  %v1664_v0 = vor.u32 %v1949_v53, %v1661_v54 }
  0xf3   : > { %1196 = vmatpush.bf16.msrb.mxu3 %v1600_v29  ;;  %v1752_v29 = vor.u32 %v1971_v19, %v1749_v21  ;;  %v1880_v34 = vor.u32 %v2003_v25, %v1877_v26  ;;  %v1981_v58 = vld [vmem:[%s2115_s6 + $0x234] sm:$0xf]  ;;  %v1789_v59 = vld [vmem:[%s2115_s6 + $0x238] sm:$0xf0]  ;;  %v1947_v5 = vld [vmem:[%s2115_s6 + $0x124] sm:$0xf] }
  0xf4   : > { %1158 = vmatpush.bf16.msrb.mxu0 %v1780_v35  ;;  %v1741_v35 = vld [vmem:[%s2115_s6 + $0x1d8] sm:$0xf0]  ;;  %v1997_v60 = vld [vmem:[%s2115_s6 + $0x2b4] sm:$0xf]  ;;  %v1792_v2 = vor.u32 %v1981_v58, %v1789_v59  ;;  %v1653_v6 = vld [vmem:[%s2115_s6 + $0x128] sm:$0xf0] }
  0xf5   : > { %1171 = vmatpush.bf16.msrb.mxu1 %v1844_v36  ;;  %v1985_v36 = vld [vmem:[%s2115_s6 + $0x254] sm:$0xf]  ;;  %v1853_v63 = vld [vmem:[%s2115_s6 + $0x2b8] sm:$0xf0]  ;;  %v1963_v7 = vld [vmem:[%s2115_s6 + $0x1a4] sm:$0xf]  ;;  %v1656_v14 = vor.u32 %v1947_v5, %v1653_v6 }
  0xf6   : > { %1184 = vmatpush.bf16.msrb.mxu2 %v1528_v37  ;;  %v1805_v37 = vld [vmem:[%s2115_s6 + $0x258] sm:$0xf0]  ;;  %v1979_v10 = vld [vmem:[%s2115_s6 + $0x224] sm:$0xf]  ;;  %v1781_v11 = vld [vmem:[%s2115_s6 + $0x228] sm:$0xf0] }
  0xf7   : > { %1197 = vmatpush.bf16.msrb.mxu3 %v1592_v41  ;;  %v1744_v41 = vor.u32 %v1969_v33, %v1741_v35  ;;  %v1808_v42 = vor.u32 %v1985_v36, %v1805_v37  ;;  %v1945_v17 = vld [vmem:[%s2115_s6 + $0x114] sm:$0xf]  ;;  %v1645_v18 = vld [vmem:[%s2115_s6 + $0x118] sm:$0xf0]  ;;  %v1943_v31 = vld [vmem:[%s2115_s6 + $0x104] sm:$0xf] }
  0xf8   : > { %1159 = vmatpush.bf16.msrb.mxu0 %v1772_v47  ;;  %v1797_v47 = vld [vmem:[%s2115_s6 + $0x248] sm:$0xf0]  ;;  %v1961_v19 = vld [vmem:[%s2115_s6 + $0x194] sm:$0xf]  ;;  %v1709_v21 = vld [vmem:[%s2115_s6 + $0x198] sm:$0xf0] }
  0xf9   : > { %1172 = vmatpush.bf16.msrb.mxu1 %v1836_v51  ;;  %v1736_v51 = vor.u32 %v1967_v44, %v1733_v45  ;;  %v1977_v22 = vld [vmem:[%s2115_s6 + $0x214] sm:$0xf]  ;;  %v1773_v23 = vld [vmem:[%s2115_s6 + $0x218] sm:$0xf0]  ;;  %v1637_v32 = vld [vmem:[%s2115_s6 + $0x108] sm:$0xf0] }
  0xfa   : > { %1185 = vmatpush.bf16.msrb.mxu2 %v1520_v52  ;;  %v1800_v52 = vor.u32 %v1983_v46, %v1797_v47  ;;  %v1993_v25 = vld [vmem:[%s2115_s6 + $0x294] sm:$0xf]  ;;  %v1837_v26 = vld [vmem:[%s2115_s6 + $0x298] sm:$0xf0]  ;;  %v1959_v33 = vld [vmem:[%s2115_s6 + $0x184] sm:$0xf] }
  0xfb   : > { %1198 = vmatpush.bf16.msrb.mxu3 %v1584_v56  ;;  %v1864_v56 = vor.u32 %v1999_v48, %v1861_v49  ;;  %v1701_v35 = vld [vmem:[%s2115_s6 + $0x188] sm:$0xf0]  ;;  %v1975_v36 = vld [vmem:[%s2115_s6 + $0x204] sm:$0xf] }
  0xfc   : > { %1160 = vmatpush.bf16.msrb.mxu0 %v1764_v1  ;;  %v1728_v1 = vor.u32 %v1965_v55, %v1725_v57  ;;  %v1765_v37 = vld [vmem:[%s2115_s6 + $0x208] sm:$0xf0] }
  0xfd   : > { %1173 = vmatpush.bf16.msrb.mxu1 %v1828_v8  ;;  %v1856_v8 = vor.u32 %v1997_v60, %v1853_v63 }
  0xfe   : > { %1186 = vmatpush.bf16.msrb.mxu2 %v1512_v9  ;;  %v1717_v9 = vld [vmem:[%s2115_s6 + $0x1a8] sm:$0xf0] }
  0xff   : > { %1199 = vmatpush.bf16.msrb.mxu3 %v1576_v12  ;;  %1161 = vmatmul.bf16.vlgmr.msrb.gmra.mxu0 %v2374_v24  ;;  %v1995_v12 = vld [vmem:[%s2115_s6 + $0x2a4] sm:$0xf] }
 0x100   : > { %1205 = vmatpush.bf16.msra.mxu0 %v1696_v13  ;;  %1174 = vmatmul.bf16.vlgmr.msrb.gmra.mxu1 %v2378_v28  ;;  %v1845_v13 = vld [vmem:[%s2115_s6 + $0x2a8] sm:$0xf0] }
 0x101   : > { %1218 = vmatpush.bf16.msra.mxu1 %v1760_v15  ;;  %1187 = vmatmul.bf16.vlgmr.msrb.gmra.mxu2 %v2307_v61  ;;  %v1669_v61 = vld [vmem:[%s2115_s6 + $0x148] sm:$0xf0]  ;;  %v1720_v15 = vor.u32 %v1963_v7, %v1717_v9 }
 0x102   : > { %1231 = vmatpush.bf16.msra.mxu2 %v1824_v16  ;;  %1200 = vmatmul.bf16.vlgmr.msrb.gmra.mxu3 %v2309_v62  ;;  %v1872_v62 = vor.u32 %v2001_v38, %v1869_v39  ;;  %v1672_v50 = vor.u32 %v1951_v43, %v1669_v61  ;;  %v1784_v16 = vor.u32 %v1979_v10, %v1781_v11  ;;  %v1991_v38 = vld [vmem:[%s2115_s6 + $0x284] sm:$0xf]  ;;  %v1829_v39 = vld [vmem:[%s2115_s6 + $0x288] sm:$0xf0] }
 0x103   : > { %1244 = vmatpush.bf16.msra.mxu3 %v1888_v20  ;;  %v1848_v20 = vor.u32 %v1995_v12, %v1845_v13  ;;  %v1832_v43 = vor.u32 %v1991_v38, %v1829_v39  ;;  %v500_v10 = vld [vmem:[#allocation2 + $0x8] sm:$0xff] }
 0x104   : > { %1206 = vmatpush.bf16.msra.mxu0 %v1688_v27  ;;  %v1648_v27 = vor.u32 %v1945_v17, %v1645_v18 }
 0x105   : > { %1219 = vmatpush.bf16.msra.mxu1 %v1752_v29  ;;  %v1712_v29 = vor.u32 %v1961_v19, %v1709_v21 }
 0x106   : > { %1232 = vmatpush.bf16.msra.mxu2 %v1816_v30  ;;  %v1776_v30 = vor.u32 %v1977_v22, %v1773_v23 }
 0x107   : > { %1245 = vmatpush.bf16.msra.mxu3 %v1880_v34  ;;  %v1840_v34 = vor.u32 %v1993_v25, %v1837_v26 }
 0x108   : > { %1207 = vmatpush.bf16.msra.mxu0 %v1680_v40  ;;  %v1640_v40 = vor.u32 %v1943_v31, %v1637_v32 }
 0x109   : > { %1220 = vmatpush.bf16.msra.mxu1 %v1744_v41  ;;  %v1704_v41 = vor.u32 %v1959_v33, %v1701_v35 }
 0x10a   : > { %1233 = vmatpush.bf16.msra.mxu2 %v1808_v42  ;;  %v1768_v42 = vor.u32 %v1975_v36, %v1765_v37 }
 0x10b   : > { %1246 = vmatpush.bf16.msra.mxu3 %v1872_v62 }
 0x10c   : > { %1208 = vmatpush.bf16.msra.mxu0 %v1672_v50 }
 0x10d   : > { %1221 = vmatpush.bf16.msra.mxu1 %v1736_v51 }
 0x10e   : > { %1234 = vmatpush.bf16.msra.mxu2 %v1800_v52 }
 0x10f   : > { %1247 = vmatpush.bf16.msra.mxu3 %v1864_v56 }
 0x110   : > { %1209 = vmatpush.bf16.msra.mxu0 %v1664_v0 }
 0x111   : > { %1222 = vmatpush.bf16.msra.mxu1 %v1728_v1 }
 0x112   : > { %1235 = vmatpush.bf16.msra.mxu2 %v1792_v2 }
 0x113   : > { %1248 = vmatpush.bf16.msra.mxu3 %v1856_v8 }
 0x114   : > { %1210 = vmatpush.bf16.msra.mxu0 %v1656_v14 }
 0x115   : > { %1223 = vmatpush.bf16.msra.mxu1 %v1720_v15 }
 0x116   : > { %1236 = vmatpush.bf16.msra.mxu2 %v1784_v16 }
 0x117   : > { %1249 = vmatpush.bf16.msra.mxu3 %v1848_v20 }
 0x118   : > { %1211 = vmatpush.bf16.msra.mxu0 %v1648_v27 }
 0x119   : > { %1224 = vmatpush.bf16.msra.mxu1 %v1712_v29 }
 0x11a   : > { %1237 = vmatpush.bf16.msra.mxu2 %v1776_v30 }
 0x11b   : > { %1250 = vmatpush.bf16.msra.mxu3 %v1840_v34 }
 0x11c   : > { %1212 = vmatpush.bf16.msra.mxu0 %v1640_v40 }
 0x11d   : > { %1225 = vmatpush.bf16.msra.mxu1 %v1704_v41 }
 0x11e   : > { %1238 = vmatpush.bf16.msra.mxu2 %v1768_v42 }
 0x11f   : > { %1251 = vmatpush.bf16.msra.mxu3 %v1832_v43  ;;  %1213 = vmatmul.bf16.vlgmr.msra.gmra.mxu0 %v2314_v3  ;;  %v499_v3 = vld [vmem:[#allocation2] sm:$0xff] }
 0x120   : > { %1226 = vmatmul.bf16.vlgmr.msra.gmra.mxu1 %v2316_v4 }
 0x121   : > { %1239 = vmatmul.bf16.vlgmr.msra.gmra.mxu2 %v2374_v24 }
 0x122   : > { %1252 = vmatmul.bf16.vlgmr.msra.gmra.mxu3 %v2378_v28 }
 0x15c   : > { %v1110_v61 = vpop.f32.mrf.mxu0 }
 0x15d   : > { %v1123_v44 = vpop.f32.mrf.mxu1 }
 0x15e   : > { %v1124_v48 = vadd.f32 %v1123_v44, %v1110_v61 }
 0x164   : > { %v1136_v62 = vpop.f32.mrf.mxu2  ;;  %v1112_v46 = vpop.f32.mrf.mxu0 }
 0x165   : > { %v1149_v45 = vpop.f32.mrf.mxu3  ;;  %v1125_v47 = vpop.f32.mrf.mxu1  ;;  %v1137_v51 = vadd.f32 %v1136_v62, %v1124_v48 }
 0x167   : > { %v1150_v52 = vadd.f32 %v1149_v45, %v1137_v51 }
 0x16c   : > { %v1138_v49 = vpop.f32.mrf.mxu2 }
 0x16d   : > { %v1151_v50 = vpop.f32.mrf.mxu3 }
 0x17c   : > { %v1162_v53 = vpop.f32.mrf.mxu0 }
 0x17d   : > { %v1163_v54 = vadd.f32 %v1162_v53, %v1150_v52  ;;  %v1175_v55 = vpop.f32.mrf.mxu1 }
 0x17f   : > { %v1176_v4 = vadd.f32 %v1175_v55, %v1163_v54 }
 0x181   : > { %v1257_v56 = vadd.f32 %v1176_v4, %v499_v3 }
 0x183   : > { %1259 = vst [vmem:[#allocation2] sm:$0xff] %v1257_v56 }
 0x184   : > { %v1188_v24 = vpop.f32.mrf.mxu2  ;;  %v1164_v57 = vpop.f32.mrf.mxu0 }
 0x185   : > { %v1201_v28 = vpop.f32.mrf.mxu3  ;;  %v1177_v58 = vpop.f32.mrf.mxu1 }
 0x186   : > { %v1202_v63 = vadd.f32 %v1201_v28, %v1188_v24 }
 0x18c   : > { %v1190_v59 = vpop.f32.mrf.mxu2 }
 0x18d   : > { %v1203_v60 = vpop.f32.mrf.mxu3 }
 0x19c   : > { %v1214_v0 = vpop.f32.mrf.mxu0 }
 0x19d   : > { %v1227_v1 = vpop.f32.mrf.mxu1  ;;  %v1215_v2 = vadd.f32 %v1214_v0, %v1202_v63 }
 0x19f   : > { %v1228_v5 = vadd.f32 %v1227_v1, %v1215_v2 }
 0x1a4   : > { %v1240_v6 = vpop.f32.mrf.mxu2  ;;  %v1216_v9 = vpop.f32.mrf.mxu0 }
 0x1a5   : > { %v1241_v7 = vadd.f32 %v1240_v6, %v1228_v5  ;;  %v1253_v8 = vpop.f32.mrf.mxu3  ;;  %v1229_v11 = vpop.f32.mrf.mxu1 }
 0x1a7   : > { %v1254_v12 = vadd.f32 %v1253_v8, %v1241_v7 }
 0x1a9   : > { %v1258_v13 = vadd.f32 %v1254_v12, %v500_v10  ;;  %1264 = sbr.rel (%p1889_p7) target bundleno = 443 (0x1bb), region = 48 }
 0x1ab   : > { %1260 = vst [vmem:[#allocation2 + $0x8] sm:$0xff] %v1258_v13 }
 0x1ac   : > { %v1242_v14 = vpop.f32.mrf.mxu2 }
 0x1ad   : > { %v1255_v15 = vpop.f32.mrf.mxu3 }
 0x1ae   : > { %v1265_v16 = vld [vmem:[#allocation2] sm:$0xff] }
 0x1af   : > { %v1267_v18 = vld [vmem:[%s2456_s4] sm:$0x3] }
 0x1b0   : > { %v1269_v19 = vperm.slane %v1267_v18, 0  ;;  %v1270_v20 = vperm.slane %v1267_v18, 1 }
 0x1b2   : > { %v1266_v17 = vld [vmem:[#allocation2 + $0x8] sm:$0xff]  ;;  %v1273_v21 = vadd.f32 %v1269_v19, %v1265_v16 }
 0x1b3   : > { %v1274_v22 = vadd.f32 %v1270_v20, %v1266_v17 }
 0x1b4   : > { %vm1275_vm0 = vcmp.ge.f32.partialorder %v1273_v21, 0.0  ;;  %v1277_v23 = vmul.f32 0.1, %v1273_v21 }
 0x1b5   : > { %vm1276_vm1 = vcmp.ge.f32.partialorder %v1274_v22, 0.0  ;;  %v1278_v25 = vmul.f32 0.1, %v1274_v22 }
 0x1b6   : > { %v1279_v26 = vsel %vm1275_vm0, %v1273_v21, %v1277_v23 }
 0x1b7   : > { %v1280_v27 = vsel %vm1276_vm1, %v1274_v22, %v1278_v25 }
 0x1b8   : > { %v1281_v29 = vpack.c.bf16 %v1280_v27, %v1279_v26 }
 0x1ba   : > { %1282 = vst [vmem:[%s2457_s5] sm:$0xff] %v1281_v29 }
 0x1bb PF: > { %s15_s20 = sadd.s32 1, %s2053_s20   ;;  %s2458_s18 = smov %s2049_s19 }
 0x1bc   : > { %p12_p8 = scmp.ge.s32.totalorder %s15_s20, 5   ;;  %s2459_s19 = smov %s2461_s21 }
 0x1be   :  { %14 = sbr.rel (!%p12_p8) target bundleno = 2 (0x2), region = 90 }

// kernel: discriminator_forward.13
= control target key start
LH: loop header
LB: loop body
LE: loop exit
PB: predicated region body
PF: predicated region fallthrough
CT: control target
= control target key end

     0   :  { %s3098_s18 = smov 0   ;;  %s3100_s19 = smov 0   ;;  %s3766_s0 = inlined_call_operand.vmem [shape: bf16[8,2304], index: 0, kind: input, shape index: {}]   ;;  %s3767_s1 = inlined_call_operand.vmem [shape: bf16[2304,512], index: 1, kind: input, shape index: {}]   ;;  %s3768_s2 = inlined_call_operand.vmem [shape: f32[1,512], index: 2, kind: input, shape index: {}]   ;;  %s3769_s3 = inlined_call_operand.vmem [shape: f32[512,128], index: 3, kind: input, shape index: {}]   ;;  %s3770_s4 = inlined_call_operand.vmem [shape: f32[1,128], index: 4, kind: input, shape index: {}]   ;;  %s3771_s5 = inlined_call_operand.vmem [shape: f32[8,128], index: 5, kind: output, shape index: {}]  }
   0x1   :  { %s3102_s20 = smov 0  }
   0x2 LB: > { %s24_s21 = sadd.s32 1, %s3061_s19  ;;  %p2047_p0 = scmp.ge.s32.totalorder %s3065_s20, 1  ;;  %s3065_s20 = sphi %s3102_s20, %s15_s20   ;;  %s3061_s19 = sphi %s3100_s19, %s3773_s19   ;;  %s3057_s18 = sphi %s3098_s18, %s3772_s18  }
   0x3   : > { %p25_p1 = scmp.ge.s32.totalorder %s24_s21, 3  ;;  %p218_p2 = scmp.lt.s32.totalorder %s3065_s20, 4 }
   0x5   : > { %s3775_s21 = smov (%p25_p1, %s24_s21), 0  ;;  %p219_p3 = pnand %p2047_p0, %p218_p2 }
   0x6   : > { %s255_s22 = smul.u32 (!%p219_p3), 6, %s3057_s18  ;;  %p2051_p6 = scmp.ne.s32.totalorder (!%p219_p3), %s3057_s18, 0 }
   0x7   : > { %222 = sbr.rel (%p219_p3) target bundleno = 532 (0x214), region = 40 }
   0x8   : > { %s265_s23 = smul.u32 (!%p219_p3), 96, %s3057_s18  ;;  %p258_p4 = scmp.lt.s32.totalorder (!%p219_p3), %s255_s22, 17 }
   0xa   : > { %p266_p5 = scmp.lt.s32.totalorder (!%p219_p3), %s265_s23, 287 }
   0xc   : > { %s3777_s22 = smov (!%p258_p4, %s255_s22), 17  ;;  %s3779_s23 = smov (!%p266_p5, %s265_s23), 287 }
   0xd   : > { %s2048_s24 = sshll.u32 %s3777_s22, 2  ;;  %s2824_s28 = sshll.u32 %s3779_s23, 4 }
   0xe   : > { %s3123_s27 = scalar_lea.vmem %s3766_s0, %s2048_s24  ;;  %s3128_s6 = scalar_lea.vmem %s3767_s1, %s2824_s28 }
   0xf   : > { %279 = sbr.rel (%p2051_p6) target bundleno = 25 (0x19), region = 44 }
  0x14   : > { %v3067_v0 = vmov 0.0  }
  0x15   : > { %280 = vst [vmem:[#allocation2 + $0x10] sm:$0xff] %v3067_v0 }
  0x16   : > { %281 = vst [vmem:[#allocation2] sm:$0xff] %v3067_v0 }
  0x17   : > { %282 = vst [vmem:[#allocation2 + $0x18] sm:$0xff] %v3067_v0 }
  0x18   : > { %283 = vst [vmem:[#allocation2 + $0x8] sm:$0xff] %v3067_v0 }
  0x19 PF: > { %v2166_v1 = vld [vmem:[%s3128_s6 + $0xe0] sm:$0xf]  ;;  %v2855_v2 = vld [vmem:[%s3128_s6 + $0xec] sm:$0xf0]  ;;  %p2820_p7 = scmp.ne.s32.totalorder %s3057_s18, 2 }
  0x1a   : > { %v2294_v3 = vld [vmem:[%s3128_s6 + $0x1e0] sm:$0xf]  ;;  %v2167_v4 = vor.u32 %v2855_v2, %v2166_v1  ;;  %v2887_v5 = vld [vmem:[%s3128_s6 + $0x1ec] sm:$0xf0] }
  0x1b   : > { %v2422_v6 = vld [vmem:[%s3128_s6 + $0x2e0] sm:$0xf]  ;;  %v2919_v7 = vld [vmem:[%s3128_s6 + $0x2ec] sm:$0xf0]  ;;  %v2295_v8 = vor.u32 %v2887_v5, %v2294_v3 }
  0x1c   : > { %v2423_v9 = vor.u32 %v2919_v7, %v2422_v6  ;;  %v2550_v10 = vld [vmem:[%s3128_s6 + $0x3e0] sm:$0xf]  ;;  %v2951_v11 = vld [vmem:[%s3128_s6 + $0x3ec] sm:$0xf0]  ;;  %1464 = vmatpush.bf16.msra.mxu0 %v2167_v4 }
  0x1d   : > { %v2150_v12 = vld [vmem:[%s3128_s6 + $0xc0] sm:$0xf]  ;;  %v2551_v13 = vor.u32 %v2951_v11, %v2550_v10  ;;  %v2851_v14 = vld [vmem:[%s3128_s6 + $0xcc] sm:$0xf0]  ;;  %1477 = vmatpush.bf16.msra.mxu1 %v2295_v8 }
  0x1e   : > { %v2278_v15 = vld [vmem:[%s3128_s6 + $0x1c0] sm:$0xf]  ;;  %v2883_v16 = vld [vmem:[%s3128_s6 + $0x1cc] sm:$0xf0]  ;;  %1490 = vmatpush.bf16.msra.mxu2 %v2423_v9  ;;  %v2151_v17 = vor.u32 %v2851_v14, %v2150_v12 }
  0x1f   : > { %v2279_v18 = vor.u32 %v2883_v16, %v2278_v15  ;;  %v2406_v19 = vld [vmem:[%s3128_s6 + $0x2c0] sm:$0xf]  ;;  %v2915_v20 = vld [vmem:[%s3128_s6 + $0x2cc] sm:$0xf0]  ;;  %1503 = vmatpush.bf16.msra.mxu3 %v2551_v13 }
  0x20   : > { %v2534_v21 = vld [vmem:[%s3128_s6 + $0x3c0] sm:$0xf]  ;;  %v2407_v22 = vor.u32 %v2915_v20, %v2406_v19  ;;  %v2947_v23 = vld [vmem:[%s3128_s6 + $0x3cc] sm:$0xf0]  ;;  %1465 = vmatpush.bf16.msra.mxu0 %v2151_v17 }
  0x21   : > { %v2134_v24 = vld [vmem:[%s3128_s6 + $0xa0] sm:$0xf]  ;;  %v2847_v25 = vld [vmem:[%s3128_s6 + $0xac] sm:$0xf0]  ;;  %v2535_v26 = vor.u32 %v2947_v23, %v2534_v21  ;;  %1478 = vmatpush.bf16.msra.mxu1 %v2279_v18 }
  0x22   : > { %v2262_v27 = vld [vmem:[%s3128_s6 + $0x1a0] sm:$0xf]  ;;  %v2879_v28 = vld [vmem:[%s3128_s6 + $0x1ac] sm:$0xf0]  ;;  %v2135_v30 = vor.u32 %v2847_v25, %v2134_v24  ;;  %1491 = vmatpush.bf16.msra.mxu2 %v2407_v22 }
  0x23   : > { %v2390_v29 = vld [vmem:[%s3128_s6 + $0x2a0] sm:$0xf]  ;;  %v2911_v31 = vld [vmem:[%s3128_s6 + $0x2ac] sm:$0xf0]  ;;  %v2263_v34 = vor.u32 %v2879_v28, %v2262_v27  ;;  %1504 = vmatpush.bf16.msra.mxu3 %v2535_v26 }
  0x24   : > { %v2518_v32 = vld [vmem:[%s3128_s6 + $0x3a0] sm:$0xf]  ;;  %v2943_v33 = vld [vmem:[%s3128_s6 + $0x3ac] sm:$0xf0]  ;;  %v2391_v35 = vor.u32 %v2911_v31, %v2390_v29  ;;  %1466 = vmatpush.bf16.msra.mxu0 %v2135_v30 }
  0x25   : > { %v2118_v36 = vld [vmem:[%s3128_s6 + $0x80] sm:$0xf]  ;;  %v2843_v37 = vld [vmem:[%s3128_s6 + $0x8c] sm:$0xf0]  ;;  %v2519_v39 = vor.u32 %v2943_v33, %v2518_v32  ;;  %1479 = vmatpush.bf16.msra.mxu1 %v2263_v34  ;;  %v2853_v34 = vld [vmem:[%s3128_s6 + $0xe4] sm:$0xf] }
  0x26   : > { %v2246_v38 = vld [vmem:[%s3128_s6 + $0x180] sm:$0xf]  ;;  %v2875_v40 = vld [vmem:[%s3128_s6 + $0x18c] sm:$0xf0]  ;;  %v2119_v45 = vor.u32 %v2843_v37, %v2118_v36  ;;  %1492 = vmatpush.bf16.msra.mxu2 %v2391_v35  ;;  %v2168_v35 = vld [vmem:[%s3128_s6 + $0xf0] sm:$0xf0] }
  0x27   : > { %v2374_v41 = vld [vmem:[%s3128_s6 + $0x280] sm:$0xf]  ;;  %v2907_v42 = vld [vmem:[%s3128_s6 + $0x28c] sm:$0xf0]  ;;  %v2247_v46 = vor.u32 %v2875_v40, %v2246_v38  ;;  %1505 = vmatpush.bf16.msra.mxu3 %v2519_v39  ;;  %v2885_v38 = vld [vmem:[%s3128_s6 + $0x1e4] sm:$0xf] }
  0x28   : > { %v2502_v43 = vld [vmem:[%s3128_s6 + $0x380] sm:$0xf]  ;;  %v2939_v44 = vld [vmem:[%s3128_s6 + $0x38c] sm:$0xf0]  ;;  %v2375_v47 = vor.u32 %v2907_v42, %v2374_v41  ;;  %1467 = vmatpush.bf16.msra.mxu0 %v2119_v45  ;;  %v2296_v39 = vld [vmem:[%s3128_s6 + $0x1f0] sm:$0xf0] }
  0x29   : > { %v2102_v48 = vld [vmem:[%s3128_s6 + $0x60] sm:$0xf]  ;;  %v2839_v49 = vld [vmem:[%s3128_s6 + $0x6c] sm:$0xf0]  ;;  %v2503_v51 = vor.u32 %v2939_v44, %v2502_v43  ;;  %1480 = vmatpush.bf16.msra.mxu1 %v2247_v46  ;;  %v2171_v43 = vor.u32 %v2853_v34, %v2168_v35  ;;  %v2232_v34 = vld [vmem:[%s3128_s6 + $0x170] sm:$0xf0] }
  0x2a   : > { %v2230_v50 = vld [vmem:[%s3128_s6 + $0x160] sm:$0xf]  ;;  %v2871_v52 = vld [vmem:[%s3128_s6 + $0x16c] sm:$0xf0]  ;;  %v2103_v57 = vor.u32 %v2839_v49, %v2102_v48  ;;  %1493 = vmatpush.bf16.msra.mxu2 %v2375_v47  ;;  %v2299_v47 = vor.u32 %v2885_v38, %v2296_v39  ;;  %v2849_v49 = vld [vmem:[%s3128_s6 + $0xc4] sm:$0xf] }
  0x2b   : > { %v2358_v53 = vld [vmem:[%s3128_s6 + $0x260] sm:$0xf]  ;;  %v2903_v54 = vld [vmem:[%s3128_s6 + $0x26c] sm:$0xf0]  ;;  %v2231_v58 = vor.u32 %v2871_v52, %v2230_v50  ;;  %1506 = vmatpush.bf16.msra.mxu3 %v2503_v51  ;;  %v2152_v50 = vld [vmem:[%s3128_s6 + $0xd0] sm:$0xf0] }
  0x2c   : > { %v2486_v55 = vld [vmem:[%s3128_s6 + $0x360] sm:$0xf]  ;;  %v2935_v56 = vld [vmem:[%s3128_s6 + $0x36c] sm:$0xf0]  ;;  %v2359_v59 = vor.u32 %v2903_v54, %v2358_v53  ;;  %1468 = vmatpush.bf16.msra.mxu0 %v2103_v57  ;;  %v2881_v51 = vld [vmem:[%s3128_s6 + $0x1c4] sm:$0xf] }
  0x2d   : > { %v2086_v60 = vld [vmem:[%s3128_s6 + $0x40] sm:$0xf]  ;;  %v2835_v61 = vld [vmem:[%s3128_s6 + $0x4c] sm:$0xf0]  ;;  %v2487_v63 = vor.u32 %v2935_v56, %v2486_v55  ;;  %1481 = vmatpush.bf16.msra.mxu1 %v2231_v58  ;;  %v2280_v52 = vld [vmem:[%s3128_s6 + $0x1d0] sm:$0xf0]  ;;  %v2155_v56 = vor.u32 %v2849_v49, %v2152_v50 }
  0x2e   : > { %v2214_v62 = vld [vmem:[%s3128_s6 + $0x140] sm:$0xf]  ;;  %v2867_v0 = vld [vmem:[%s3128_s6 + $0x14c] sm:$0xf0]  ;;  %v2087_v5 = vor.u32 %v2835_v61, %v2086_v60  ;;  %1494 = vmatpush.bf16.msra.mxu2 %v2359_v59  ;;  %v2283_v60 = vor.u32 %v2881_v51, %v2280_v52  ;;  %v2845_v61 = vld [vmem:[%s3128_s6 + $0xa4] sm:$0xf] }
  0x2f   : > { %v2342_v1 = vld [vmem:[%s3128_s6 + $0x240] sm:$0xf]  ;;  %v2899_v2 = vld [vmem:[%s3128_s6 + $0x24c] sm:$0xf0]  ;;  %v2215_v6 = vor.u32 %v2867_v0, %v2214_v62  ;;  %1507 = vmatpush.bf16.msra.mxu3 %v2487_v63  ;;  %v2136_v62 = vld [vmem:[%s3128_s6 + $0xb0] sm:$0xf0] }
  0x30   : > { %v2470_v3 = vld [vmem:[%s3128_s6 + $0x340] sm:$0xf]  ;;  %v2931_v4 = vld [vmem:[%s3128_s6 + $0x34c] sm:$0xf0]  ;;  %v2343_v7 = vor.u32 %v2899_v2, %v2342_v1  ;;  %1469 = vmatpush.bf16.msra.mxu0 %v2087_v5  ;;  %v2877_v63 = vld [vmem:[%s3128_s6 + $0x1a4] sm:$0xf]  ;;  %v2139_v5 = vor.u32 %v2845_v61, %v2136_v62 }
  0x31   : > { %v2070_v8 = vld [vmem:[%s3128_s6 + $0x20] sm:$0xf]  ;;  %v2831_v9 = vld [vmem:[%s3128_s6 + $0x2c] sm:$0xf0]  ;;  %v2471_v11 = vor.u32 %v2931_v4, %v2470_v3  ;;  %1482 = vmatpush.bf16.msra.mxu1 %v2215_v6  ;;  %v2264_v0 = vld [vmem:[%s3128_s6 + $0x1b0] sm:$0xf0] }
  0x32   : > { %v2198_v10 = vld [vmem:[%s3128_s6 + $0x120] sm:$0xf]  ;;  %v2863_v12 = vld [vmem:[%s3128_s6 + $0x12c] sm:$0xf0]  ;;  %v2071_v17 = vor.u32 %v2831_v9, %v2070_v8  ;;  %1495 = vmatpush.bf16.msra.mxu2 %v2343_v7  ;;  %v289_v4 = vld [vmem:[%s3123_s27 + $0x8] sm:$0xff] }
  0x33   : > { %v2326_v13 = vld [vmem:[%s3128_s6 + $0x220] sm:$0xf]  ;;  %v2895_v14 = vld [vmem:[%s3128_s6 + $0x22c] sm:$0xf0]  ;;  %v2199_v20 = vor.u32 %v2863_v12, %v2198_v10  ;;  %1508 = vmatpush.bf16.msra.mxu3 %v2471_v11  ;;  %v488_v10 = vunpack.c.l.b16 %v289_v4  ;;  %v489_v11 = vunpack.c.h.b16 %v289_v4  ;;  %v2267_v12 = vor.u32 %v2877_v63, %v2264_v0 }
  0x34   : > { %v2454_v15 = vld [vmem:[%s3128_s6 + $0x320] sm:$0xf]  ;;  %v2927_v16 = vld [vmem:[%s3128_s6 + $0x32c] sm:$0xf0]  ;;  %v2327_v21 = vor.u32 %v2895_v14, %v2326_v13  ;;  %1470 = vmatpush.bf16.msra.mxu0 %v2071_v17  ;;  %v2841_v14 = vld [vmem:[%s3128_s6 + $0x84] sm:$0xf] }
  0x35   : > { %v2054_v18 = vld [vmem:[%s3128_s6] sm:$0xf]  ;;  %v2827_v19 = vld [vmem:[%s3128_s6 + $0xc] sm:$0xf0]  ;;  %v2455_v25 = vor.u32 %v2927_v16, %v2454_v15  ;;  %1483 = vmatpush.bf16.msra.mxu1 %v2199_v20  ;;  %v2120_v15 = vld [vmem:[%s3128_s6 + $0x90] sm:$0xf0]  ;;  %v3231_v20 = vpack.c.b16 %v488_v10, %v488_v10 }
  0x36   : > { %v2182_v22 = vld [vmem:[%s3128_s6 + $0x100] sm:$0xf]  ;;  %v2859_v23 = vld [vmem:[%s3128_s6 + $0x10c] sm:$0xf0]  ;;  %v2055_v32 = vor.u32 %v2827_v19, %v2054_v18  ;;  %1496 = vmatpush.bf16.msra.mxu2 %v2327_v21  ;;  %v2873_v17 = vld [vmem:[%s3128_s6 + $0x184] sm:$0xf]  ;;  %v3233_v21 = vpack.c.b16 %v489_v11, %v489_v11 }
  0x37   : > { %v2310_v24 = vld [vmem:[%s3128_s6 + $0x200] sm:$0xf]  ;;  %v2891_v26 = vld [vmem:[%s3128_s6 + $0x20c] sm:$0xf0]  ;;  %v2183_v36 = vor.u32 %v2859_v23, %v2182_v22  ;;  %1509 = vmatpush.bf16.msra.mxu3 %v2455_v25  ;;  %v2248_v18 = vld [vmem:[%s3128_s6 + $0x190] sm:$0xf0]  ;;  %v2123_v25 = vor.u32 %v2841_v14, %v2120_v15 }
  0x38   : > { %v2438_v27 = vld [vmem:[%s3128_s6 + $0x300] sm:$0xf]  ;;  %v2923_v28 = vld [vmem:[%s3128_s6 + $0x30c] sm:$0xf0]  ;;  %v2311_v37 = vor.u32 %v2891_v26, %v2310_v24  ;;  %1471 = vmatpush.bf16.msra.mxu0 %v2055_v32  ;;  %v2104_v32 = vld [vmem:[%s3128_s6 + $0x70] sm:$0xf0] }
  0x39   : > { %v2678_v29 = vld [vmem:[%s3128_s6 + $0x4e0] sm:$0xf]  ;;  %v2983_v30 = vld [vmem:[%s3128_s6 + $0x4ec] sm:$0xf0]  ;;  %v2439_v40 = vor.u32 %v2923_v28, %v2438_v27  ;;  %1484 = vmatpush.bf16.msra.mxu1 %v2183_v36  ;;  %v2949_v10 = vld [vmem:[%s3128_s6 + $0x3e4] sm:$0xf] }
  0x3a   : > { %v2806_v31 = vld [vmem:[%s3128_s6 + $0x5e0] sm:$0xf]  ;;  %v3015_v33 = vld [vmem:[%s3128_s6 + $0x5ec] sm:$0xf0]  ;;  %v2679_v41 = vor.u32 %v2983_v30, %v2678_v29  ;;  %1497 = vmatpush.bf16.msra.mxu2 %v2311_v37  ;;  %v2251_v29 = vor.u32 %v2873_v17, %v2248_v18  ;;  %v2680_v14 = vld [vmem:[%s3128_s6 + $0x4f0] sm:$0xf0] }
  0x3b   : > { %v2807_v42 = vor.u32 %v3015_v33, %v2806_v31  ;;  %v2662_v44 = vld [vmem:[%s3128_s6 + $0x4c0] sm:$0xf]  ;;  %v2979_v45 = vld [vmem:[%s3128_s6 + $0x4cc] sm:$0xf0]  ;;  %1510 = vmatpush.bf16.msra.mxu3 %v2439_v40  ;;  %v2837_v31 = vld [vmem:[%s3128_s6 + $0x64] sm:$0xf] }
  0x3c   : > { %v2790_v46 = vld [vmem:[%s3128_s6 + $0x5c0] sm:$0xf]  ;;  %v3011_v48 = vld [vmem:[%s3128_s6 + $0x5cc] sm:$0xf0]  ;;  %1516 = vmatpush.bf16.msrb.mxu0 %v2679_v41  ;;  %v2663_v53 = vor.u32 %v2979_v45, %v2662_v44  ;;  %v2869_v33 = vld [vmem:[%s3128_s6 + $0x164] sm:$0xf]  ;;  %v2107_v37 = vor.u32 %v2837_v31, %v2104_v32 }
  0x3d   : > { %v2646_v54 = vld [vmem:[%s3128_s6 + $0x4a0] sm:$0xf]  ;;  %1529 = vmatpush.bf16.msrb.mxu1 %v2807_v42  ;;  %v2791_v55 = vor.u32 %v3011_v48, %v2790_v46  ;;  %v2975_v57 = vld [vmem:[%s3128_s6 + $0x4ac] sm:$0xf0]  ;;  %1498 = vmatmul.bf16.vlgmr.msra.gmra.mxu2 %v3231_v20  ;;  %v2235_v41 = vor.u32 %v2869_v33, %v2232_v34  ;;  %v2088_v44 = vld [vmem:[%s3128_s6 + $0x50] sm:$0xf0] }
  0x3e   : > { %1542 = vmatpush.bf16.msrb.mxu2 %v2171_v43  ;;  %v2774_v58 = vld [vmem:[%s3128_s6 + $0x5a0] sm:$0xf]  ;;  %v3007_v59 = vld [vmem:[%s3128_s6 + $0x5ac] sm:$0xf0]  ;;  %v2647_v1 = vor.u32 %v2975_v57, %v2646_v54  ;;  %1511 = vmatmul.bf16.vlgmr.msra.gmra.mxu3 %v3233_v21  ;;  %v2833_v43 = vld [vmem:[%s3128_s6 + $0x44] sm:$0xf] }
  0x3f   : > { %1555 = vmatpush.bf16.msrb.mxu3 %v2299_v47  ;;  %v2775_v2 = vor.u32 %v3007_v59, %v2774_v58  ;;  %v288_v3 = vld [vmem:[%s3123_s27] sm:$0xff]  ;;  %v2971_v7 = vld [vmem:[%s3128_s6 + $0x48c] sm:$0xf0]  ;;  %v2216_v46 = vld [vmem:[%s3128_s6 + $0x150] sm:$0xf0]  ;;  %v2091_v49 = vor.u32 %v2833_v43, %v2088_v44 }
  0x40   : > { %1517 = vmatpush.bf16.msrb.mxu0 %v2663_v53  ;;  %v2630_v6 = vld [vmem:[%s3128_s6 + $0x480] sm:$0xf]  ;;  %v486_v9 = vunpack.c.l.b16 %v288_v3  ;;  %v3003_v13 = vld [vmem:[%s3128_s6 + $0x58c] sm:$0xf0]  ;;  %v487_v16 = vunpack.c.h.b16 %v288_v3  ;;  %v2865_v45 = vld [vmem:[%s3128_s6 + $0x144] sm:$0xf] }
  0x41   : > { %1530 = vmatpush.bf16.msrb.mxu1 %v2791_v55  ;;  %v2758_v8 = vld [vmem:[%s3128_s6 + $0x580] sm:$0xf]  ;;  %v2631_v22 = vor.u32 %v2971_v7, %v2630_v6  ;;  %v2967_v27 = vld [vmem:[%s3128_s6 + $0x46c] sm:$0xf0]  ;;  %v2219_v53 = vor.u32 %v2865_v45, %v2216_v46  ;;  %v2829_v55 = vld [vmem:[%s3128_s6 + $0x24] sm:$0xf] }
  0x42   : > { %1543 = vmatpush.bf16.msrb.mxu2 %v2155_v56  ;;  %v3229_v19 = vpack.c.b16 %v486_v9, %v486_v9  ;;  %v3235_v23 = vpack.c.b16 %v487_v16, %v487_v16  ;;  %v2759_v24 = vor.u32 %v3003_v13, %v2758_v8  ;;  %v2614_v26 = vld [vmem:[%s3128_s6 + $0x460] sm:$0xf]  ;;  %v2999_v30 = vld [vmem:[%s3128_s6 + $0x56c] sm:$0xf0]  ;;  %v2072_v56 = vld [vmem:[%s3128_s6 + $0x30] sm:$0xf0] }
  0x43   : > { %1556 = vmatpush.bf16.msrb.mxu3 %v2283_v60  ;;  %v2742_v28 = vld [vmem:[%s3128_s6 + $0x560] sm:$0xf]  ;;  %v2615_v35 = vor.u32 %v2967_v27, %v2614_v26  ;;  %v2963_v39 = vld [vmem:[%s3128_s6 + $0x44c] sm:$0xf0]  ;;  %v2861_v57 = vld [vmem:[%s3128_s6 + $0x124] sm:$0xf]  ;;  %v2075_v0 = vor.u32 %v2829_v55, %v2072_v56 }
  0x44   : > { %1518 = vmatpush.bf16.msrb.mxu0 %v2647_v1  ;;  %1485 = vmatmul.bf16.vlgmr.msra.gmra.mxu1 %v3235_v23  ;;  %v2743_v36 = vor.u32 %v2999_v30, %v2742_v28  ;;  %v2598_v38 = vld [vmem:[%s3128_s6 + $0x440] sm:$0xf]  ;;  %v2995_v42 = vld [vmem:[%s3128_s6 + $0x54c] sm:$0xf0]  ;;  %v2200_v58 = vld [vmem:[%s3128_s6 + $0x130] sm:$0xf0] }
  0x45   : > { %1531 = vmatpush.bf16.msrb.mxu1 %v2775_v2  ;;  %1472 = vmatmul.bf16.vlgmr.msra.gmra.mxu0 %v3229_v19  ;;  %v2726_v40 = vld [vmem:[%s3128_s6 + $0x540] sm:$0xf]  ;;  %v2599_v47 = vor.u32 %v2963_v39, %v2598_v38  ;;  %v2959_v51 = vld [vmem:[%s3128_s6 + $0x42c] sm:$0xf0]  ;;  %v2825_v2 = vld [vmem:[%s3128_s6 + $0x4] sm:$0xf]  ;;  %v2203_v4 = vor.u32 %v2861_v57, %v2200_v58 }
  0x46   : > { %1544 = vmatpush.bf16.msrb.mxu2 %v2139_v5  ;;  %v2727_v48 = vor.u32 %v2995_v42, %v2726_v40  ;;  %v2582_v50 = vld [vmem:[%s3128_s6 + $0x420] sm:$0xf]  ;;  %v2991_v54 = vld [vmem:[%s3128_s6 + $0x52c] sm:$0xf0]  ;;  %v2056_v5 = vld [vmem:[%s3128_s6 + $0x10] sm:$0xf0] }
  0x47   : > { %1557 = vmatpush.bf16.msrb.mxu3 %v2267_v12  ;;  %v2710_v52 = vld [vmem:[%s3128_s6 + $0x520] sm:$0xf]  ;;  %v2583_v59 = vor.u32 %v2959_v51, %v2582_v50  ;;  %v2955_v61 = vld [vmem:[%s3128_s6 + $0x40c] sm:$0xf0]  ;;  %v2857_v6 = vld [vmem:[%s3128_s6 + $0x104] sm:$0xf]  ;;  %v2059_v17 = vor.u32 %v2825_v2, %v2056_v5 }
  0x48   : > { %1519 = vmatpush.bf16.msrb.mxu0 %v2631_v22  ;;  %v2566_v60 = vld [vmem:[%s3128_s6 + $0x400] sm:$0xf]  ;;  %v2711_v63 = vor.u32 %v2991_v54, %v2710_v52  ;;  %v2987_v1 = vld [vmem:[%s3128_s6 + $0x50c] sm:$0xf0]  ;;  %v2184_v7 = vld [vmem:[%s3128_s6 + $0x110] sm:$0xf0] }
  0x49   : > { %1532 = vmatpush.bf16.msrb.mxu1 %v2759_v24  ;;  %v2694_v62 = vld [vmem:[%s3128_s6 + $0x500] sm:$0xf]  ;;  %v290_v3 = vld [vmem:[%s3123_s27 + $0x10] sm:$0xff]  ;;  %v2917_v8 = vld [vmem:[%s3128_s6 + $0x2e4] sm:$0xf]  ;;  %v2567_v11 = vor.u32 %v2955_v61, %v2566_v60 }
  0x4a   : > { %1545 = vmatpush.bf16.msrb.mxu2 %v2123_v25  ;;  %v2424_v9 = vld [vmem:[%s3128_s6 + $0x2f0] sm:$0xf0]  ;;  %v2981_v13 = vld [vmem:[%s3128_s6 + $0x4e4] sm:$0xf]  ;;  %v490_v15 = vunpack.c.l.b16 %v290_v3  ;;  %v2695_v16 = vor.u32 %v2987_v1, %v2694_v62  ;;  %v491_v24 = vunpack.c.h.b16 %v290_v3  ;;  %v2187_v25 = vor.u32 %v2857_v6, %v2184_v7 }
  0x4b   : > { %1558 = vmatpush.bf16.msrb.mxu3 %v2251_v29  ;;  %v2552_v12 = vld [vmem:[%s3128_s6 + $0x3f0] sm:$0xf0]  ;;  %v3013_v18 = vld [vmem:[%s3128_s6 + $0x5e4] sm:$0xf]  ;;  %v2427_v26 = vor.u32 %v2917_v8, %v2424_v9  ;;  %v2683_v28 = vor.u32 %v2981_v13, %v2680_v14 }
  0x4c   : > { %1520 = vmatpush.bf16.msrb.mxu0 %v2615_v35  ;;  %v2808_v22 = vld [vmem:[%s3128_s6 + $0x5f0] sm:$0xf0]  ;;  %v2555_v27 = vor.u32 %v2949_v10, %v2552_v12  ;;  %v2913_v29 = vld [vmem:[%s3128_s6 + $0x2c4] sm:$0xf]  ;;  %v3292_v39 = vpack.c.b16 %v491_v24, %v491_v24 }
  0x4d   : > { %1533 = vmatpush.bf16.msrb.mxu1 %v2743_v36  ;;  %v2408_v30 = vld [vmem:[%s3128_s6 + $0x2d0] sm:$0xf0]  ;;  %v2945_v31 = vld [vmem:[%s3128_s6 + $0x3c4] sm:$0xf]  ;;  %v2811_v32 = vor.u32 %v3013_v18, %v2808_v22  ;;  %v3288_v36 = vpack.c.b16 %v490_v15, %v490_v15 }
  0x4e   : > { %1546 = vmatpush.bf16.msrb.mxu2 %v2107_v37  ;;  %v2536_v33 = vld [vmem:[%s3128_s6 + $0x3d0] sm:$0xf0]  ;;  %v2977_v34 = vld [vmem:[%s3128_s6 + $0x4c4] sm:$0xf]  ;;  %v2411_v40 = vor.u32 %v2913_v29, %v2408_v30 }
  0x4f   : > { %1559 = vmatpush.bf16.msrb.mxu3 %v2235_v41  ;;  %v2664_v35 = vld [vmem:[%s3128_s6 + $0x4d0] sm:$0xf0]  ;;  %v3009_v37 = vld [vmem:[%s3128_s6 + $0x5c4] sm:$0xf]  ;;  %v2539_v41 = vor.u32 %v2945_v31, %v2536_v33 }
  0x50   : > { %1521 = vmatpush.bf16.msrb.mxu0 %v2599_v47  ;;  %v2792_v38 = vld [vmem:[%s3128_s6 + $0x5d0] sm:$0xf0]  ;;  %v2667_v42 = vor.u32 %v2977_v34, %v2664_v35  ;;  %v2909_v43 = vld [vmem:[%s3128_s6 + $0x2a4] sm:$0xf] }
  0x51   : > { %1534 = vmatpush.bf16.msrb.mxu1 %v2727_v48  ;;  %v2392_v44 = vld [vmem:[%s3128_s6 + $0x2b0] sm:$0xf0]  ;;  %v2941_v45 = vld [vmem:[%s3128_s6 + $0x3a4] sm:$0xf]  ;;  %v2795_v46 = vor.u32 %v3009_v37, %v2792_v38 }
  0x52   : > { %1547 = vmatpush.bf16.msrb.mxu2 %v2091_v49  ;;  %v2520_v47 = vld [vmem:[%s3128_s6 + $0x3b0] sm:$0xf0]  ;;  %v2973_v48 = vld [vmem:[%s3128_s6 + $0x4a4] sm:$0xf]  ;;  %v2395_v52 = vor.u32 %v2909_v43, %v2392_v44 }
  0x53   : > { %1560 = vmatpush.bf16.msrb.mxu3 %v2219_v53  ;;  %v2648_v49 = vld [vmem:[%s3128_s6 + $0x4b0] sm:$0xf0]  ;;  %v3005_v50 = vld [vmem:[%s3128_s6 + $0x5a4] sm:$0xf]  ;;  %v2523_v53 = vor.u32 %v2941_v45, %v2520_v47 }
  0x54   : > { %1522 = vmatpush.bf16.msrb.mxu0 %v2583_v59  ;;  %v2776_v51 = vld [vmem:[%s3128_s6 + $0x5b0] sm:$0xf0]  ;;  %v2651_v54 = vor.u32 %v2973_v48, %v2648_v49  ;;  %v2905_v55 = vld [vmem:[%s3128_s6 + $0x284] sm:$0xf] }
  0x55   : > { %1535 = vmatpush.bf16.msrb.mxu1 %v2711_v63  ;;  %v2376_v56 = vld [vmem:[%s3128_s6 + $0x290] sm:$0xf0]  ;;  %v2937_v57 = vld [vmem:[%s3128_s6 + $0x384] sm:$0xf]  ;;  %v2779_v58 = vor.u32 %v3005_v50, %v2776_v51 }
  0x56   : > { %1548 = vmatpush.bf16.msrb.mxu2 %v2075_v0  ;;  %v2504_v59 = vld [vmem:[%s3128_s6 + $0x390] sm:$0xf0]  ;;  %v2969_v60 = vld [vmem:[%s3128_s6 + $0x484] sm:$0xf]  ;;  %v2379_v0 = vor.u32 %v2905_v55, %v2376_v56  ;;  %v2856_v55 = vld [vmem:[%s3128_s6 + $0xf4] sm:$0xf0] }
  0x57   : > { %1561 = vmatpush.bf16.msrb.mxu3 %v2203_v4  ;;  %v2632_v61 = vld [vmem:[%s3128_s6 + $0x490] sm:$0xf0]  ;;  %v3001_v62 = vld [vmem:[%s3128_s6 + $0x584] sm:$0xf]  ;;  %v2507_v1 = vor.u32 %v2937_v57, %v2504_v59  ;;  %v2302_v56 = vld [vmem:[%s3128_s6 + $0x1e8] sm:$0xf] }
  0x58   : > { %1523 = vmatpush.bf16.msrb.mxu0 %v2567_v11  ;;  %v2760_v63 = vld [vmem:[%s3128_s6 + $0x590] sm:$0xf0]  ;;  %v2635_v2 = vor.u32 %v2969_v60, %v2632_v61  ;;  %v2901_v3 = vld [vmem:[%s3128_s6 + $0x264] sm:$0xf]  ;;  %v2430_v59 = vld [vmem:[%s3128_s6 + $0x2e8] sm:$0xf] }
  0x59   : > { %1536 = vmatpush.bf16.msrb.mxu1 %v2695_v16  ;;  %v2360_v4 = vld [vmem:[%s3128_s6 + $0x270] sm:$0xf0]  ;;  %v2933_v5 = vld [vmem:[%s3128_s6 + $0x364] sm:$0xf]  ;;  %v2763_v6 = vor.u32 %v3001_v62, %v2760_v63  ;;  %v2920_v60 = vld [vmem:[%s3128_s6 + $0x2f4] sm:$0xf0] }
  0x5a   : > { %1549 = vmatpush.bf16.msrb.mxu2 %v2059_v17  ;;  %v2488_v7 = vld [vmem:[%s3128_s6 + $0x370] sm:$0xf0]  ;;  %v2965_v8 = vld [vmem:[%s3128_s6 + $0x464] sm:$0xf]  ;;  %v2363_v12 = vor.u32 %v2901_v3, %v2360_v4  ;;  %v2558_v63 = vld [vmem:[%s3128_s6 + $0x3e8] sm:$0xf]  ;;  %v2431_v4 = vor.u32 %v2920_v60, %v2430_v59 }
  0x5b   : > { %1562 = vmatpush.bf16.msrb.mxu3 %v2187_v25  ;;  %1524 = vmatmul.bf16.vlgmr.msrb.gmra.mxu0 %v3288_v36  ;;  %v2616_v9 = vld [vmem:[%s3128_s6 + $0x470] sm:$0xf0]  ;;  %v2997_v10 = vld [vmem:[%s3128_s6 + $0x564] sm:$0xf]  ;;  %v2491_v13 = vor.u32 %v2933_v5, %v2488_v7  ;;  %v2158_v5 = vld [vmem:[%s3128_s6 + $0xc8] sm:$0xf] }
  0x5c   : > { %1568 = vmatpush.bf16.msra.mxu0 %v2427_v26  ;;  %1537 = vmatmul.bf16.vlgmr.msrb.gmra.mxu1 %v3292_v39  ;;  %v2744_v11 = vld [vmem:[%s3128_s6 + $0x570] sm:$0xf0]  ;;  %v2619_v14 = vor.u32 %v2965_v8, %v2616_v9  ;;  %v2897_v15 = vld [vmem:[%s3128_s6 + $0x244] sm:$0xf]  ;;  %v2286_v7 = vld [vmem:[%s3128_s6 + $0x1c8] sm:$0xf] }
  0x5d   : > { %1581 = vmatpush.bf16.msra.mxu1 %v2555_v27  ;;  %1550 = vmatmul.bf16.vlgmr.msrb.gmra.mxu2 %v3229_v19  ;;  %v2344_v16 = vld [vmem:[%s3128_s6 + $0x250] sm:$0xf0]  ;;  %v2929_v17 = vld [vmem:[%s3128_s6 + $0x344] sm:$0xf]  ;;  %v2747_v18 = vor.u32 %v2997_v10, %v2744_v11  ;;  %v2884_v9 = vld [vmem:[%s3128_s6 + $0x1d4] sm:$0xf0] }
  0x5e   : > { %1594 = vmatpush.bf16.msra.mxu2 %v2683_v28  ;;  %1563 = vmatmul.bf16.vlgmr.msrb.gmra.mxu3 %v3235_v23  ;;  %v2472_v22 = vld [vmem:[%s3128_s6 + $0x350] sm:$0xf0]  ;;  %v2961_v24 = vld [vmem:[%s3128_s6 + $0x444] sm:$0xf]  ;;  %v2347_v28 = vor.u32 %v2897_v15, %v2344_v16  ;;  %v2414_v10 = vld [vmem:[%s3128_s6 + $0x2c8] sm:$0xf]  ;;  %v2287_v15 = vor.u32 %v2884_v9, %v2286_v7 }
  0x5f   : > { %1607 = vmatpush.bf16.msra.mxu3 %v2811_v32  ;;  %v2600_v25 = vld [vmem:[%s3128_s6 + $0x450] sm:$0xf0]  ;;  %v2993_v26 = vld [vmem:[%s3128_s6 + $0x544] sm:$0xf]  ;;  %v2475_v29 = vor.u32 %v2929_v17, %v2472_v22  ;;  %v2916_v11 = vld [vmem:[%s3128_s6 + $0x2d4] sm:$0xf0] }
  0x60   : > { %1569 = vmatpush.bf16.msra.mxu0 %v2411_v40  ;;  %v2728_v27 = vld [vmem:[%s3128_s6 + $0x550] sm:$0xf0]  ;;  %v2603_v30 = vor.u32 %v2961_v24, %v2600_v25  ;;  %v2893_v31 = vld [vmem:[%s3128_s6 + $0x224] sm:$0xf]  ;;  %v2415_v16 = vor.u32 %v2916_v11, %v2414_v10  ;;  %v2142_v17 = vld [vmem:[%s3128_s6 + $0xa8] sm:$0xf] }
  0x61   : > { %1582 = vmatpush.bf16.msra.mxu1 %v2539_v41  ;;  %v2328_v32 = vld [vmem:[%s3128_s6 + $0x230] sm:$0xf0]  ;;  %v2925_v33 = vld [vmem:[%s3128_s6 + $0x324] sm:$0xf]  ;;  %v2731_v34 = vor.u32 %v2993_v26, %v2728_v27  ;;  %v2270_v22 = vld [vmem:[%s3128_s6 + $0x1a8] sm:$0xf] }
  0x62   : > { %1595 = vmatpush.bf16.msra.mxu2 %v2667_v42  ;;  %v2456_v35 = vld [vmem:[%s3128_s6 + $0x330] sm:$0xf0]  ;;  %v2957_v37 = vld [vmem:[%s3128_s6 + $0x424] sm:$0xf]  ;;  %v2331_v42 = vor.u32 %v2893_v31, %v2328_v32  ;;  %v2880_v25 = vld [vmem:[%s3128_s6 + $0x1b4] sm:$0xf0] }
  0x63   : > { %1608 = vmatpush.bf16.msra.mxu3 %v2795_v46  ;;  %v2584_v38 = vld [vmem:[%s3128_s6 + $0x430] sm:$0xf0]  ;;  %v2989_v40 = vld [vmem:[%s3128_s6 + $0x524] sm:$0xf]  ;;  %v2459_v45 = vor.u32 %v2925_v33, %v2456_v35  ;;  %v2398_v26 = vld [vmem:[%s3128_s6 + $0x2a8] sm:$0xf]  ;;  %v2271_v31 = vor.u32 %v2880_v25, %v2270_v22 }
  0x64   : > { %1570 = vmatpush.bf16.msra.mxu0 %v2395_v52  ;;  %v2712_v41 = vld [vmem:[%s3128_s6 + $0x530] sm:$0xf0]  ;;  %v2889_v43 = vld [vmem:[%s3128_s6 + $0x204] sm:$0xf]  ;;  %v2587_v46 = vor.u32 %v2957_v37, %v2584_v38  ;;  %v2912_v27 = vld [vmem:[%s3128_s6 + $0x2b4] sm:$0xf0] }
  0x65   : > { %1583 = vmatpush.bf16.msra.mxu1 %v2523_v53  ;;  %v2312_v44 = vld [vmem:[%s3128_s6 + $0x210] sm:$0xf0]  ;;  %v2921_v47 = vld [vmem:[%s3128_s6 + $0x304] sm:$0xf]  ;;  %v2715_v50 = vor.u32 %v2989_v40, %v2712_v41  ;;  %v2399_v32 = vor.u32 %v2912_v27, %v2398_v26  ;;  %v2126_v33 = vld [vmem:[%s3128_s6 + $0x88] sm:$0xf] }
  0x66   : > { %1596 = vmatpush.bf16.msra.mxu2 %v2651_v54  ;;  %v2440_v48 = vld [vmem:[%s3128_s6 + $0x310] sm:$0xf0]  ;;  %v2953_v49 = vld [vmem:[%s3128_s6 + $0x404] sm:$0xf]  ;;  %v2174_v54 = vld [vmem:[%s3128_s6 + $0xe8] sm:$0xf]  ;;  %v2315_v57 = vor.u32 %v2889_v43, %v2312_v44 }
  0x67   : > { %1609 = vmatpush.bf16.msra.mxu3 %v2779_v58  ;;  %v2568_v51 = vld [vmem:[%s3128_s6 + $0x410] sm:$0xf0]  ;;  %v2985_v52 = vld [vmem:[%s3128_s6 + $0x504] sm:$0xf]  ;;  %v2888_v58 = vld [vmem:[%s3128_s6 + $0x1f4] sm:$0xf0]  ;;  %v2443_v61 = vor.u32 %v2921_v47, %v2440_v48 }
  0x68   : > { %1571 = vmatpush.bf16.msra.mxu0 %v2379_v0  ;;  %v2696_v53 = vld [vmem:[%s3128_s6 + $0x510] sm:$0xf0]  ;;  %v2571_v62 = vor.u32 %v2953_v49, %v2568_v51  ;;  %v2952_v0 = vld [vmem:[%s3128_s6 + $0x3f4] sm:$0xf0]  ;;  %v2303_v3 = vor.u32 %v2888_v58, %v2302_v56  ;;  %v2254_v35 = vld [vmem:[%s3128_s6 + $0x188] sm:$0xf] }
  0x69   : > { %1584 = vmatpush.bf16.msra.mxu1 %v2507_v1  ;;  %v2699_v1 = vor.u32 %v2985_v52, %v2696_v53  ;;  %v2559_v8 = vor.u32 %v2952_v0, %v2558_v63  ;;  %v2876_v38 = vld [vmem:[%s3128_s6 + $0x194] sm:$0xf0]  ;;  %v2382_v40 = vld [vmem:[%s3128_s6 + $0x288] sm:$0xf] }
  0x6a   : > { %1597 = vmatpush.bf16.msra.mxu2 %v2635_v2  ;;  %v2175_v2 = vor.u32 %v2856_v55, %v2174_v54  ;;  %v2908_v41 = vld [vmem:[%s3128_s6 + $0x294] sm:$0xf0]  ;;  %v2110_v47 = vld [vmem:[%s3128_s6 + $0x68] sm:$0xf] }
  0x6b   : > { %1610 = vmatpush.bf16.msra.mxu3 %v2763_v6  ;;  %v2852_v6 = vld [vmem:[%s3128_s6 + $0xd4] sm:$0xf0]  ;;  %v2238_v49 = vld [vmem:[%s3128_s6 + $0x168] sm:$0xf] }
  0x6c   : > { %1572 = vmatpush.bf16.msra.mxu0 %v2363_v12  ;;  %v2542_v12 = vld [vmem:[%s3128_s6 + $0x3c8] sm:$0xf]  ;;  %v2940_v43 = vld [vmem:[%s3128_s6 + $0x394] sm:$0xf0] }
  0x6d   : > { %1585 = vmatpush.bf16.msra.mxu1 %v2491_v13  ;;  %v2948_v13 = vld [vmem:[%s3128_s6 + $0x3d4] sm:$0xf0]  ;;  %v2366_v52 = vld [vmem:[%s3128_s6 + $0x268] sm:$0xf] }
  0x6e   : > { %1598 = vmatpush.bf16.msra.mxu2 %v2619_v14  ;;  %v2159_v14 = vor.u32 %v2852_v6, %v2158_v5  ;;  %v2543_v24 = vor.u32 %v2948_v13, %v2542_v12  ;;  %v2840_v48 = vld [vmem:[%s3128_s6 + $0x74] sm:$0xf0]  ;;  %v2494_v54 = vld [vmem:[%s3128_s6 + $0x368] sm:$0xf] }
  0x6f   : > { %1611 = vmatpush.bf16.msra.mxu3 %v2747_v18  ;;  %v2848_v18 = vld [vmem:[%s3128_s6 + $0xb4] sm:$0xf0]  ;;  %v2111_v56 = vor.u32 %v2840_v48, %v2110_v47  ;;  %v2094_v59 = vld [vmem:[%s3128_s6 + $0x48] sm:$0xf] }
  0x70   : > { %1573 = vmatpush.bf16.msra.mxu0 %v2347_v28  ;;  %v2526_v28 = vld [vmem:[%s3128_s6 + $0x3a8] sm:$0xf]  ;;  %v2872_v51 = vld [vmem:[%s3128_s6 + $0x174] sm:$0xf0] }
  0x71   : > { %1586 = vmatpush.bf16.msra.mxu1 %v2475_v29  ;;  %v2944_v29 = vld [vmem:[%s3128_s6 + $0x3b4] sm:$0xf0]  ;;  %v2350_v0 = vld [vmem:[%s3128_s6 + $0x248] sm:$0xf] }
  0x72   : > { %1599 = vmatpush.bf16.msra.mxu2 %v2603_v30  ;;  %v2143_v30 = vor.u32 %v2848_v18, %v2142_v17  ;;  %v2527_v37 = vor.u32 %v2944_v29, %v2526_v28  ;;  %v2904_v53 = vld [vmem:[%s3128_s6 + $0x274] sm:$0xf0]  ;;  %v2078_v7 = vld [vmem:[%s3128_s6 + $0x28] sm:$0xf] }
  0x73   : > { %1612 = vmatpush.bf16.msra.mxu3 %v2731_v34  ;;  %v2844_v34 = vld [vmem:[%s3128_s6 + $0x94] sm:$0xf0]  ;;  %v2367_v58 = vor.u32 %v2904_v53, %v2366_v52  ;;  %v2206_v9 = vld [vmem:[%s3128_s6 + $0x128] sm:$0xf] }
  0x74   : > { %1574 = vmatpush.bf16.msra.mxu0 %v2331_v42  ;;  %v2510_v42 = vld [vmem:[%s3128_s6 + $0x388] sm:$0xf]  ;;  %v2127_v44 = vor.u32 %v2844_v34, %v2126_v33  ;;  %v2936_v55 = vld [vmem:[%s3128_s6 + $0x374] sm:$0xf0] }
  0x75   : > { %1587 = vmatpush.bf16.msra.mxu1 %v2459_v45  ;;  %v2255_v45 = vor.u32 %v2876_v38, %v2254_v35  ;;  %v2836_v60 = vld [vmem:[%s3128_s6 + $0x54] sm:$0xf0]  ;;  %v2334_v12 = vld [vmem:[%s3128_s6 + $0x228] sm:$0xf]  ;;  %v2854_v38 = vld [vmem:[%s3128_s6 + $0xec] sm:$0xf] }
  0x76   : > { %1600 = vmatpush.bf16.msra.mxu2 %v2587_v46  ;;  %v2383_v46 = vor.u32 %v2908_v41, %v2382_v40  ;;  %v2868_v63 = vld [vmem:[%s3128_s6 + $0x154] sm:$0xf0]  ;;  %v2062_v17 = vld [vmem:[%s3128_s6 + $0x8] sm:$0xf]  ;;  %v2176_v40 = vld [vmem:[%s3128_s6 + $0xf8] sm:$0xf0] }
  0x77   : > { %1613 = vmatpush.bf16.msra.mxu3 %v2715_v50  ;;  %v2511_v50 = vor.u32 %v2940_v43, %v2510_v42  ;;  %v2864_v11 = vld [vmem:[%s3128_s6 + $0x134] sm:$0xf0]  ;;  %v2190_v25 = vld [vmem:[%s3128_s6 + $0x108] sm:$0xf]  ;;  %v2886_v43 = vld [vmem:[%s3128_s6 + $0x1ec] sm:$0xf]  ;;  %v2179_v48 = vor.u32 %v2854_v38, %v2176_v40 }
  0x78   : > { %1575 = vmatpush.bf16.msra.mxu0 %v2315_v57  ;;  %v2239_v57 = vor.u32 %v2872_v51, %v2238_v49  ;;  %v2896_v13 = vld [vmem:[%s3128_s6 + $0x234] sm:$0xf0]  ;;  %v2207_v22 = vor.u32 %v2864_v11, %v2206_v9  ;;  %v2318_v27 = vld [vmem:[%s3128_s6 + $0x208] sm:$0xf] }
  0x79   : > { %1588 = vmatpush.bf16.msra.mxu1 %v2443_v61  ;;  %v2222_v61 = vld [vmem:[%s3128_s6 + $0x148] sm:$0xf]  ;;  %v2828_v18 = vld [vmem:[%s3128_s6 + $0x14] sm:$0xf0] }
  0x7a   : > { %1601 = vmatpush.bf16.msra.mxu2 %v2571_v62  ;;  %v2495_v62 = vor.u32 %v2936_v55, %v2494_v54  ;;  %v2223_v5 = vor.u32 %v2868_v63, %v2222_v61  ;;  %v2860_v26 = vld [vmem:[%s3128_s6 + $0x114] sm:$0xf0]  ;;  %v2814_v34 = vld [vmem:[%s3128_s6 + $0x5e8] sm:$0xf]  ;;  %v2063_v35 = vor.u32 %v2828_v18, %v2062_v17  ;;  %v2850_v54 = vld [vmem:[%s3128_s6 + $0xcc] sm:$0xf] }
  0x7b   : > { %1614 = vmatpush.bf16.msra.mxu3 %v2699_v1  ;;  %1576 = vmatmul.bf16.vlgmr.msra.gmra.mxu0 %v3231_v20  ;;  %v2900_v1 = vld [vmem:[%s3128_s6 + $0x254] sm:$0xf0]  ;;  %v2191_v41 = vor.u32 %v2860_v26, %v2190_v25  ;;  %v2670_v49 = vld [vmem:[%s3128_s6 + $0x4c8] sm:$0xf]  ;;  %v2160_v55 = vld [vmem:[%s3128_s6 + $0xd8] sm:$0xf0] }
  0x7c   : > { %1620 = vmatpush.bf16.msrb.mxu0 %v2175_v2  ;;  %1589 = vmatmul.bf16.vlgmr.msra.gmra.mxu1 %v3233_v21  ;;  %v2478_v2 = vld [vmem:[%s3128_s6 + $0x348] sm:$0xf]  ;;  %v2351_v6 = vor.u32 %v2900_v1, %v2350_v0  ;;  %v2892_v29 = vld [vmem:[%s3128_s6 + $0x214] sm:$0xf0]  ;;  %v2256_v17 = vld [vmem:[%s3128_s6 + $0x198] sm:$0xf0] }
  0x7d   : > { %1633 = vmatpush.bf16.msrb.mxu1 %v2303_v3  ;;  %1602 = vmatmul.bf16.vlgmr.msra.gmra.mxu2 %v3288_v36  ;;  %v2932_v3 = vld [vmem:[%s3128_s6 + $0x354] sm:$0xf0]  ;;  %v2319_v42 = vor.u32 %v2892_v29, %v2318_v27  ;;  %v2798_v51 = vld [vmem:[%s3128_s6 + $0x5c8] sm:$0xf] }
  0x7e   : > { %1646 = vmatpush.bf16.msrb.mxu2 %v2431_v4  ;;  %1615 = vmatmul.bf16.vlgmr.msra.gmra.mxu3 %v3292_v39  ;;  %v2095_v4 = vor.u32 %v2836_v60, %v2094_v59  ;;  %v2479_v10 = vor.u32 %v2932_v3, %v2478_v2  ;;  %v2984_v33 = vld [vmem:[%s3128_s6 + $0x4f4] sm:$0xf0]  ;;  %v2163_v60 = vor.u32 %v2850_v54, %v2160_v55  ;;  %v2654_v61 = vld [vmem:[%s3128_s6 + $0x4a8] sm:$0xf]  ;;  %v2846_v2 = vld [vmem:[%s3128_s6 + $0xac] sm:$0xf] }
  0x7f   : > { %1659 = vmatpush.bf16.msrb.mxu3 %v2559_v8  ;;  %v2832_v8 = vld [vmem:[%s3128_s6 + $0x34] sm:$0xf0]  ;;  %v2782_v63 = vld [vmem:[%s3128_s6 + $0x5a8] sm:$0xf]  ;;  %v2144_v3 = vld [vmem:[%s3128_s6 + $0xb8] sm:$0xf0] }
  0x80   : > { %1621 = vmatpush.bf16.msrb.mxu0 %v2159_v14  ;;  %v2462_v14 = vld [vmem:[%s3128_s6 + $0x328] sm:$0xf]  ;;  %v3012_v53 = vld [vmem:[%s3128_s6 + $0x5d4] sm:$0xf0] }
  0x81   : > { %1634 = vmatpush.bf16.msrb.mxu1 %v2287_v15  ;;  %v2928_v15 = vld [vmem:[%s3128_s6 + $0x334] sm:$0xf0]  ;;  %v2799_v59 = vor.u32 %v3012_v53, %v2798_v51  ;;  %v2638_v9 = vld [vmem:[%s3128_s6 + $0x488] sm:$0xf] }
  0x82   : > { %1647 = vmatpush.bf16.msrb.mxu2 %v2415_v16  ;;  %v2079_v16 = vor.u32 %v2832_v8, %v2078_v7  ;;  %v2463_v28 = vor.u32 %v2928_v15, %v2462_v14  ;;  %v3008_v1 = vld [vmem:[%s3128_s6 + $0x5b4] sm:$0xf0]  ;;  %v2147_v8 = vor.u32 %v2846_v2, %v2144_v3  ;;  %v2766_v11 = vld [vmem:[%s3128_s6 + $0x588] sm:$0xf]  ;;  %v2842_v14 = vld [vmem:[%s3128_s6 + $0x8c] sm:$0xf] }
  0x83   : > { %1660 = vmatpush.bf16.msrb.mxu3 %v2543_v24  ;;  %v2335_v24 = vor.u32 %v2896_v13, %v2334_v12  ;;  %v2783_v7 = vor.u32 %v3008_v1, %v2782_v63  ;;  %v3004_v13 = vld [vmem:[%s3128_s6 + $0x594] sm:$0xf0]  ;;  %v2128_v15 = vld [vmem:[%s3128_s6 + $0x98] sm:$0xf0]  ;;  %v2622_v25 = vld [vmem:[%s3128_s6 + $0x468] sm:$0xf] }
  0x84   : > { %1622 = vmatpush.bf16.msrb.mxu0 %v2143_v30  ;;  %v2446_v30 = vld [vmem:[%s3128_s6 + $0x308] sm:$0xf]  ;;  %v2968_v26 = vld [vmem:[%s3128_s6 + $0x474] sm:$0xf0]  ;;  %v2826_v3 = vld [vmem:[%s3128_s6 + $0xc] sm:$0xf] }
  0x85   : > { %1635 = vmatpush.bf16.msrb.mxu1 %v2271_v31  ;;  %v2924_v31 = vld [vmem:[%s3128_s6 + $0x314] sm:$0xf0]  ;;  %v2750_v27 = vld [vmem:[%s3128_s6 + $0x568] sm:$0xf] }
  0x86   : > { %1648 = vmatpush.bf16.msrb.mxu2 %v2399_v32  ;;  %v2686_v32 = vld [vmem:[%s3128_s6 + $0x4e8] sm:$0xf]  ;;  %v3000_v29 = vld [vmem:[%s3128_s6 + $0x574] sm:$0xf0] }
  0x87   : > { %1661 = vmatpush.bf16.msrb.mxu3 %v2527_v37  ;;  %v3016_v37 = vld [vmem:[%s3128_s6 + $0x5f4] sm:$0xf0]  ;;  %v2606_v38 = vld [vmem:[%s3128_s6 + $0x448] sm:$0xf] }
  0x88   : > { %1623 = vmatpush.bf16.msrb.mxu0 %v2127_v44  ;;  %v2304_v44 = vld [vmem:[%s3128_s6 + $0x1f8] sm:$0xf0]  ;;  %v2815_v47 = vor.u32 %v3016_v37, %v2814_v34  ;;  %v2623_v34 = vor.u32 %v2968_v26, %v2622_v25  ;;  %v2964_v40 = vld [vmem:[%s3128_s6 + $0x454] sm:$0xf0]  ;;  %v2590_v51 = vld [vmem:[%s3128_s6 + $0x428] sm:$0xf] }
  0x89   : > { %1636 = vmatpush.bf16.msrb.mxu1 %v2255_v45  ;;  %v2447_v45 = vor.u32 %v2924_v31, %v2446_v30  ;;  %v2307_v52 = vor.u32 %v2886_v43, %v2304_v44  ;;  %v2838_v30 = vld [vmem:[%s3128_s6 + $0x6c] sm:$0xf]  ;;  %v2112_v31 = vld [vmem:[%s3128_s6 + $0x78] sm:$0xf0]  ;;  %v2996_v43 = vld [vmem:[%s3128_s6 + $0x554] sm:$0xf0] }
  0x8a   : > { %1649 = vmatpush.bf16.msrb.mxu2 %v2383_v46  ;;  %v2687_v46 = vor.u32 %v2984_v33, %v2686_v32  ;;  %v2870_v32 = vld [vmem:[%s3128_s6 + $0x16c] sm:$0xf]  ;;  %v2240_v33 = vld [vmem:[%s3128_s6 + $0x178] sm:$0xf0]  ;;  %v2115_v37 = vor.u32 %v2838_v30, %v2112_v31  ;;  %v2718_v53 = vld [vmem:[%s3128_s6 + $0x528] sm:$0xf] }
  0x8b   : > { %1662 = vmatpush.bf16.msrb.mxu3 %v2511_v50  ;;  %v2980_v50 = vld [vmem:[%s3128_s6 + $0x4d4] sm:$0xf0]  ;;  %v2834_v44 = vld [vmem:[%s3128_s6 + $0x4c] sm:$0xf]  ;;  %v2702_v1 = vld [vmem:[%s3128_s6 + $0x508] sm:$0xf] }
  0x8c   : > { %1624 = vmatpush.bf16.msrb.mxu0 %v2111_v56  ;;  %v2882_v56 = vld [vmem:[%s3128_s6 + $0x1cc] sm:$0xf]  ;;  %v2992_v55 = vld [vmem:[%s3128_s6 + $0x534] sm:$0xf0]  ;;  %v2544_v31 = vld [vmem:[%s3128_s6 + $0x3d8] sm:$0xf0] }
  0x8d   : > { %1637 = vmatpush.bf16.msrb.mxu1 %v2239_v57  ;;  %v2288_v57 = vld [vmem:[%s3128_s6 + $0x1d8] sm:$0xf0]  ;;  %v2719_v63 = vor.u32 %v2992_v55, %v2718_v53  ;;  %v2988_v2 = vld [vmem:[%s3128_s6 + $0x514] sm:$0xf0]  ;;  %v2906_v53 = vld [vmem:[%s3128_s6 + $0x28c] sm:$0xf] }
  0x8e   : > { %1650 = vmatpush.bf16.msrb.mxu2 %v2367_v58  ;;  %v2671_v58 = vor.u32 %v2980_v50, %v2670_v49  ;;  %v2291_v0 = vor.u32 %v2882_v56, %v2288_v57  ;;  %v2830_v56 = vld [vmem:[%s3128_s6 + $0x2c] sm:$0xf]  ;;  %v2080_v57 = vld [vmem:[%s3128_s6 + $0x38] sm:$0xf0] }
  0x8f   : > { %1663 = vmatpush.bf16.msrb.mxu3 %v2495_v62  ;;  %v2976_v62 = vld [vmem:[%s3128_s6 + $0x4b4] sm:$0xf0]  ;;  %v2512_v55 = vld [vmem:[%s3128_s6 + $0x398] sm:$0xf0] }
  0x90   : > { %1625 = vmatpush.bf16.msrb.mxu0 %v2095_v4  ;;  %v2878_v4 = vld [vmem:[%s3128_s6 + $0x1ac] sm:$0xf] }
  0x91   : > { %1638 = vmatpush.bf16.msrb.mxu1 %v2223_v5  ;;  %v2272_v5 = vld [vmem:[%s3128_s6 + $0x1b8] sm:$0xf0] }
  0x92   : > { %1651 = vmatpush.bf16.msrb.mxu2 %v2351_v6  ;;  %v2655_v6 = vor.u32 %v2976_v62, %v2654_v61  ;;  %v2275_v12 = vor.u32 %v2878_v4, %v2272_v5  ;;  %v2574_v61 = vld [vmem:[%s3128_s6 + $0x408] sm:$0xf]  ;;  %v2956_v62 = vld [vmem:[%s3128_s6 + $0x414] sm:$0xf0]  ;;  %v2064_v5 = vld [vmem:[%s3128_s6 + $0x18] sm:$0xf0] }
  0x93   : > { %1664 = vmatpush.bf16.msrb.mxu3 %v2479_v10  ;;  %v2972_v10 = vld [vmem:[%s3128_s6 + $0x494] sm:$0xf0] }
  0x94   : > { %1626 = vmatpush.bf16.msrb.mxu0 %v2079_v16  ;;  %v2874_v16 = vld [vmem:[%s3128_s6 + $0x18c] sm:$0xf]  ;;  %v2639_v18 = vor.u32 %v2972_v10, %v2638_v9  ;;  %v2432_v9 = vld [vmem:[%s3128_s6 + $0x2f8] sm:$0xf0] }
  0x95   : > { %1639 = vmatpush.bf16.msrb.mxu1 %v2207_v22  ;;  %v2767_v22 = vor.u32 %v3004_v13, %v2766_v11  ;;  %v2950_v10 = vld [vmem:[%s3128_s6 + $0x3ec] sm:$0xf]  ;;  %v2575_v11 = vor.u32 %v2956_v62, %v2574_v61 }
  0x96   : > { %1652 = vmatpush.bf16.msrb.mxu2 %v2335_v24  ;;  %v2131_v24 = vor.u32 %v2842_v14, %v2128_v15  ;;  %v2982_v13 = vld [vmem:[%s3128_s6 + $0x4ec] sm:$0xf]  ;;  %v2688_v14 = vld [vmem:[%s3128_s6 + $0x4f8] sm:$0xf0]  ;;  %v2703_v15 = vor.u32 %v2988_v2, %v2702_v1 }
  0x97   : > { %1665 = vmatpush.bf16.msrb.mxu3 %v2463_v28  ;;  %v2259_v28 = vor.u32 %v2874_v16, %v2256_v17  ;;  %v2067_v16 = vor.u32 %v2826_v3, %v2064_v5  ;;  %v3014_v17 = vld [vmem:[%s3128_s6 + $0x5ec] sm:$0xf]  ;;  %v2691_v26 = vor.u32 %v2982_v13, %v2688_v14  ;;  %v2496_v3 = vld [vmem:[%s3128_s6 + $0x378] sm:$0xf0] }
  0x98   : > { %1627 = vmatpush.bf16.msrb.mxu0 %v2063_v35  ;;  %v2751_v35 = vor.u32 %v3000_v29, %v2750_v27  ;;  %v2914_v27 = vld [vmem:[%s3128_s6 + $0x2cc] sm:$0xf]  ;;  %v2624_v5 = vld [vmem:[%s3128_s6 + $0x478] sm:$0xf0] }
  0x99   : > { %1640 = vmatpush.bf16.msrb.mxu1 %v2191_v41  ;;  %v2734_v41 = vld [vmem:[%s3128_s6 + $0x548] sm:$0xf]  ;;  %v2946_v29 = vld [vmem:[%s3128_s6 + $0x3cc] sm:$0xf] }
  0x9a   : > { %1653 = vmatpush.bf16.msrb.mxu2 %v2319_v42  ;;  %v2243_v42 = vor.u32 %v2870_v32, %v2240_v33  ;;  %v2735_v49 = vor.u32 %v2996_v43, %v2734_v41  ;;  %v2978_v32 = vld [vmem:[%s3128_s6 + $0x4cc] sm:$0xf]  ;;  %v2672_v33 = vld [vmem:[%s3128_s6 + $0x4d8] sm:$0xf0] }
  0x9b   : > { %1666 = vmatpush.bf16.msrb.mxu3 %v2447_v45  ;;  %1628 = vmatmul.bf16.vlgmr.msrb.gmra.mxu0 %v3229_v19  ;;  %v2096_v45 = vld [vmem:[%s3128_s6 + $0x58] sm:$0xf0]  ;;  %v2910_v41 = vld [vmem:[%s3128_s6 + $0x2ac] sm:$0xf] }
  0x9c   : > { %1672 = vmatpush.bf16.msra.mxu0 %v2687_v46  ;;  %1641 = vmatmul.bf16.vlgmr.msrb.gmra.mxu1 %v3235_v23  ;;  %v2866_v46 = vld [vmem:[%s3128_s6 + $0x14c] sm:$0xf]  ;;  %v2099_v50 = vor.u32 %v2834_v44, %v2096_v45  ;;  %v2528_v45 = vld [vmem:[%s3128_s6 + $0x3b8] sm:$0xf0] }
  0x9d   : > { %1685 = vmatpush.bf16.msra.mxu1 %v2815_v47  ;;  %1654 = vmatmul.bf16.vlgmr.msrb.gmra.mxu2 %v3231_v20  ;;  %v2224_v47 = vld [vmem:[%s3128_s6 + $0x158] sm:$0xf0]  ;;  %v2942_v43 = vld [vmem:[%s3128_s6 + $0x3ac] sm:$0xf] }
  0x9e   : > { %1698 = vmatpush.bf16.msra.mxu2 %v2179_v48  ;;  %1667 = vmatmul.bf16.vlgmr.msrb.gmra.mxu3 %v3233_v21  ;;  %v2607_v48 = vor.u32 %v2964_v40, %v2606_v38  ;;  %v2227_v54 = vor.u32 %v2866_v46, %v2224_v47  ;;  %v2547_v38 = vor.u32 %v2946_v29, %v2544_v31  ;;  %v2974_v46 = vld [vmem:[%s3128_s6 + $0x4ac] sm:$0xf]  ;;  %v2656_v47 = vld [vmem:[%s3128_s6 + $0x4b8] sm:$0xf0] }
  0x9f   : > { %1711 = vmatpush.bf16.msra.mxu3 %v2307_v52  ;;  %v2960_v52 = vld [vmem:[%s3128_s6 + $0x434] sm:$0xf0]  ;;  %v2675_v40 = vor.u32 %v2978_v32, %v2672_v33  ;;  %v2934_v1 = vld [vmem:[%s3128_s6 + $0x36c] sm:$0xf]  ;;  %v2336_v29 = vld [vmem:[%s3128_s6 + $0x238] sm:$0xf0] }
  0xa0   : > { %1673 = vmatpush.bf16.msra.mxu0 %v2671_v58  ;;  %v2862_v58 = vld [vmem:[%s3128_s6 + $0x12c] sm:$0xf]  ;;  %v2464_v33 = vld [vmem:[%s3128_s6 + $0x338] sm:$0xf0] }
  0xa1   : > { %1686 = vmatpush.bf16.msra.mxu1 %v2799_v59  ;;  %v2208_v59 = vld [vmem:[%s3128_s6 + $0x138] sm:$0xf0]  ;;  %v2930_v13 = vld [vmem:[%s3128_s6 + $0x34c] sm:$0xf] }
  0xa2   : > { %1699 = vmatpush.bf16.msra.mxu2 %v2163_v60  ;;  %v2591_v60 = vor.u32 %v2960_v52, %v2590_v51  ;;  %v2211_v4 = vor.u32 %v2862_v58, %v2208_v59  ;;  %v2531_v51 = vor.u32 %v2942_v43, %v2528_v45  ;;  %v2659_v52 = vor.u32 %v2974_v46, %v2656_v47  ;;  %v3002_v58 = vld [vmem:[%s3128_s6 + $0x58c] sm:$0xf]  ;;  %v2768_v59 = vld [vmem:[%s3128_s6 + $0x598] sm:$0xf0] }
  0xa3   : > { %1712 = vmatpush.bf16.msra.mxu3 %v2291_v0  ;;  %v2083_v0 = vor.u32 %v2830_v56, %v2080_v57  ;;  %v2970_v56 = vld [vmem:[%s3128_s6 + $0x48c] sm:$0xf]  ;;  %v2640_v57 = vld [vmem:[%s3128_s6 + $0x498] sm:$0xf0]  ;;  %v2771_v2 = vor.u32 %v3002_v58, %v2768_v59 }
  0xa4   : > { %1674 = vmatpush.bf16.msra.mxu0 %v2655_v6  ;;  %v2858_v6 = vld [vmem:[%s3128_s6 + $0x10c] sm:$0xf]  ;;  %v2643_v62 = vor.u32 %v2970_v56, %v2640_v57  ;;  %v2448_v47 = vld [vmem:[%s3128_s6 + $0x318] sm:$0xf0] }
  0xa5   : > { %1687 = vmatpush.bf16.msra.mxu1 %v2783_v7  ;;  %v2192_v7 = vld [vmem:[%s3128_s6 + $0x118] sm:$0xf0]  ;;  %v2890_v43 = vld [vmem:[%s3128_s6 + $0x20c] sm:$0xf] }
  0xa6   : > { %1700 = vmatpush.bf16.msra.mxu2 %v2147_v8  ;;  %v2918_v8 = vld [vmem:[%s3128_s6 + $0x2ec] sm:$0xf] }
  0xa7   : > { %1713 = vmatpush.bf16.msra.mxu3 %v2275_v12  ;;  %v2560_v12 = vld [vmem:[%s3128_s6 + $0x3f8] sm:$0xf0]  ;;  %v2922_v45 = vld [vmem:[%s3128_s6 + $0x30c] sm:$0xf] }
  0xa8   : > { %1675 = vmatpush.bf16.msra.mxu0 %v2639_v18  ;;  %v2816_v18 = vld [vmem:[%s3128_s6 + $0x5f8] sm:$0xf0]  ;;  %v2563_v25 = vor.u32 %v2950_v10, %v2560_v12 }
  0xa9   : > { %1688 = vmatpush.bf16.msra.mxu1 %v2767_v22  ;;  %v2195_v22 = vor.u32 %v2858_v6, %v2192_v7  ;;  %v2819_v30 = vor.u32 %v3014_v17, %v2816_v18  ;;  %v2998_v6 = vld [vmem:[%s3128_s6 + $0x56c] sm:$0xf]  ;;  %v2752_v7 = vld [vmem:[%s3128_s6 + $0x578] sm:$0xf0] }
  0xaa   : > { %1701 = vmatpush.bf16.msra.mxu2 %v2131_v24  ;;  %v2435_v24 = vor.u32 %v2918_v8, %v2432_v9  ;;  %v2499_v9 = vor.u32 %v2934_v1, %v2496_v3  ;;  %v2352_v12 = vld [vmem:[%s3128_s6 + $0x258] sm:$0xf0]  ;;  %v2755_v14 = vor.u32 %v2998_v6, %v2752_v7  ;;  %v2994_v18 = vld [vmem:[%s3128_s6 + $0x54c] sm:$0xf] }
  0xab   : > { %1714 = vmatpush.bf16.msra.mxu3 %v2259_v28  ;;  %v2416_v28 = vld [vmem:[%s3128_s6 + $0x2d8] sm:$0xf0] }
  0xac   : > { %1676 = vmatpush.bf16.msra.mxu0 %v2623_v34  ;;  %v3010_v34 = vld [vmem:[%s3128_s6 + $0x5cc] sm:$0xf]  ;;  %v2608_v17 = vld [vmem:[%s3128_s6 + $0x458] sm:$0xf0] }
  0xad   : > { %1689 = vmatpush.bf16.msra.mxu1 %v2751_v35  ;;  %v2800_v35 = vld [vmem:[%s3128_s6 + $0x5d8] sm:$0xf0] }
  0xae   : > { %1702 = vmatpush.bf16.msra.mxu2 %v2115_v37  ;;  %v2419_v37 = vor.u32 %v2914_v27, %v2416_v28  ;;  %v2803_v44 = vor.u32 %v3010_v34, %v2800_v35  ;;  %v2894_v28 = vld [vmem:[%s3128_s6 + $0x22c] sm:$0xf]  ;;  %v2592_v35 = vld [vmem:[%s3128_s6 + $0x438] sm:$0xf0] }
  0xaf   : > { %1715 = vmatpush.bf16.msra.mxu3 %v2243_v42  ;;  %v2400_v42 = vld [vmem:[%s3128_s6 + $0x2b8] sm:$0xf0]  ;;  %v2958_v34 = vld [vmem:[%s3128_s6 + $0x42c] sm:$0xf] }
  0xb0   : > { %1677 = vmatpush.bf16.msra.mxu0 %v2607_v48  ;;  %v3006_v48 = vld [vmem:[%s3128_s6 + $0x5ac] sm:$0xf] }
  0xb1   : > { %1690 = vmatpush.bf16.msra.mxu1 %v2735_v49  ;;  %v2784_v49 = vld [vmem:[%s3128_s6 + $0x5b8] sm:$0xf0] }
  0xb2   : > { %1703 = vmatpush.bf16.msra.mxu2 %v2099_v50  ;;  %v2403_v50 = vor.u32 %v2910_v41, %v2400_v42  ;;  %v2595_v42 = vor.u32 %v2958_v34, %v2592_v35 }
  0xb3   : > { %1716 = vmatpush.bf16.msra.mxu3 %v2227_v54  ;;  %v2938_v54 = vld [vmem:[%s3128_s6 + $0x38c] sm:$0xf] }
  0xb4   : > { %1678 = vmatpush.bf16.msra.mxu0 %v2591_v60  ;;  %v2515_v61 = vor.u32 %v2938_v54, %v2512_v55 }
  0xb5   : > { %1691 = vmatpush.bf16.msra.mxu1 %v2719_v63  ;;  %v2902_v63 = vld [vmem:[%s3128_s6 + $0x26c] sm:$0xf] }
  0xb6   : > { %1704 = vmatpush.bf16.msra.mxu2 %v2083_v0  ;;  %v2368_v0 = vld [vmem:[%s3128_s6 + $0x278] sm:$0xf0] }
  0xb7   : > { %1717 = vmatpush.bf16.msra.mxu3 %v2211_v4  ;;  %v2966_v4 = vld [vmem:[%s3128_s6 + $0x46c] sm:$0xf]  ;;  %v2371_v8 = vor.u32 %v2902_v63, %v2368_v0 }
  0xb8   : > { %1679 = vmatpush.bf16.msra.mxu0 %v2575_v11  ;;  %v2627_v10 = vor.u32 %v2966_v4, %v2624_v5  ;;  %v2898_v11 = vld [vmem:[%s3128_s6 + $0x24c] sm:$0xf] }
  0xb9   : > { %1692 = vmatpush.bf16.msra.mxu1 %v2703_v15  ;;  %v2480_v15 = vld [vmem:[%s3128_s6 + $0x358] sm:$0xf0] }
  0xba   : > { %1705 = vmatpush.bf16.msra.mxu2 %v2067_v16  ;;  %v2962_v16 = vld [vmem:[%s3128_s6 + $0x44c] sm:$0xf] }
  0xbb   : > { %1718 = vmatpush.bf16.msra.mxu3 %v2195_v22  ;;  %1680 = vmatmul.bf16.vlgmr.msra.gmra.mxu0 %v3288_v36  ;;  %v2736_v22 = vld [vmem:[%s3128_s6 + $0x558] sm:$0xf0]  ;;  %v2611_v27 = vor.u32 %v2962_v16, %v2608_v17 }
  0xbc   : > { %1724 = vmatpush.bf16.msrb.mxu0 %v2435_v24  ;;  %1693 = vmatmul.bf16.vlgmr.msra.gmra.mxu1 %v3292_v39  ;;  %v2739_v32 = vor.u32 %v2994_v18, %v2736_v22 }
  0xbd   : > { %1737 = vmatpush.bf16.msrb.mxu1 %v2563_v25  ;;  %1706 = vmatmul.bf16.vlgmr.msra.gmra.mxu2 %v3229_v19  ;;  %v2384_v19 = vld [vmem:[%s3128_s6 + $0x298] sm:$0xf0]  ;;  %v2355_v25 = vor.u32 %v2898_v11, %v2352_v12 }
  0xbe   : > { %1750 = vmatpush.bf16.msrb.mxu2 %v2691_v26  ;;  %1719 = vmatmul.bf16.vlgmr.msra.gmra.mxu3 %v3235_v23  ;;  %v2787_v23 = vor.u32 %v3006_v48, %v2784_v49  ;;  %v2387_v60 = vor.u32 %v2906_v53, %v2384_v19  ;;  %v2483_v26 = vor.u32 %v2930_v13, %v2480_v15  ;;  %v2954_v48 = vld [vmem:[%s3128_s6 + $0x40c] sm:$0xf]  ;;  %v2576_v49 = vld [vmem:[%s3128_s6 + $0x418] sm:$0xf0]  ;;  %v285_v15 = vld [vmem:[#allocation2] sm:$0xff] }
  0xbf   : > { %1763 = vmatpush.bf16.msrb.mxu3 %v2819_v30  ;;  %v2926_v30 = vld [vmem:[%s3128_s6 + $0x32c] sm:$0xf]  ;;  %v2704_v53 = vld [vmem:[%s3128_s6 + $0x518] sm:$0xf0]  ;;  %v2579_v55 = vor.u32 %v2954_v48, %v2576_v49 }
  0xc0   : > { %1725 = vmatpush.bf16.msrb.mxu0 %v2419_v37  ;;  %v2990_v37 = vld [vmem:[%s3128_s6 + $0x52c] sm:$0xf]  ;;  %v2467_v41 = vor.u32 %v2926_v30, %v2464_v33 }
  0xc1   : > { %1738 = vmatpush.bf16.msrb.mxu1 %v2547_v38  ;;  %v1486_v31 = vpop.f32.mrf.mxu1  ;;  %v2720_v38 = vld [vmem:[%s3128_s6 + $0x538] sm:$0xf0] }
  0xc2   : > { %1751 = vmatpush.bf16.msrb.mxu2 %v2675_v40  ;;  %v1473_v24 = vpop.f32.mrf.mxu0  ;;  %v2339_v40 = vor.u32 %v2894_v28, %v2336_v29  ;;  %v2723_v46 = vor.u32 %v2990_v37, %v2720_v38 }
  0xc3   : > { %1764 = vmatpush.bf16.msrb.mxu3 %v2803_v44  ;;  %v2320_v44 = vld [vmem:[%s3128_s6 + $0x218] sm:$0xf0]  ;;  %v1487_v58 = vadd.f32 %v1486_v31, %v1473_v24 }
  0xc4   : > { %1726 = vmatpush.bf16.msrb.mxu0 %v2403_v50  ;;  %v1499_v50 = vpop.f32.mrf.mxu2  ;;  %v2323_v54 = vor.u32 %v2890_v43, %v2320_v44 }
  0xc5   : > { %1739 = vmatpush.bf16.msrb.mxu1 %v2531_v51  ;;  %v1512_v51 = vpop.f32.mrf.mxu3  ;;  %v1500_v59 = vadd.f32 %v1499_v50, %v1487_v58  ;;  %v287_v58 = vld [vmem:[#allocation2 + $0x8] sm:$0xff] }
  0xc6   : > { %1752 = vmatpush.bf16.msrb.mxu2 %v2659_v52  ;;  %v2986_v52 = vld [vmem:[%s3128_s6 + $0x50c] sm:$0xf] }
  0xc7   : > { %1765 = vmatpush.bf16.msrb.mxu3 %v2787_v23  ;;  %v2451_v23 = vor.u32 %v2922_v45, %v2448_v47  ;;  %v2707_v57 = vor.u32 %v2986_v52, %v2704_v53 }
  0xc8   : > { %1727 = vmatpush.bf16.msrb.mxu0 %v2387_v60 }
  0xc9   : > { %1740 = vmatpush.bf16.msrb.mxu1 %v2515_v61  ;;  %v1488_v56 = vpop.f32.mrf.mxu1 }
  0xca   : > { %1753 = vmatpush.bf16.msrb.mxu2 %v2643_v62  ;;  %v1475_v19 = vpop.f32.mrf.mxu0  ;;  %v1513_v62 = vadd.f32 %v1512_v51, %v1500_v59 }
  0xcb   : > { %1766 = vmatpush.bf16.msrb.mxu3 %v2771_v2  ;;  %v284_v2 = vld [vmem:[#allocation2 + $0x10] sm:$0xff] }
  0xcc   : > { %1728 = vmatpush.bf16.msrb.mxu0 %v2371_v8  ;;  %v1501_v60 = vpop.f32.mrf.mxu2 }
  0xcd   : > { %1741 = vmatpush.bf16.msrb.mxu1 %v2499_v9  ;;  %v1514_v61 = vpop.f32.mrf.mxu3 }
  0xce   : > { %1754 = vmatpush.bf16.msrb.mxu2 %v2627_v10 }
  0xcf   : > { %1767 = vmatpush.bf16.msrb.mxu3 %v2755_v14 }
  0xd0   : > { %1729 = vmatpush.bf16.msrb.mxu0 %v2355_v25 }
  0xd1   : > { %1742 = vmatpush.bf16.msrb.mxu1 %v2483_v26 }
  0xd2   : > { %1755 = vmatpush.bf16.msrb.mxu2 %v2611_v27 }
  0xd3   : > { %1768 = vmatpush.bf16.msrb.mxu3 %v2739_v32 }
  0xd4   : > { %1730 = vmatpush.bf16.msrb.mxu0 %v2339_v40 }
  0xd5   : > { %1743 = vmatpush.bf16.msrb.mxu1 %v2467_v41  ;;  %v286_v41 = vld [vmem:[#allocation2 + $0x18] sm:$0xff] }
  0xd6   : > { %1756 = vmatpush.bf16.msrb.mxu2 %v2595_v42 }
  0xd7   : > { %1769 = vmatpush.bf16.msrb.mxu3 %v2723_v46 }
  0xd8   : > { %1731 = vmatpush.bf16.msrb.mxu0 %v2323_v54  ;;  %v1525_v63 = vpop.f32.mrf.mxu0 }
  0xd9   : > { %1744 = vmatpush.bf16.msrb.mxu1 %v2451_v23  ;;  %v1526_v0 = vadd.f32 %v1525_v63, %v1513_v62  ;;  %v1538_v1 = vpop.f32.mrf.mxu1 }
  0xda   : > { %1757 = vmatpush.bf16.msrb.mxu2 %v2579_v55 }
  0xdb   : > { %1770 = vmatpush.bf16.msrb.mxu3 %v2707_v57  ;;  %1732 = vmatmul.bf16.vlgmr.msrb.gmra.mxu0 %v3231_v20  ;;  %v1539_v3 = vadd.f32 %v1538_v1, %v1526_v0 }
  0xdc   : > { %1745 = vmatmul.bf16.vlgmr.msrb.gmra.mxu1 %v3233_v21 }
  0xdd   : > { %1758 = vmatmul.bf16.vlgmr.msrb.gmra.mxu2 %v3288_v36  ;;  %v1776_v4 = vadd.f32 %v1539_v3, %v284_v2 }
  0xde   : > { %1771 = vmatmul.bf16.vlgmr.msrb.gmra.mxu3 %v3292_v39 }
  0xdf   : > { %1780 = vst [vmem:[#allocation2 + $0x10] sm:$0xff] %v1776_v4 }
  0xe0   : > { %v1551_v5 = vpop.f32.mrf.mxu2  ;;  %v1527_v7 = vpop.f32.mrf.mxu0 }
  0xe1   : > { %v1564_v6 = vpop.f32.mrf.mxu3  ;;  %v1540_v8 = vpop.f32.mrf.mxu1 }
  0xe2   : > { %v1565_v10 = vadd.f32 %v1564_v6, %v1551_v5 }
  0xe8   : > { %v1553_v9 = vpop.f32.mrf.mxu2 }
  0xe9   : > { %v1566_v20 = vpop.f32.mrf.mxu3 }
  0xf8   : > { %v1577_v21 = vpop.f32.mrf.mxu0 }
  0xf9   : > { %v1578_v11 = vadd.f32 %v1577_v21, %v1565_v10  ;;  %v1590_v36 = vpop.f32.mrf.mxu1 }
  0xfb   : > { %v1591_v12 = vadd.f32 %v1590_v36, %v1578_v11 }
 0x100   : > { %v1603_v39 = vpop.f32.mrf.mxu2  ;;  %v1579_v17 = vpop.f32.mrf.mxu0 }
 0x101   : > { %v1604_v13 = vadd.f32 %v1603_v39, %v1591_v12  ;;  %v1616_v14 = vpop.f32.mrf.mxu3  ;;  %v1592_v18 = vpop.f32.mrf.mxu1 }
 0x103   : > { %v1617_v16 = vadd.f32 %v1616_v14, %v1604_v13 }
 0x105   : > { %v1777_v22 = vadd.f32 %v1617_v16, %v285_v15 }
 0x107   : > { %1781 = vst [vmem:[#allocation2] sm:$0xff] %v1777_v22 }
 0x108   : > { %v1605_v24 = vpop.f32.mrf.mxu2 }
 0x109   : > { %v1618_v25 = vpop.f32.mrf.mxu3 }
 0x118   : > { %v1629_v26 = vpop.f32.mrf.mxu0 }
 0x119   : > { %v1642_v27 = vpop.f32.mrf.mxu1 }
 0x11a   : > { %v1643_v34 = vadd.f32 %v1642_v27, %v1629_v26 }
 0x120   : > { %v1655_v28 = vpop.f32.mrf.mxu2  ;;  %v1631_v30 = vpop.f32.mrf.mxu0 }
 0x121   : > { %v1668_v29 = vpop.f32.mrf.mxu3  ;;  %v1644_v31 = vpop.f32.mrf.mxu1  ;;  %v1656_v35 = vadd.f32 %v1655_v28, %v1643_v34 }
 0x123   : > { %v1669_v37 = vadd.f32 %v1668_v29, %v1656_v35 }
 0x128   : > { %v1657_v32 = vpop.f32.mrf.mxu2 }
 0x129   : > { %v1670_v33 = vpop.f32.mrf.mxu3 }
 0x138   : > { %v1681_v38 = vpop.f32.mrf.mxu0 }
 0x139   : > { %v1682_v40 = vadd.f32 %v1681_v38, %v1669_v37  ;;  %v1694_v42 = vpop.f32.mrf.mxu1 }
 0x13b   : > { %v1695_v43 = vadd.f32 %v1694_v42, %v1682_v40 }
 0x13d   : > { %v1778_v44 = vadd.f32 %v1695_v43, %v286_v41 }
 0x13f   : > { %1782 = vst [vmem:[#allocation2 + $0x18] sm:$0xff] %v1778_v44 }
 0x140   : > { %v1707_v45 = vpop.f32.mrf.mxu2  ;;  %v1683_v47 = vpop.f32.mrf.mxu0 }
 0x141   : > { %v1720_v46 = vpop.f32.mrf.mxu3  ;;  %v1696_v48 = vpop.f32.mrf.mxu1 }
 0x142   : > { %v1721_v51 = vadd.f32 %v1720_v46, %v1707_v45 }
 0x148   : > { %v1709_v49 = vpop.f32.mrf.mxu2 }
 0x149   : > { %v1722_v50 = vpop.f32.mrf.mxu3 }
 0x158   : > { %v1733_v52 = vpop.f32.mrf.mxu0 }
 0x159   : > { %v1746_v53 = vpop.f32.mrf.mxu1  ;;  %v1734_v19 = vadd.f32 %v1733_v52, %v1721_v51 }
 0x15b   : > { %v1747_v54 = vadd.f32 %v1746_v53, %v1734_v19 }
 0x160   : > { %v1759_v23 = vpop.f32.mrf.mxu2  ;;  %v1735_v57 = vpop.f32.mrf.mxu0 }
 0x161   : > { %v1760_v55 = vadd.f32 %v1759_v23, %v1747_v54  ;;  %v1772_v56 = vpop.f32.mrf.mxu3  ;;  %v1748_v59 = vpop.f32.mrf.mxu1 }
 0x163   : > { %v1773_v60 = vadd.f32 %v1772_v56, %v1760_v55 }
 0x165   : > { %v1779_v61 = vadd.f32 %v1773_v60, %v287_v58  ;;  %1787 = sbr.rel (%p2820_p7) target bundleno = 532 (0x214), region = 48 }
 0x167   : > { %1783 = vst [vmem:[#allocation2 + $0x8] sm:$0xff] %v1779_v61 }
 0x168   : > { %v1761_v62 = vpop.f32.mrf.mxu2 }
 0x169   : > { %v1774_v63 = vpop.f32.mrf.mxu3 }
 0x16a   : > { %v1865_v0 = vld [vmem:[%s3769_s3 + $0x178] sm:$0xff]  ;;  %v1864_v2 = vld [vmem:[%s3769_s3 + $0x170] sm:$0xff]  ;;  %v1863_v6 = vld [vmem:[%s3769_s3 + $0x168] sm:$0xff] }
 0x16b   : > { %v1833_v1 = vld [vmem:[%s3769_s3 + $0x78] sm:$0xff]  ;;  %1926 = vmatpush.msra.mxu2 %v1865_v0  ;;  %v1832_v4 = vld [vmem:[%s3769_s3 + $0x70] sm:$0xff]  ;;  %v1831_v8 = vld [vmem:[%s3769_s3 + $0x68] sm:$0xff] }
 0x16c   : > { %1886 = vmatpush.msra.mxu0 %v1833_v1  ;;  %v1881_v3 = vld [vmem:[%s3769_s3 + $0x1f8] sm:$0xff]  ;;  %v1880_v7 = vld [vmem:[%s3769_s3 + $0x1f0] sm:$0xff]  ;;  %v1879_v20 = vld [vmem:[%s3769_s3 + $0x1e8] sm:$0xff] }
 0x16d   : > { %v1849_v5 = vld [vmem:[%s3769_s3 + $0xf8] sm:$0xff]  ;;  %1946 = vmatpush.msra.mxu3 %v1881_v3  ;;  %1927 = vmatpush.msra.mxu2 %v1864_v2  ;;  %v1848_v9 = vld [vmem:[%s3769_s3 + $0xf0] sm:$0xff]  ;;  %v1862_v10 = vld [vmem:[%s3769_s3 + $0x160] sm:$0xff] }
 0x16e   : > { %1906 = vmatpush.msra.mxu1 %v1849_v5  ;;  %1887 = vmatpush.msra.mxu0 %v1832_v4  ;;  %v1830_v21 = vld [vmem:[%s3769_s3 + $0x60] sm:$0xff]  ;;  %v1847_v11 = vld [vmem:[%s3769_s3 + $0xe8] sm:$0xff]  ;;  %v1861_v39 = vld [vmem:[%s3769_s3 + $0x158] sm:$0xff] }
 0x16f   : > { %1947 = vmatpush.msra.mxu3 %v1880_v7  ;;  %1928 = vmatpush.msra.mxu2 %v1863_v6  ;;  %v1878_v36 = vld [vmem:[%s3769_s3 + $0x1e0] sm:$0xff]  ;;  %v1829_v13 = vld [vmem:[%s3769_s3 + $0x58] sm:$0xff]  ;;  %v1860_v16 = vld [vmem:[%s3769_s3 + $0x150] sm:$0xff] }
 0x170   : > { %1907 = vmatpush.msra.mxu1 %v1848_v9  ;;  %1888 = vmatpush.msra.mxu0 %v1831_v8  ;;  %v1846_v12 = vld [vmem:[%s3769_s3 + $0xe0] sm:$0xff]  ;;  %v1877_v14 = vld [vmem:[%s3769_s3 + $0x1d8] sm:$0xff]  ;;  %v1828_v17 = vld [vmem:[%s3769_s3 + $0x50] sm:$0xff] }
 0x171   : > { %1948 = vmatpush.msra.mxu3 %v1879_v20  ;;  %1929 = vmatpush.msra.mxu2 %v1862_v10  ;;  %v1845_v15 = vld [vmem:[%s3769_s3 + $0xd8] sm:$0xff]  ;;  %v1876_v18 = vld [vmem:[%s3769_s3 + $0x1d0] sm:$0xff]  ;;  %v1859_v24 = vld [vmem:[%s3769_s3 + $0x148] sm:$0xff] }
 0x172   : > { %1908 = vmatpush.msra.mxu1 %v1847_v11  ;;  %1889 = vmatpush.msra.mxu0 %v1830_v21  ;;  %v1844_v22 = vld [vmem:[%s3769_s3 + $0xd0] sm:$0xff]  ;;  %v1827_v25 = vld [vmem:[%s3769_s3 + $0x48] sm:$0xff]  ;;  %v1858_v28 = vld [vmem:[%s3769_s3 + $0x140] sm:$0xff] }
 0x173   : > { %1949 = vmatpush.msra.mxu3 %v1878_v36  ;;  %1930 = vmatpush.msra.mxu2 %v1861_v39  ;;  %v1875_v26 = vld [vmem:[%s3769_s3 + $0x1c8] sm:$0xff]  ;;  %v1826_v29 = vld [vmem:[%s3769_s3 + $0x40] sm:$0xff]  ;;  %v1857_v32 = vld [vmem:[%s3769_s3 + $0x138] sm:$0xff] }
 0x174   : > { %1909 = vmatpush.msra.mxu1 %v1846_v12  ;;  %1890 = vmatpush.msra.mxu0 %v1829_v13  ;;  %v1843_v27 = vld [vmem:[%s3769_s3 + $0xc8] sm:$0xff]  ;;  %v1874_v30 = vld [vmem:[%s3769_s3 + $0x1c0] sm:$0xff]  ;;  %v1825_v33 = vld [vmem:[%s3769_s3 + $0x38] sm:$0xff] }
 0x175   : > { %1950 = vmatpush.msra.mxu3 %v1877_v14  ;;  %1931 = vmatpush.msra.mxu2 %v1860_v16  ;;  %v1842_v31 = vld [vmem:[%s3769_s3 + $0xc0] sm:$0xff]  ;;  %v1873_v34 = vld [vmem:[%s3769_s3 + $0x1b8] sm:$0xff]  ;;  %v1856_v37 = vld [vmem:[%s3769_s3 + $0x130] sm:$0xff] }
 0x176   : > { %1910 = vmatpush.msra.mxu1 %v1845_v15  ;;  %1891 = vmatpush.msra.mxu0 %v1828_v17  ;;  %v1841_v35 = vld [vmem:[%s3769_s3 + $0xb8] sm:$0xff]  ;;  %v1824_v38 = vld [vmem:[%s3769_s3 + $0x30] sm:$0xff]  ;;  %v1855_v42 = vld [vmem:[%s3769_s3 + $0x128] sm:$0xff] }
 0x177   : > { %1951 = vmatpush.msra.mxu3 %v1876_v18  ;;  %1932 = vmatpush.msra.mxu2 %v1859_v24  ;;  %v1872_v40 = vld [vmem:[%s3769_s3 + $0x1b0] sm:$0xff]  ;;  %v1823_v43 = vld [vmem:[%s3769_s3 + $0x28] sm:$0xff]  ;;  %v1854_v44 = vld [vmem:[%s3769_s3 + $0x120] sm:$0xff] }
 0x178   : > { %1911 = vmatpush.msra.mxu1 %v1844_v22  ;;  %1892 = vmatpush.msra.mxu0 %v1827_v25  ;;  %v1840_v41 = vld [vmem:[%s3769_s3 + $0xb0] sm:$0xff]  ;;  %v1871_v45 = vld [vmem:[%s3769_s3 + $0x1a8] sm:$0xff]  ;;  %v1822_v46 = vld [vmem:[%s3769_s3 + $0x20] sm:$0xff] }
 0x179   : > { %1952 = vmatpush.msra.mxu3 %v1875_v26  ;;  %1933 = vmatpush.msra.mxu2 %v1858_v28  ;;  %v1839_v47 = vld [vmem:[%s3769_s3 + $0xa8] sm:$0xff]  ;;  %v1853_v48 = vld [vmem:[%s3769_s3 + $0x118] sm:$0xff]  ;;  %v1792_v50 = vld [vmem:[%s3768_s2] sm:$0xf] }
 0x17a   : > { %1912 = vmatpush.msra.mxu1 %v1843_v27  ;;  %1893 = vmatpush.msra.mxu0 %v1826_v29  ;;  %v1790_v49 = vld [vmem:[#allocation2 + $0x18] sm:$0xff]  ;;  %v1870_v51 = vld [vmem:[%s3769_s3 + $0x1a0] sm:$0xff]  ;;  %v1796_v53 = vperm.slane %v1792_v50, 2  ;;  %v1788_v19 = vld [vmem:[#allocation2 + $0x10] sm:$0xff]  ;;  %v1794_v54 = vperm.slane %v1792_v50, 0  ;;  %v1797_v23 = vperm.slane %v1792_v50, 3 }
 0x17b   : > { %1953 = vmatpush.msra.mxu3 %v1874_v30  ;;  %1934 = vmatpush.msra.mxu2 %v1857_v32  ;;  %v1838_v52 = vld [vmem:[%s3769_s3 + $0xa0] sm:$0xff]  ;;  %v1821_v55 = vld [vmem:[%s3769_s3 + $0x18] sm:$0xff]  ;;  %v1791_v56 = vld [vmem:[#allocation2 + $0x8] sm:$0xff]  ;;  %v1795_v58 = vperm.slane %v1792_v50, 1 }
 0x17c   : > { %1913 = vmatpush.msra.mxu1 %v1842_v31  ;;  %1894 = vmatpush.msra.mxu0 %v1825_v33  ;;  %v1789_v57 = vld [vmem:[#allocation2] sm:$0xff]  ;;  %v1869_v59 = vld [vmem:[%s3769_s3 + $0x198] sm:$0xff]  ;;  %v1804_v61 = vadd.f32 %v1796_v53, %v1790_v49  ;;  %v1802_v62 = vadd.f32 %v1794_v54, %v1788_v19  ;;  %v1805_v63 = vadd.f32 %v1797_v23, %v1791_v56  ;;  %v1852_v0 = vld [vmem:[%s3769_s3 + $0x110] sm:$0xff] }
 0x17d   : > { %1954 = vmatpush.msra.mxu3 %v1873_v34  ;;  %1935 = vmatpush.msra.mxu2 %v1856_v37  ;;  %v1837_v60 = vld [vmem:[%s3769_s3 + $0x98] sm:$0xff]  ;;  %v1820_v1 = vld [vmem:[%s3769_s3 + $0x10] sm:$0xff]  ;;  %v1803_v2 = vadd.f32 %v1795_v58, %v1789_v57  ;;  %v1851_v3 = vld [vmem:[%s3769_s3 + $0x108] sm:$0xff] }
 0x17e   : > { %1914 = vmatpush.msra.mxu1 %v1841_v35  ;;  %1895 = vmatpush.msra.mxu0 %v1824_v38  ;;  %v1868_v4 = vld [vmem:[%s3769_s3 + $0x190] sm:$0xff]  ;;  %v1812_v6 = vmul.f32 0.01, %v1804_v61  ;;  %v1819_v7 = vld [vmem:[%s3769_s3 + $0x8] sm:$0xff]  ;;  %vm1808_vm0 = vcmp.ge.f32.partialorder %v1804_v61, 0.0  ;;  %vm1806_vm1 = vcmp.ge.f32.partialorder %v1802_v62, 0.0 }
 0x17f   : > { %1955 = vmatpush.msra.mxu3 %v1872_v40  ;;  %1936 = vmatpush.msra.mxu2 %v1855_v42  ;;  %v1836_v5 = vld [vmem:[%s3769_s3 + $0x90] sm:$0xff]  ;;  %v1810_v8 = vmul.f32 0.01, %v1802_v62  ;;  %v1813_v9 = vmul.f32 0.01, %v1805_v63  ;;  %v1867_v20 = vld [vmem:[%s3769_s3 + $0x188] sm:$0xff] }
 0x180   : > { %1915 = vmatpush.msra.mxu1 %v1840_v41  ;;  %1896 = vmatpush.msra.mxu0 %v1823_v43  ;;  %v1835_v10 = vld [vmem:[%s3769_s3 + $0x88] sm:$0xff]  ;;  %vm1809_vm2 = vcmp.ge.f32.partialorder %v1805_v63, 0.0  ;;  %v1850_v21 = vld [vmem:[%s3769_s3 + $0x100] sm:$0xff]  ;;  %v1811_v36 = vmul.f32 0.01, %v1803_v2  ;;  %v1816_v12 = vsel %vm1808_vm0, %v1804_v61, %v1812_v6  ;;  %vm1807_vm3 = vcmp.ge.f32.partialorder %v1803_v2, 0.0 }
 0x181   : > { %1956 = vmatpush.msra.mxu3 %v1871_v45  ;;  %1937 = vmatpush.msra.mxu2 %v1854_v44  ;;  %v1818_v11 = vld [vmem:[%s3769_s3] sm:$0xff]  ;;  %v1814_v13 = vsel %vm1806_vm1, %v1802_v62, %v1810_v8  ;;  %v1817_v14 = vsel %vm1809_vm2, %v1805_v63, %v1813_v9 }
 0x182   : > { %1916 = vmatpush.msra.mxu1 %v1839_v47  ;;  %1897 = vmatpush.msra.mxu0 %v1822_v46  ;;  %v1866_v39 = vld [vmem:[%s3769_s3 + $0x180] sm:$0xff]  ;;  %v1815_v16 = vsel %vm1807_vm3, %v1803_v2, %v1811_v36 }
 0x183   : > { %1957 = vmatpush.msra.mxu3 %v1870_v51  ;;  %1938 = vmatpush.msra.mxu2 %v1853_v48  ;;  %v1834_v15 = vld [vmem:[%s3769_s3 + $0x80] sm:$0xff] }
 0x184   : > { %1917 = vmatpush.msra.mxu1 %v1838_v52  ;;  %1898 = vmatpush.msra.mxu0 %v1821_v55  ;;  %v3042_v17 = vld [vmem:[%s3770_s4] ss:$0 sm:$0xff] }
 0x185   : > { %1958 = vmatpush.msra.mxu3 %v1869_v59  ;;  %1939 = vmatpush.msra.mxu2 %v1852_v0 }
 0x186   : > { %1918 = vmatpush.msra.mxu1 %v1837_v60  ;;  %1899 = vmatpush.msra.mxu0 %v1820_v1 }
 0x187   : > { %1959 = vmatpush.msra.mxu3 %v1868_v4  ;;  %1940 = vmatpush.msra.mxu2 %v1851_v3 }
 0x188   : > { %1919 = vmatpush.msra.mxu1 %v1836_v5  ;;  %1900 = vmatpush.msra.mxu0 %v1819_v7 }
 0x189   : > { %1960 = vmatpush.msra.mxu3 %v1867_v20  ;;  %1941 = vmatpush.msra.mxu2 %v1850_v21 }
 0x18a   : > { %1920 = vmatpush.msra.mxu1 %v1835_v10  ;;  %1901 = vmatpush.msra.mxu0 %v1818_v11 }
 0x18b   : > { %1942 = vmatmul.f32.vlgmr.msra.gmra.mxu2 %v1816_v12  ;;  %1961 = vmatpush.msra.mxu3 %v1866_v39 }
 0x18c   : > { %1902 = vmatmul.f32.vlgmr.msra.gmra.mxu0 %v1814_v13  ;;  %1962 = vmatmul.f32.vlgmr.msra.gmra.mxu3 %v1817_v14 }
 0x18d   : > { %1921 = vmatpush.msra.mxu1 %v1834_v15 }
 0x18e   : > { %1922 = vmatmul.f32.vlgmr.msra.gmra.mxu1 %v1815_v16 }
 0x209   : > { %v1903_v18 = vpop.f32.mrf.mxu0 }
 0x20a   : > { %v1904_v22 = vadd.f32 %v3042_v17, %v1903_v18 }
 0x20b   : > { %v1923_v24 = vpop.f32.mrf.mxu1 }
 0x20c   : > { %v1924_v25 = vadd.f32 %v1923_v24, %v1904_v22 }
 0x20e   : > { %v1943_v26 = vpop.f32.mrf.mxu2 }
 0x20f   : > { %v1944_v27 = vadd.f32 %v1943_v26, %v1924_v25  ;;  %v1963_v28 = vpop.f32.mrf.mxu3 }
 0x211   : > { %v1964_v29 = vadd.f32 %v1963_v28, %v1944_v27 }
 0x213   : > { %1966 = vst [vmem:[%s3771_s5] sm:$0xff] %v1964_v29 }
 0x214 PF: > { %s15_s20 = sadd.s32 1, %s3065_s20   ;;  %s3772_s18 = smov %s3061_s19 }
 0x215   : > { %p12_p8 = scmp.ge.s32.totalorder %s15_s20, 5   ;;  %s3773_s19 = smov %s3775_s21 }
 0x217   :  { %14 = sbr.rel (!%p12_p8) target bundleno = 2 (0x2), region = 81 }

</bundles_post_ra>
